<compile_context>
chip_gen: v7x
topology: tpu7x:2x2x1
jax: 0.10.0
libtpu: 0.0.40
codegen_flags: <defaults>
</compile_context>

<pallas_src>
import functools

import jax
import jax.numpy as jnp
import numpy as np
from jax.experimental import pallas as pl
from jax.experimental.pallas import tpu as pltpu

LANE = 128
SUB = 8


def _round_up(x, m):
    return (x + m - 1) // m * m


def _pick_vmem_limit():
    """~75% of physical VMEM (capped at 100 MiB), 48 MiB fallback."""
    try:
        cap = pltpu.get_tpu_info().vmem_capacity_bytes
    except Exception:
        cap = 64 * 1024 * 1024
    return int(max(32 * 1024 * 1024, min(cap * 3 // 4, 100 * 1024 * 1024)))


def _basic_block_kernel(x_ref, w1_ref, s1_ref, b1_ref, w2_ref, s2_ref, b2_ref,
                        out_ref, act_ref, *, H, W, WP):
    """Fused BasicBlock forward for one image.

    Scratch geometry (flat (HP*WP, C) view, HP = H + 4, WP = round_up(W+2, 8)):
      * the activation lives at scratch rows [2, H+2), columns [1, 1+W);
      * rows 0..1 and H+2..H+3 are zero halo rows (cleared every step, cheap);
      * columns 0 and [1+W, WP) of the interior are the in-row zero halo and
        are rewritten as part of the single interior store each step.
    The (dy, dx) conv tap for all output pixels is then simply flat rows
    [s, s + H*WP) with s = (dy+1)*WP + dx - 1: output position p = r*WP + (j+1)
    reads scratch[r+dy+1, j+dx] = activation[r+dy-1, j+dx-1] (zero outside),
    i.e. exactly a 3x3 / padding=1 convolution.  Valid output columns of the
    flat accumulator are [1, 1+W) of each WP-row chunk.
    """
    C = x_ref.shape[-1]                 # lane-dense channel count (mult. of 128)
    M = H * WP                          # rows of the flat accumulator / interior
    dt = act_ref.dtype

    # Zero only the top/bottom halo rows (4*WP rows total).  Cheap, and done
    # every step so the kernel is megacore-safe without persistent-scratch init.
    act_ref[0:2 * WP, :] = jnp.zeros((2 * WP, C), dt)
    act_ref[(H + 2) * WP:(H + 4) * WP, :] = jnp.zeros((2 * WP, C), dt)

    def conv3x3(w_ref):
        # 9 MXU matmuls (K = C), partials accumulated as f32 values (no
        # accumulator scratch / no VMEM read-modify-write passes).
        acc = None
        for dy in range(3):
            for dx in range(3):
                s = (dy + 1) * WP + dx - 1
                lhs = act_ref[s:s + M, :]                       # (M, C)
                t = jnp.dot(lhs, w_ref[3 * dy + dx],
                            preferred_element_type=jnp.float32)
                acc = t if acc is None else acc + t
        return acc                                              # (M, C) f32

    # x arrives already zero-padded along W (cols [1, 1+W) hold the image), so
    # a single aligned store writes both the data and the in-row zero halo.
    x_flat = x_ref[0].reshape(M, C)                             # (M, C) compute dt

    # ---- conv1 + BN1 + ReLU --------------------------------------------------
    act_ref[2 * WP:(H + 2) * WP, :] = x_flat
    h = jnp.maximum(conv3x3(w1_ref) * s1_ref[...] + b1_ref[...], 0.0)   # (M,C) f32

    # ---- re-im2col h (mask junk halo columns -> they become conv2's padding) -
    col = jax.lax.broadcasted_iota(jnp.int32, (H, WP, 1), 1)
    valid = (col >= 1) & (col < 1 + W)
    h3 = jnp.where(valid, h.reshape(H, WP, C), 0.0)
    act_ref[2 * WP:(H + 2) * WP, :] = h3.reshape(M, C).astype(dt)

    # ---- conv2 + BN2 + residual + ReLU ---------------------------------------
    y = conv3x3(w2_ref) * s2_ref[...] + b2_ref[...]             # (M, C) f32
    y = jnp.maximum(y + x_flat.astype(jnp.float32), 0.0)        # residual add
    y = y.reshape(H, WP, C)[:, 1:1 + W, :]                      # drop halo cols
    out_ref[...] = y[None].astype(out_ref.dtype)


def _fold_conv_weights(w_oihw, c_pad, dtype):
    """(Cout, Cin, 3, 3) OIHW -> (9, Cp, Cp): one (Cin, Cout) slab per (dy, dx) tap."""
    cout, cin, _, _ = w_oihw.shape
    w = jnp.transpose(w_oihw, (2, 3, 1, 0))                     # (dy, dx, cin, cout)
    w = jnp.pad(w, ((0, 0), (0, 0), (0, c_pad - cin), (0, c_pad - cout)))
    return w.reshape(9, c_pad, c_pad).astype(dtype)


def _pad_vec(v, c_pad):
    # NOTE: padded lanes MUST stay zero (zero bias keeps padded channels at 0
    # through ReLU so no garbage survives into HBM).
    return jnp.pad(v.astype(jnp.float32), (0, c_pad - v.shape[0])).reshape(1, c_pad)


def basic_block_forward(x_nchw, params, *, compute_dtype=jnp.bfloat16, out_dtype=None):
    """BasicBlock.forward (stride=1, down_sample=None). NCHW in / NCHW out.

    compute_dtype is the MXU-boundary dtype (input / weights / im2col scratch);
    accumulation and the BN/residual epilogue are always f32.  In the bf16
    path the residual adds the bf16-quantized input (documented deviation).
    """
    N, C, H, W = x_nchw.shape
    assert params["w1_oihw"].shape[1] == C and params["w2_oihw"].shape[0] == C, \
        "identity residual needs out_ch == in_ch"
    if out_dtype is None:
        out_dtype = compute_dtype
    Cp = _round_up(max(C, LANE), LANE)          # lane-dense channels
    WP = _round_up(W + 2, SUB)                  # padded row width (>= W + 2)

    # Layout transform at the module boundary: NCHW -> NHWC, pad W (left zero
    # col + right halo) and channels in ONE pad op.
    x = jnp.transpose(x_nchw, (0, 2, 3, 1)).astype(compute_dtype)
    x = jnp.pad(x, ((0, 0), (0, 0), (1, WP - 1 - W), (0, Cp - C)))

    w1 = _fold_conv_weights(params["w1_oihw"], Cp, compute_dtype)
    w2 = _fold_conv_weights(params["w2_oihw"], Cp, compute_dtype)
    s1, b1 = _pad_vec(params["s1"], Cp), _pad_vec(params["b1"], Cp)
    s2, b2 = _pad_vec(params["s2"], Cp), _pad_vec(params["b2"], Cp)

    kernel = functools.partial(_basic_block_kernel, H=H, W=W, WP=WP)

    out = pl.pallas_call(
        kernel,
        out_shape=jax.ShapeDtypeStruct((N, H, W, Cp), out_dtype),
        grid=(N,),
        in_specs=[
            pl.BlockSpec((1, H, WP, Cp), lambda i: (i, 0, 0, 0)),
            pl.BlockSpec((9, Cp, Cp), lambda i: (0, 0, 0)),
            pl.BlockSpec((1, Cp), lambda i: (0, 0)),
            pl.BlockSpec((1, Cp), lambda i: (0, 0)),
            pl.BlockSpec((9, Cp, Cp), lambda i: (0, 0, 0)),
            pl.BlockSpec((1, Cp), lambda i: (0, 0)),
            pl.BlockSpec((1, Cp), lambda i: (0, 0)),
        ],
        out_specs=pl.BlockSpec((1, H, W, Cp), lambda i: (i, 0, 0, 0)),
        scratch_shapes=[
            pltpu.VMEM(((H + 4) * WP, Cp), compute_dtype),   # single flat im2col
        ],
        compiler_params=pltpu.CompilerParams(
            dimension_semantics=("parallel",),
            vmem_limit_bytes=_pick_vmem_limit(),
        ),
    )(x, w1, s1, b1, w2, s2, b2)

    out = out[..., :C]                                       # drop channel padding
    return jnp.transpose(out, (0, 3, 1, 2))                  # NHWC -> NCHW


def init_params(key, in_channels, out_channels, eps=1e-5):
    k1, k2, k3, k4 = jax.random.split(key, 4)
    w1_oihw = 0.1 * jax.random.normal(k1, (out_channels, in_channels, 3, 3), jnp.float32)
    w2_oihw = 0.1 * jax.random.normal(k2, (out_channels, out_channels, 3, 3), jnp.float32)

    # Deterministic BatchNorm params / running stats, folded to scale & bias.
    gamma1 = 1.0 + 0.1 * jax.random.normal(k3, (out_channels,), jnp.float32)
    beta1 = 0.05 * jnp.arange(out_channels, dtype=jnp.float32)
    mean1 = 0.01 * jnp.arange(out_channels, dtype=jnp.float32)
    var1 = 1.5 * jnp.ones((out_channels,), jnp.float32)
    gamma2 = 1.0 + 0.1 * jax.random.normal(k4, (out_channels,), jnp.float32)
    beta2 = -0.03 * jnp.arange(out_channels, dtype=jnp.float32)
    mean2 = -0.02 * jnp.arange(out_channels, dtype=jnp.float32)
    var2 = 0.8 * jnp.ones((out_channels,), jnp.float32)

    s1 = gamma1 / jnp.sqrt(var1 + eps)
    b1 = beta1 - mean1 * s1
    s2 = gamma2 / jnp.sqrt(var2 + eps)
    b2 = beta2 - mean2 * s2
    return dict(w1_oihw=w1_oihw, w2_oihw=w2_oihw, s1=s1, b1=b1, s2=s2, b2=b2)


def ref_forward(x_nchw, p):
    """Pure-JAX reference (NCHW, same semantics) for verification."""
    def conv(x, w):
        return jax.lax.conv_general_dilated(
            x, w, window_strides=(1, 1), padding=((1, 1), (1, 1)),
            dimension_numbers=("NCHW", "OIHW", "NCHW"))

    h = conv(x_nchw, p["w1_oihw"]) * p["s1"][None, :, None, None] + p["b1"][None, :, None, None]
    h = jnp.maximum(h, 0.0)
    o = conv(h, p["w2_oihw"]) * p["s2"][None, :, None, None] + p["b2"][None, :, None, None]
    return jnp.maximum(o + x_nchw, 0.0)


if __name__ == "__main__":
    key = jax.random.PRNGKey(0)
    kx, kp = jax.random.split(key)
    N, C, H, W = 2, 4, 16, 16                       # NCHW, like the PyTorch module
    x = jax.random.normal(kx, (N, C, H, W), jnp.float32)
    params = init_params(kp, in_channels=C, out_channels=C)

    ref = ref_forward(x, params)

    # f32 MXU-boundary path: tight correctness check.
    out_f32 = jax.block_until_ready(
        basic_block_forward(x, params, compute_dtype=jnp.float32))
    assert out_f32.shape == (N, C, H, W)
    np.testing.assert_allclose(np.asarray(out_f32), np.asarray(ref), rtol=1e-4, atol=1e-4)

    # Default bf16 MXU-boundary path (f32 accumulation + epilogue): loose check.
    out_bf16 = jax.block_until_ready(basic_block_forward(x, params))
    np.testing.assert_allclose(np.asarray(jnp.asarray(out_bf16, jnp.float32)),
                               np.asarray(ref), rtol=0.1, atol=0.1)

    print("KERNEL_OK")
</pallas_src>

<mosaic_0001>
module attributes {stable_mosaic.version = 11 : i64} {
  func.func @_basic_block_kernel(%arg0: i32, %arg1: memref<1x16x24x128xf32, #tpu.memory_space<vmem>>, %arg2: memref<9x128x128xf32, #tpu.memory_space<vmem>>, %arg3: memref<1x128xf32, #tpu.memory_space<vmem>>, %arg4: memref<1x128xf32, #tpu.memory_space<vmem>>, %arg5: memref<9x128x128xf32, #tpu.memory_space<vmem>>, %arg6: memref<1x128xf32, #tpu.memory_space<vmem>>, %arg7: memref<1x128xf32, #tpu.memory_space<vmem>>, %arg8: memref<1x16x16x128xf32, #tpu.memory_space<vmem>>, %arg9: memref<480x128xf32, #tpu.memory_space<vmem>>) attributes {dimension_semantics = [#tpu.dimension_semantics<parallel>], iteration_bounds = array<i64: 2>, scalar_prefetch = 0 : i64, scratch_operands = 1 : i64, tpu.core_type = #tpu.core_type<tc>, window_params = [{transform_indices = @transform_0, window_bounds = array<i64: 1, 16, 24, 128>}, {pipeline_mode = #tpu.pipeline_mode<synchronous>, transform_indices = @transform_1, window_bounds = array<i64: 9, 128, 128>}, {pipeline_mode = #tpu.pipeline_mode<synchronous>, transform_indices = @transform_2, window_bounds = array<i64: 1, 128>}, {pipeline_mode = #tpu.pipeline_mode<synchronous>, transform_indices = @transform_3, window_bounds = array<i64: 1, 128>}, {pipeline_mode = #tpu.pipeline_mode<synchronous>, transform_indices = @transform_4, window_bounds = array<i64: 9, 128, 128>}, {pipeline_mode = #tpu.pipeline_mode<synchronous>, transform_indices = @transform_5, window_bounds = array<i64: 1, 128>}, {pipeline_mode = #tpu.pipeline_mode<synchronous>, transform_indices = @transform_6, window_bounds = array<i64: 1, 128>}, {transform_indices = @transform_7, window_bounds = array<i64: 1, 16, 16, 128>}]} {
    %cst = arith.constant 0.000000e+00 : f32
    %0 = vector.broadcast %cst : f32 to vector<48x128xf32>
    %c0 = arith.constant 0 : index
    %c0_0 = arith.constant 0 : index
    %1 = vector.load %arg9[%c0, %c0_0] : memref<480x128xf32, #tpu.memory_space<vmem>>, vector<48x128xf32>
    tpu.vector_store %arg9[%c0, %c0_0], %0 {strides = array<i32>} : memref<480x128xf32, #tpu.memory_space<vmem>>, vector<48x128xf32>,
    %cst_1 = arith.constant 0.000000e+00 : f32
    %2 = vector.broadcast %cst_1 : f32 to vector<48x128xf32>
    %c432 = arith.constant 432 : index
    %c0_2 = arith.constant 0 : index
    %3 = vector.load %arg9[%c432, %c0_2] : memref<480x128xf32, #tpu.memory_space<vmem>>, vector<48x128xf32>
    tpu.vector_store %arg9[%c432, %c0_2], %2 {strides = array<i32>} : memref<480x128xf32, #tpu.memory_space<vmem>>, vector<48x128xf32>,
    %c0_3 = arith.constant 0 : index
    %c0_4 = arith.constant 0 : index
    %c0_5 = arith.constant 0 : index
    %c0_6 = arith.constant 0 : index
    %4 = vector.load %arg1[%c0_3, %c0_4, %c0_5, %c0_6] : memref<1x16x24x128xf32, #tpu.memory_space<vmem>>, vector<1x16x24x128xf32>
    %5 = vector.shape_cast %4 : vector<1x16x24x128xf32> to vector<16x24x128xf32>
    %6 = vector.shape_cast %5 : vector<16x24x128xf32> to vector<384x128xf32>
    %c48 = arith.constant 48 : index
    %c0_7 = arith.constant 0 : index
    %7 = vector.load %arg9[%c48, %c0_7] : memref<480x128xf32, #tpu.memory_space<vmem>>, vector<384x128xf32>
    tpu.vector_store %arg9[%c48, %c0_7], %6 {strides = array<i32>} : memref<480x128xf32, #tpu.memory_space<vmem>>, vector<384x128xf32>,
    %c23 = arith.constant 23 : index
    %c0_8 = arith.constant 0 : index
    %8 = vector.load %arg9[%c23, %c0_8] : memref<480x128xf32, #tpu.memory_space<vmem>>, vector<384x128xf32>
    %c0_9 = arith.constant 0 : index
    %c0_10 = arith.constant 0 : index
    %c0_11 = arith.constant 0 : index
    %9 = vector.load %arg2[%c0_9, %c0_10, %c0_11] : memref<9x128x128xf32, #tpu.memory_space<vmem>>, vector<1x128x128xf32>
    %10 = vector.shape_cast %9 : vector<1x128x128xf32> to vector<128x128xf32>
    %cst_12 = arith.constant dense<0.000000e+00> : vector<384x128xf32>
    %11 = tpu.matmul %8, %10, %cst_12 {dimension_numbers = #tpu.dot_dimension_numbers<[1], [0], [0], [1], [0, 0, 1, 1], [], []>} : vector<384x128xf32>, vector<128x128xf32>, vector<384x128xf32> -> vector<384x128xf32>
    %c24 = arith.constant 24 : index
    %c0_13 = arith.constant 0 : index
    %12 = vector.load %arg9[%c24, %c0_13] : memref<480x128xf32, #tpu.memory_space<vmem>>, vector<384x128xf32>
    %c1 = arith.constant 1 : index
    %c0_14 = arith.constant 0 : index
    %c0_15 = arith.constant 0 : index
    %13 = vector.load %arg2[%c1, %c0_14, %c0_15] : memref<9x128x128xf32, #tpu.memory_space<vmem>>, vector<1x128x128xf32>
    %14 = vector.shape_cast %13 : vector<1x128x128xf32> to vector<128x128xf32>
    %cst_16 = arith.constant dense<0.000000e+00> : vector<384x128xf32>
    %15 = tpu.matmul %12, %14, %cst_16 {dimension_numbers = #tpu.dot_dimension_numbers<[1], [0], [0], [1], [0, 0, 1, 1], [], []>} : vector<384x128xf32>, vector<128x128xf32>, vector<384x128xf32> -> vector<384x128xf32>
    %16 = arith.addf %11, %15 : vector<384x128xf32>
    %c25 = arith.constant 25 : index
    %c0_17 = arith.constant 0 : index
    %17 = vector.load %arg9[%c25, %c0_17] : memref<480x128xf32, #tpu.memory_space<vmem>>, vector<384x128xf32>
    %c2 = arith.constant 2 : index
    %c0_18 = arith.constant 0 : index
    %c0_19 = arith.constant 0 : index
    %18 = vector.load %arg2[%c2, %c0_18, %c0_19] : memref<9x128x128xf32, #tpu.memory_space<vmem>>, vector<1x128x128xf32>
    %19 = vector.shape_cast %18 : vector<1x128x128xf32> to vector<128x128xf32>
    %cst_20 = arith.constant dense<0.000000e+00> : vector<384x128xf32>
    %20 = tpu.matmul %17, %19, %cst_20 {dimension_numbers = #tpu.dot_dimension_numbers<[1], [0], [0], [1], [0, 0, 1, 1], [], []>} : vector<384x128xf32>, vector<128x128xf32>, vector<384x128xf32> -> vector<384x128xf32>
    %21 = arith.addf %16, %20 : vector<384x128xf32>
    %c47 = arith.constant 47 : index
    %c0_21 = arith.constant 0 : index
    %22 = vector.load %arg9[%c47, %c0_21] : memref<480x128xf32, #tpu.memory_space<vmem>>, vector<384x128xf32>
    %c3 = arith.constant 3 : index
    %c0_22 = arith.constant 0 : index
    %c0_23 = arith.constant 0 : index
    %23 = vector.load %arg2[%c3, %c0_22, %c0_23] : memref<9x128x128xf32, #tpu.memory_space<vmem>>, vector<1x128x128xf32>
    %24 = vector.shape_cast %23 : vector<1x128x128xf32> to vector<128x128xf32>
    %cst_24 = arith.constant dense<0.000000e+00> : vector<384x128xf32>
    %25 = tpu.matmul %22, %24, %cst_24 {dimension_numbers = #tpu.dot_dimension_numbers<[1], [0], [0], [1], [0, 0, 1, 1], [], []>} : vector<384x128xf32>, vector<128x128xf32>, vector<384x128xf32> -> vector<384x128xf32>
    %26 = arith.addf %21, %25 : vector<384x128xf32>
    %c48_25 = arith.constant 48 : index
    %c0_26 = arith.constant 0 : index
    %27 = vector.load %arg9[%c48_25, %c0_26] : memref<480x128xf32, #tpu.memory_space<vmem>>, vector<384x128xf32>
    %c4 = arith.constant 4 : index
    %c0_27 = arith.constant 0 : index
    %c0_28 = arith.constant 0 : index
    %28 = vector.load %arg2[%c4, %c0_27, %c0_28] : memref<9x128x128xf32, #tpu.memory_space<vmem>>, vector<1x128x128xf32>
    %29 = vector.shape_cast %28 : vector<1x128x128xf32> to vector<128x128xf32>
    %cst_29 = arith.constant dense<0.000000e+00> : vector<384x128xf32>
    %30 = tpu.matmul %27, %29, %cst_29 {dimension_numbers = #tpu.dot_dimension_numbers<[1], [0], [0], [1], [0, 0, 1, 1], [], []>} : vector<384x128xf32>, vector<128x128xf32>, vector<384x128xf32> -> vector<384x128xf32>
    %31 = arith.addf %26, %30 : vector<384x128xf32>
    %c49 = arith.constant 49 : index
    %c0_30 = arith.constant 0 : index
    %32 = vector.load %arg9[%c49, %c0_30] : memref<480x128xf32, #tpu.memory_space<vmem>>, vector<384x128xf32>
    %c5 = arith.constant 5 : index
    %c0_31 = arith.constant 0 : index
    %c0_32 = arith.constant 0 : index
    %33 = vector.load %arg2[%c5, %c0_31, %c0_32] : memref<9x128x128xf32, #tpu.memory_space<vmem>>, vector<1x128x128xf32>
    %34 = vector.shape_cast %33 : vector<1x128x128xf32> to vector<128x128xf32>
    %cst_33 = arith.constant dense<0.000000e+00> : vector<384x128xf32>
    %35 = tpu.matmul %32, %34, %cst_33 {dimension_numbers = #tpu.dot_dimension_numbers<[1], [0], [0], [1], [0, 0, 1, 1], [], []>} : vector<384x128xf32>, vector<128x128xf32>, vector<384x128xf32> -> vector<384x128xf32>
    %36 = arith.addf %31, %35 : vector<384x128xf32>
    %c71 = arith.constant 71 : index
    %c0_34 = arith.constant 0 : index
    %37 = vector.load %arg9[%c71, %c0_34] : memref<480x128xf32, #tpu.memory_space<vmem>>, vector<384x128xf32>
    %c6 = arith.constant 6 : index
    %c0_35 = arith.constant 0 : index
    %c0_36 = arith.constant 0 : index
    %38 = vector.load %arg2[%c6, %c0_35, %c0_36] : memref<9x128x128xf32, #tpu.memory_space<vmem>>, vector<1x128x128xf32>
    %39 = vector.shape_cast %38 : vector<1x128x128xf32> to vector<128x128xf32>
    %cst_37 = arith.constant dense<0.000000e+00> : vector<384x128xf32>
    %40 = tpu.matmul %37, %39, %cst_37 {dimension_numbers = #tpu.dot_dimension_numbers<[1], [0], [0], [1], [0, 0, 1, 1], [], []>} : vector<384x128xf32>, vector<128x128xf32>, vector<384x128xf32> -> vector<384x128xf32>
    %41 = arith.addf %36, %40 : vector<384x128xf32>
    %c72 = arith.constant 72 : index
    %c0_38 = arith.constant 0 : index
    %42 = vector.load %arg9[%c72, %c0_38] : memref<480x128xf32, #tpu.memory_space<vmem>>, vector<384x128xf32>
    %c7 = arith.constant 7 : index
    %c0_39 = arith.constant 0 : index
    %c0_40 = arith.constant 0 : index
    %43 = vector.load %arg2[%c7, %c0_39, %c0_40] : memref<9x128x128xf32, #tpu.memory_space<vmem>>, vector<1x128x128xf32>
    %44 = vector.shape_cast %43 : vector<1x128x128xf32> to vector<128x128xf32>
    %cst_41 = arith.constant dense<0.000000e+00> : vector<384x128xf32>
    %45 = tpu.matmul %42, %44, %cst_41 {dimension_numbers = #tpu.dot_dimension_numbers<[1], [0], [0], [1], [0, 0, 1, 1], [], []>} : vector<384x128xf32>, vector<128x128xf32>, vector<384x128xf32> -> vector<384x128xf32>
    %46 = arith.addf %41, %45 : vector<384x128xf32>
    %c73 = arith.constant 73 : index
    %c0_42 = arith.constant 0 : index
    %47 = vector.load %arg9[%c73, %c0_42] : memref<480x128xf32, #tpu.memory_space<vmem>>, vector<384x128xf32>
    %c8 = arith.constant 8 : index
    %c0_43 = arith.constant 0 : index
    %c0_44 = arith.constant 0 : index
    %48 = vector.load %arg2[%c8, %c0_43, %c0_44] : memref<9x128x128xf32, #tpu.memory_space<vmem>>, vector<1x128x128xf32>
    %49 = vector.shape_cast %48 : vector<1x128x128xf32> to vector<128x128xf32>
    %cst_45 = arith.constant dense<0.000000e+00> : vector<384x128xf32>
    %50 = tpu.matmul %47, %49, %cst_45 {dimension_numbers = #tpu.dot_dimension_numbers<[1], [0], [0], [1], [0, 0, 1, 1], [], []>} : vector<384x128xf32>, vector<128x128xf32>, vector<384x128xf32> -> vector<384x128xf32>
    %51 = arith.addf %46, %50 : vector<384x128xf32>
    %c0_46 = arith.constant 0 : index
    %c0_47 = arith.constant 0 : index
    %52 = vector.load %arg3[%c0_46, %c0_47] : memref<1x128xf32, #tpu.memory_space<vmem>>, vector<1x128xf32>
    %53 = vector.broadcast %52 : vector<1x128xf32> to vector<384x128xf32>
    %54 = arith.mulf %51, %53 : vector<384x128xf32>
    %c0_48 = arith.constant 0 : index
    %c0_49 = arith.constant 0 : index
    %55 = vector.load %arg4[%c0_48, %c0_49] : memref<1x128xf32, #tpu.memory_space<vmem>>, vector<1x128xf32>
    %56 = vector.broadcast %55 : vector<1x128xf32> to vector<384x128xf32>
    %57 = arith.addf %54, %56 : vector<384x128xf32>
    %cst_50 = arith.constant 0.000000e+00 : f32
    %58 = vector.broadcast %cst_50 : f32 to vector<384x128xf32>
    %59 = arith.maximumf %57, %58 : vector<384x128xf32>
    %60 = tpu.iota {dimensions = array<i32: 1>} : vector<16x24x1xi32>
    %c1_i32 = arith.constant 1 : i32
    %61 = vector.broadcast %c1_i32 : i32 to vector<16x24x1xi32>
    %62 = arith.cmpi sge, %60, %61 : vector<16x24x1xi32>
    %c17_i32 = arith.constant 17 : i32
    %63 = vector.broadcast %c17_i32 : i32 to vector<16x24x1xi32>
    %64 = arith.cmpi slt, %60, %63 : vector<16x24x1xi32>
    %65 = arith.andi %62, %64 : vector<16x24x1xi1>
    %66 = vector.shape_cast %59 : vector<384x128xf32> to vector<16x24x128xf32>
    %cst_51 = arith.constant 0.000000e+00 : f32
    %67 = vector.shape_cast %65 : vector<16x24x1xi1> to vector<16x24x1xi1>
    %68 = vector.broadcast %67 : vector<16x24x1xi1> to vector<16x24x128xi1>
    %69 = vector.broadcast %cst_51 : f32 to vector<16x24x128xf32>
    %70 = arith.select %68, %66, %69 : vector<16x24x128xi1>, vector<16x24x128xf32>
    %71 = vector.shape_cast %70 : vector<16x24x128xf32> to vector<384x128xf32>
    %c48_52 = arith.constant 48 : index
    %c0_53 = arith.constant 0 : index
    %72 = vector.load %arg9[%c48_52, %c0_53] : memref<480x128xf32, #tpu.memory_space<vmem>>, vector<384x128xf32>
    tpu.vector_store %arg9[%c48_52, %c0_53], %71 {strides = array<i32>} : memref<480x128xf32, #tpu.memory_space<vmem>>, vector<384x128xf32>,
    %c23_54 = arith.constant 23 : index
    %c0_55 = arith.constant 0 : index
    %73 = vector.load %arg9[%c23_54, %c0_55] : memref<480x128xf32, #tpu.memory_space<vmem>>, vector<384x128xf32>
    %c0_56 = arith.constant 0 : index
    %c0_57 = arith.constant 0 : index
    %c0_58 = arith.constant 0 : index
    %74 = vector.load %arg5[%c0_56, %c0_57, %c0_58] : memref<9x128x128xf32, #tpu.memory_space<vmem>>, vector<1x128x128xf32>
    %75 = vector.shape_cast %74 : vector<1x128x128xf32> to vector<128x128xf32>
    %cst_59 = arith.constant dense<0.000000e+00> : vector<384x128xf32>
    %76 = tpu.matmul %73, %75, %cst_59 {dimension_numbers = #tpu.dot_dimension_numbers<[1], [0], [0], [1], [0, 0, 1, 1], [], []>} : vector<384x128xf32>, vector<128x128xf32>, vector<384x128xf32> -> vector<384x128xf32>
    %c24_60 = arith.constant 24 : index
    %c0_61 = arith.constant 0 : index
    %77 = vector.load %arg9[%c24_60, %c0_61] : memref<480x128xf32, #tpu.memory_space<vmem>>, vector<384x128xf32>
    %c1_62 = arith.constant 1 : index
    %c0_63 = arith.constant 0 : index
    %c0_64 = arith.constant 0 : index
    %78 = vector.load %arg5[%c1_62, %c0_63, %c0_64] : memref<9x128x128xf32, #tpu.memory_space<vmem>>, vector<1x128x128xf32>
    %79 = vector.shape_cast %78 : vector<1x128x128xf32> to vector<128x128xf32>
    %cst_65 = arith.constant dense<0.000000e+00> : vector<384x128xf32>
    %80 = tpu.matmul %77, %79, %cst_65 {dimension_numbers = #tpu.dot_dimension_numbers<[1], [0], [0], [1], [0, 0, 1, 1], [], []>} : vector<384x128xf32>, vector<128x128xf32>, vector<384x128xf32> -> vector<384x128xf32>
    %81 = arith.addf %76, %80 : vector<384x128xf32>
    %c25_66 = arith.constant 25 : index
    %c0_67 = arith.constant 0 : index
    %82 = vector.load %arg9[%c25_66, %c0_67] : memref<480x128xf32, #tpu.memory_space<vmem>>, vector<384x128xf32>
    %c2_68 = arith.constant 2 : index
    %c0_69 = arith.constant 0 : index
    %c0_70 = arith.constant 0 : index
    %83 = vector.load %arg5[%c2_68, %c0_69, %c0_70] : memref<9x128x128xf32, #tpu.memory_space<vmem>>, vector<1x128x128xf32>
    %84 = vector.shape_cast %83 : vector<1x128x128xf32> to vector<128x128xf32>
    %cst_71 = arith.constant dense<0.000000e+00> : vector<384x128xf32>
    %85 = tpu.matmul %82, %84, %cst_71 {dimension_numbers = #tpu.dot_dimension_numbers<[1], [0], [0], [1], [0, 0, 1, 1], [], []>} : vector<384x128xf32>, vector<128x128xf32>, vector<384x128xf32> -> vector<384x128xf32>
    %86 = arith.addf %81, %85 : vector<384x128xf32>
    %c47_72 = arith.constant 47 : index
    %c0_73 = arith.constant 0 : index
    %87 = vector.load %arg9[%c47_72, %c0_73] : memref<480x128xf32, #tpu.memory_space<vmem>>, vector<384x128xf32>
    %c3_74 = arith.constant 3 : index
    %c0_75 = arith.constant 0 : index
    %c0_76 = arith.constant 0 : index
    %88 = vector.load %arg5[%c3_74, %c0_75, %c0_76] : memref<9x128x128xf32, #tpu.memory_space<vmem>>, vector<1x128x128xf32>
    %89 = vector.shape_cast %88 : vector<1x128x128xf32> to vector<128x128xf32>
    %cst_77 = arith.constant dense<0.000000e+00> : vector<384x128xf32>
    %90 = tpu.matmul %87, %89, %cst_77 {dimension_numbers = #tpu.dot_dimension_numbers<[1], [0], [0], [1], [0, 0, 1, 1], [], []>} : vector<384x128xf32>, vector<128x128xf32>, vector<384x128xf32> -> vector<384x128xf32>
    %91 = arith.addf %86, %90 : vector<384x128xf32>
    %c48_78 = arith.constant 48 : index
    %c0_79 = arith.constant 0 : index
    %92 = vector.load %arg9[%c48_78, %c0_79] : memref<480x128xf32, #tpu.memory_space<vmem>>, vector<384x128xf32>
    %c4_80 = arith.constant 4 : index
    %c0_81 = arith.constant 0 : index
    %c0_82 = arith.constant 0 : index
    %93 = vector.load %arg5[%c4_80, %c0_81, %c0_82] : memref<9x128x128xf32, #tpu.memory_space<vmem>>, vector<1x128x128xf32>
    %94 = vector.shape_cast %93 : vector<1x128x128xf32> to vector<128x128xf32>
    %cst_83 = arith.constant dense<0.000000e+00> : vector<384x128xf32>
    %95 = tpu.matmul %92, %94, %cst_83 {dimension_numbers = #tpu.dot_dimension_numbers<[1], [0], [0], [1], [0, 0, 1, 1], [], []>} : vector<384x128xf32>, vector<128x128xf32>, vector<384x128xf32> -> vector<384x128xf32>
    %96 = arith.addf %91, %95 : vector<384x128xf32>
    %c49_84 = arith.constant 49 : index
    %c0_85 = arith.constant 0 : index
    %97 = vector.load %arg9[%c49_84, %c0_85] : memref<480x128xf32, #tpu.memory_space<vmem>>, vector<384x128xf32>
    %c5_86 = arith.constant 5 : index
    %c0_87 = arith.constant 0 : index
    %c0_88 = arith.constant 0 : index
    %98 = vector.load %arg5[%c5_86, %c0_87, %c0_88] : memref<9x128x128xf32, #tpu.memory_space<vmem>>, vector<1x128x128xf32>
    %99 = vector.shape_cast %98 : vector<1x128x128xf32> to vector<128x128xf32>
    %cst_89 = arith.constant dense<0.000000e+00> : vector<384x128xf32>
    %100 = tpu.matmul %97, %99, %cst_89 {dimension_numbers = #tpu.dot_dimension_numbers<[1], [0], [0], [1], [0, 0, 1, 1], [], []>} : vector<384x128xf32>, vector<128x128xf32>, vector<384x128xf32> -> vector<384x128xf32>
    %101 = arith.addf %96, %100 : vector<384x128xf32>
    %c71_90 = arith.constant 71 : index
    %c0_91 = arith.constant 0 : index
    %102 = vector.load %arg9[%c71_90, %c0_91] : memref<480x128xf32, #tpu.memory_space<vmem>>, vector<384x128xf32>
    %c6_92 = arith.constant 6 : index
    %c0_93 = arith.constant 0 : index
    %c0_94 = arith.constant 0 : index
    %103 = vector.load %arg5[%c6_92, %c0_93, %c0_94] : memref<9x128x128xf32, #tpu.memory_space<vmem>>, vector<1x128x128xf32>
    %104 = vector.shape_cast %103 : vector<1x128x128xf32> to vector<128x128xf32>
    %cst_95 = arith.constant dense<0.000000e+00> : vector<384x128xf32>
    %105 = tpu.matmul %102, %104, %cst_95 {dimension_numbers = #tpu.dot_dimension_numbers<[1], [0], [0], [1], [0, 0, 1, 1], [], []>} : vector<384x128xf32>, vector<128x128xf32>, vector<384x128xf32> -> vector<384x128xf32>
    %106 = arith.addf %101, %105 : vector<384x128xf32>
    %c72_96 = arith.constant 72 : index
    %c0_97 = arith.constant 0 : index
    %107 = vector.load %arg9[%c72_96, %c0_97] : memref<480x128xf32, #tpu.memory_space<vmem>>, vector<384x128xf32>
    %c7_98 = arith.constant 7 : index
    %c0_99 = arith.constant 0 : index
    %c0_100 = arith.constant 0 : index
    %108 = vector.load %arg5[%c7_98, %c0_99, %c0_100] : memref<9x128x128xf32, #tpu.memory_space<vmem>>, vector<1x128x128xf32>
    %109 = vector.shape_cast %108 : vector<1x128x128xf32> to vector<128x128xf32>
    %cst_101 = arith.constant dense<0.000000e+00> : vector<384x128xf32>
    %110 = tpu.matmul %107, %109, %cst_101 {dimension_numbers = #tpu.dot_dimension_numbers<[1], [0], [0], [1], [0, 0, 1, 1], [], []>} : vector<384x128xf32>, vector<128x128xf32>, vector<384x128xf32> -> vector<384x128xf32>
    %111 = arith.addf %106, %110 : vector<384x128xf32>
    %c73_102 = arith.constant 73 : index
    %c0_103 = arith.constant 0 : index
    %112 = vector.load %arg9[%c73_102, %c0_103] : memref<480x128xf32, #tpu.memory_space<vmem>>, vector<384x128xf32>
    %c8_104 = arith.constant 8 : index
    %c0_105 = arith.constant 0 : index
    %c0_106 = arith.constant 0 : index
    %113 = vector.load %arg5[%c8_104, %c0_105, %c0_106] : memref<9x128x128xf32, #tpu.memory_space<vmem>>, vector<1x128x128xf32>
    %114 = vector.shape_cast %113 : vector<1x128x128xf32> to vector<128x128xf32>
    %cst_107 = arith.constant dense<0.000000e+00> : vector<384x128xf32>
    %115 = tpu.matmul %112, %114, %cst_107 {dimension_numbers = #tpu.dot_dimension_numbers<[1], [0], [0], [1], [0, 0, 1, 1], [], []>} : vector<384x128xf32>, vector<128x128xf32>, vector<384x128xf32> -> vector<384x128xf32>
    %116 = arith.addf %111, %115 : vector<384x128xf32>
    %c0_108 = arith.constant 0 : index
    %c0_109 = arith.constant 0 : index
    %117 = vector.load %arg6[%c0_108, %c0_109] : memref<1x128xf32, #tpu.memory_space<vmem>>, vector<1x128xf32>
    %118 = vector.broadcast %117 : vector<1x128xf32> to vector<384x128xf32>
    %119 = arith.mulf %116, %118 : vector<384x128xf32>
    %c0_110 = arith.constant 0 : index
    %c0_111 = arith.constant 0 : index
    %120 = vector.load %arg7[%c0_110, %c0_111] : memref<1x128xf32, #tpu.memory_space<vmem>>, vector<1x128xf32>
    %121 = vector.broadcast %120 : vector<1x128xf32> to vector<384x128xf32>
    %122 = arith.addf %119, %121 : vector<384x128xf32>
    %123 = arith.addf %122, %6 : vector<384x128xf32>
    %cst_112 = arith.constant 0.000000e+00 : f32
    %124 = vector.broadcast %cst_112 : f32 to vector<384x128xf32>
    %125 = arith.maximumf %123, %124 : vector<384x128xf32>
    %126 = vector.shape_cast %125 : vector<384x128xf32> to vector<16x24x128xf32>
    %127 = vector.extract_strided_slice %126 {offsets = [0, 1, 0], sizes = [16, 16, 128], strides = [1, 1, 1]} : vector<16x24x128xf32> to vector<16x16x128xf32>
    %128 = vector.shape_cast %127 : vector<16x16x128xf32> to vector<1x16x16x128xf32>
    %c0_113 = arith.constant 0 : index
    %c0_114 = arith.constant 0 : index
    %c0_115 = arith.constant 0 : index
    %c0_116 = arith.constant 0 : index
    %129 = vector.load %arg8[%c0_113, %c0_114, %c0_115, %c0_116] : memref<1x16x16x128xf32, #tpu.memory_space<vmem>>, vector<1x16x16x128xf32>
    tpu.vector_store %arg8[%c0_113, %c0_114, %c0_115, %c0_116], %128 {strides = array<i32>} : memref<1x16x16x128xf32, #tpu.memory_space<vmem>>, vector<1x16x16x128xf32>,
    return
  }
  func.func @transform_0(%arg0: i32) -> (i32, i32, i32, i32) {
    %c0_i32 = arith.constant 0 : i32
    %c0_i32_0 = arith.constant 0 : i32
    %c0_i32_1 = arith.constant 0 : i32
    %c0_i32_2 = arith.constant 0 : i32
    return %arg0, %c0_i32, %c0_i32_0, %c0_i32_1 : i32, i32, i32, i32
  }
  func.func @transform_1(%arg0: i32) -> (i32, i32, i32) {
    %c0_i32 = arith.constant 0 : i32
    %c0_i32_0 = arith.constant 0 : i32
    %c0_i32_1 = arith.constant 0 : i32
    %c0_i32_2 = arith.constant 0 : i32
    return %c0_i32, %c0_i32_0, %c0_i32_1 : i32, i32, i32
  }
  func.func @transform_2(%arg0: i32) -> (i32, i32) {
    %c0_i32 = arith.constant 0 : i32
    %c0_i32_0 = arith.constant 0 : i32
    %c0_i32_1 = arith.constant 0 : i32
    return %c0_i32, %c0_i32_0 : i32, i32
  }
  func.func @transform_3(%arg0: i32) -> (i32, i32) {
    %c0_i32 = arith.constant 0 : i32
    %c0_i32_0 = arith.constant 0 : i32
    %c0_i32_1 = arith.constant 0 : i32
    return %c0_i32, %c0_i32_0 : i32, i32
  }
  func.func @transform_4(%arg0: i32) -> (i32, i32, i32) {
    %c0_i32 = arith.constant 0 : i32
    %c0_i32_0 = arith.constant 0 : i32
    %c0_i32_1 = arith.constant 0 : i32
    %c0_i32_2 = arith.constant 0 : i32
    return %c0_i32, %c0_i32_0, %c0_i32_1 : i32, i32, i32
  }
  func.func @transform_5(%arg0: i32) -> (i32, i32) {
    %c0_i32 = arith.constant 0 : i32
    %c0_i32_0 = arith.constant 0 : i32
    %c0_i32_1 = arith.constant 0 : i32
    return %c0_i32, %c0_i32_0 : i32, i32
  }
  func.func @transform_6(%arg0: i32) -> (i32, i32) {
    %c0_i32 = arith.constant 0 : i32
    %c0_i32_0 = arith.constant 0 : i32
    %c0_i32_1 = arith.constant 0 : i32
    return %c0_i32, %c0_i32_0 : i32, i32
  }
  func.func @transform_7(%arg0: i32) -> (i32, i32, i32, i32) {
    %c0_i32 = arith.constant 0 : i32
    %c0_i32_0 = arith.constant 0 : i32
    %c0_i32_1 = arith.constant 0 : i32
    %c0_i32_2 = arith.constant 0 : i32
    return %arg0, %c0_i32, %c0_i32_0, %c0_i32_1 : i32, i32, i32, i32
  }
}

</mosaic_0001>

<bundles_post_ra>
// kernel: tpu_custom_call.1
= control target key start
LH: loop header
LB: loop body
LE: loop exit
PB: predicated region body
PF: predicated region fallthrough
CT: control target
= control target key end

     0   :  { %s15199_s0 = inlined_call_operand.hbm [shape: f32[2,16,24,128], index: 0, kind: input, shape index: {}]   ;;  %s15200_s1 = inlined_call_operand.hbm [shape: f32[9,128,128], index: 1, kind: input, shape index: {}]   ;;  %s15201_s2 = inlined_call_operand.vmem [shape: f32[1,128], index: 2, kind: input, shape index: {}]   ;;  %s15202_s3 = inlined_call_operand.vmem [shape: f32[1,128], index: 3, kind: input, shape index: {}]   ;;  %s15203_s4 = inlined_call_operand.hbm [shape: f32[9,128,128], index: 4, kind: input, shape index: {}]   ;;  %s15204_s5 = inlined_call_operand.vmem [shape: f32[1,128], index: 5, kind: input, shape index: {}]   ;;  %s15205_s6 = inlined_call_operand.vmem [shape: f32[1,128], index: 6, kind: input, shape index: {}]   ;;  %s15206_s7 = inlined_call_operand.hbm [shape: f32[2,16,16,128], index: 7, kind: output, shape index: {}]  }
   0x1   :  { %15337 = sst [smem:[#allocation99_spill]] %s15200_s1 }
   0x2   :  { %12 = vsyncpa [#allocation4], 0 }
   0x3   :  { %14 = vsyncpa [#allocation4 + $0x1], 0 }
   0x4   :  { %15 = vsyncpa [#allocation7], 0 }
   0x5   :  { %16 = vsyncpa [#allocation5], 0 }
   0x6   :  { %18 = vsyncpa [#allocation5 + $0x1], 0  ;;  %s13099_s24 = smov 0   ;;  %s13101_s25 = smov 0  }
   0x7   :  { %s13103_s26 = smov 0   ;;  %s13105_s27 = smov 0  }
   0x8 LB: > { %s13120_s28 = sadd.s32 4294967295, %s13048_s27   ;;  %s8397_s29 = sadd.s32 4294967294, %s13048_s27   ;;  %s13048_s27 = sphi %s13105_s27, %s15607_s27   ;;  %s13044_s26 = sphi %s13103_s26, %s15606_s26   ;;  %s13040_s25 = sphi %s13101_s25, %s15605_s25   ;;  %s13036_s24 = sphi %s13099_s24, %s15604_s24  }
   0x9   : > { %p44_p0 = scmp.ne.s32.totalorder %s13040_s25, %s13036_s24  ;;  %p15207_p1 = scmp.eq.s32.totalorder %s13120_s28, 0 }
   0xa   : > { %p200_p3 = scmp.eq.s32.totalorder %s8397_s29, 1  ;;  %p8398_p5 = scmp.ge.s32.totalorder %s13048_s27, 1 }
   0xb   : > { %p13129_p4 = por %p15207_p1, %p44_p0  ;;  %p207_p7 = scmp.lt.s32.totalorder %s13048_s27, 3 }
   0xc   : > { %p13134_p6 = por %p200_p3, %p44_p0  ;;  %s13050_s10 = smov [#allocation6]  }
   0xd   : > { %s15338_s30 = scalar_select %p13129_p4, 1, 0 }
   0xe   : > { %s15339_s8 = scalar_select %p13134_p6, 1, 0 }
   0xf   : > { %p13139_p8 = pnand %p8398_p5, %p207_p7  ;;  %s219_s11 = sshll.u32 %s13050_s10, 4  ;;  %s13143_s11 = int_to_ptr.vmem [resolvable:$true] %s219_s11 }
  0x10   : > { %s13051_s13 = smov [#allocation8]   ;;  %s15342_s1 = sld [smem:[#allocation99_spill]] }
  0x11   : > { %p12800_p9 = pneg %p13139_p8  ;;  %s238_s14 = sshll.u32 %s13051_s13, 4  ;;  %s13154_s14 = int_to_ptr.vmem [resolvable:$true] %s238_s14 }
  0x13   : > { %p13150_p11 = pnand %p12800_p9, %p15207_p1 }
  0x15   : > { %p12894_p13 = pneg %p13150_p11 }
  0x16   : > { %s12892_s17 = scalar_lea.hbm %s15342_s1, 18432 }
  0x17   : > { %p12893_p12 = scmp.ne.s32.totalorder %s15342_s1, %s12892_s17  ;;  %p12899_p5 = scmp.lt.u32.totalorder %s12892_s17, %s15342_s1 }
  0x19   : > { %p12895_p0 = pnand %p12894_p13, %p12893_p12 }
  0x1b   : > { %p12896_p3 = pneg %p12895_p0 }
  0x1d   : > { %p12901_p7 = pnand %p12899_p5, %p12896_p3 }
  0x1f   : > { %12904 = shalt.err (!%p12901_p7)
}
  0x20   : > { %s12905_s22 = scalar_lea.vmem %s13143_s11, 18432  ;;  %p12913_p2 = scmp.lt.s32.totalorder %s13143_s11, %s13143_s11 }
  0x21   : > { %p12906_p9 = scmp.ne.s32.totalorder %s13143_s11, %s12905_s22  ;;  %p12914_p12 = scmp.lt.s32.totalorder %s12905_s22, %s12905_s22 }
  0x23   : > { %p12908_p10 = pnand %p12906_p9, %p12894_p13  ;;  %p12915_p0 = por %p12914_p12, %p12913_p2 }
  0x25   : > { %p12909_p1 = pneg %p12908_p10 }
  0x27   : > { %p12916_p6 = pnand %p12915_p0, %p12909_p1 }
  0x29   : > { %12919 = shalt.err (!%p12916_p6)
}
  0x2a   : > { %s15208_s23 = smov 128   ;;  %s15209_s29 = smov 8  }
  0x2b   : > { %12803 = dma.hbm_to_vmem [thread:$0]  (!%p13150_p11), %s15342_s1, 18432, %s13143_s11, [#allocation7], %s15208_s23, %s15208_s23, %s15209_s29  }
  0x2c   : > { %s12920_s17 = scalar_lea.hbm %s15203_s4, 18432 }
  0x2d   : > { %p12921_p1 = scmp.ne.s32.totalorder %s15203_s4, %s12920_s17  ;;  %p12927_p10 = scmp.lt.u32.totalorder %s12920_s17, %s15203_s4 }
  0x2f   : > { %p12923_p2 = pnand %p12921_p1, %p12894_p13 }
  0x31   : > { %p12924_p6 = pneg %p12923_p2 }
  0x33   : > { %p12929_p3 = pnand %p12927_p10, %p12924_p6 }
  0x35   : > { %12932 = shalt.err (!%p12929_p3)
}
  0x36   : > { %s12933_s11 = scalar_lea.vmem %s13154_s14, 18432  ;;  %p12941_p12 = scmp.lt.s32.totalorder %s13154_s14, %s13154_s14 }
  0x37   : > { %p12934_p5 = scmp.ne.s32.totalorder %s13154_s14, %s12933_s11  ;;  %p12942_p0 = scmp.lt.s32.totalorder %s12933_s11, %s12933_s11 }
  0x39   : > { %p12936_p7 = pnand %p12934_p5, %p12894_p13  ;;  %p12943_p1 = por %p12942_p0, %p12941_p12 }
  0x3b   : > { %p12937_p9 = pneg %p12936_p7 }
  0x3d   : > { %p12944_p2 = pnand %p12943_p1, %p12937_p9 }
  0x3f   : > { %12947 = shalt.err (!%p12944_p2)
}
  0x40   : > { %12806 = dma.hbm_to_vmem [thread:$0]  (!%p13150_p11), %s15203_s4, 18432, %s13154_s14, [#allocation7], %s15208_s23, %s15208_s23, %s15209_s29  }
  0x41   : > { %s13215_s12 = sadd.s32 1, %s13048_s27   ;;  %s31_s13 = sadd.s32 1, %s13044_s26 }
  0x42   : > { %s28_s15 = ssub.s32 %s13048_s27, %s13215_s12  ;;  %p38_p13 = scmp.ne.s32.totalorder %s13044_s26, %s13040_s25 }
  0x43   : > { %p29_p6 = scmp.eq.s32.totalorder %s28_s15, 0  ;;  %p39_p10 = scmp.eq.s32.totalorder %s13048_s27, 0 }
  0x44   : > { %p15343_p3 = scmp.eq.s32.totalorder %s13120_s28, 1  ;;  %p12817_p7 = scmp.lt.s32.totalorder %s13048_s27, 2 }
  0x45   : > { %s13231_s17 = scalar_select %p29_p6, %s13044_s26, %s31_s13  }
  0x46   : > { %p13225_p5 = por %p15343_p3, %p38_p13  ;;  %p40_p9 = por %p39_p10, %p38_p13 }
  0x47   : > { %s258_s18 = sand.u32 1, %s13044_s26   ;;  %s12786_s14 = smul.u32 6144, %s13048_s27 }
  0x48   : > { %s15344_s16 = scalar_select %p13225_p5, 1, 0 }
  0x49   : > { %s12785_s19 = smul.u32 384, %s258_s18  ;;  %p13235_p11 = pnand %p12817_p7, %p40_p9 }
  0x4a   : > { %s13242_s22 = scalar_lea.hbm %s15199_s0, %s12786_s14  ;;  %s13246_s15 = scalar_lea.sflag [#allocation4], %s258_s18 }
  0x4b   : > { %s262_s10 = scalar_lea.vmem [#allocation3], %s12785_s19  ;;  %s12948_s23 = scalar_lea.hbm %s13242_s22, 6144 }
  0x4c   : > { %s269_s13 = sshll.u32 %s262_s10, 4  ;;  %p12949_p12 = scmp.ne.s32.totalorder %s13242_s22, %s12948_s23  ;;  %s13244_s13 = int_to_ptr.vmem [resolvable:$true] %s269_s13 }
  0x4d   : > { %p12950_p0 = pneg %p13235_p11  ;;  %s12953_s11 = scalar_lea.hbm %s15199_s0, 12288 }
  0x4e   : > { %p12954_p13 = scmp.lt.u32.totalorder %s13242_s22, %s15199_s0  ;;  %p12955_p6 = scmp.lt.u32.totalorder %s12953_s11, %s12948_s23 }
  0x4f   : > { %p12951_p1 = pnand %p12950_p0, %p12949_p12  ;;  %p12957_p3 = scmp.lt.u32.totalorder %s12948_s23, %s13242_s22 }
  0x50   : > { %p12956_p10 = por %p12955_p6, %p12954_p13 }
  0x51   : > { %p12952_p2 = pneg %p12951_p1 }
  0x52   : > { %p12958_p7 = por %p12957_p3, %p12956_p10 }
  0x54   : > { %p12959_p9 = pnand %p12958_p7, %p12952_p2 }
  0x56   : > { %12962 = shalt.err (!%p12959_p9)
}
  0x57   : > { %s12963_s18 = scalar_lea.vmem %s13244_s13, 6144  ;;  %s13054_s19 = smov [#allocation3]  }
  0x58   : > { %p12964_p12 = scmp.ne.s32.totalorder %s13244_s13, %s12963_s18  ;;  %s12968_s10 = sshll.u32 %s13054_s19, 4  ;;  %s12969_s10 = int_to_ptr.vmem [resolvable:$false] %s12968_s10 }
  0x59   : > { %s12970_s1 = scalar_lea.vmem %s12969_s10, 12288  ;;  %p12971_p4 = scmp.lt.s32.totalorder %s13244_s13, %s12969_s10 }
  0x5a   : > { %p12966_p1 = pnand %p12964_p12, %p12950_p0  ;;  %p12972_p13 = scmp.lt.s32.totalorder %s12970_s1, %s12963_s18 }
  0x5c   : > { %p12967_p5 = pneg %p12966_p1  ;;  %p12973_p6 = por %p12972_p13, %p12971_p4 }
  0x5e   : > { %p12974_p10 = pnand %p12973_p6, %p12967_p5 }
  0x60   : > { %12977 = shalt.err (!%p12974_p10)
}
  0x61   : > { %s15346_s23 = smov 8   ;;  %s15347_s29 = smov 128  }
  0x62   : > { %12810 = dma.hbm_to_vmem [thread:$0]  (!%p13235_p11), %s13242_s22, 6144, %s13244_s13, %s13246_s15, %s15347_s29, %s15347_s29, %s15346_s23  }
  0x63   : > { %281 = sbr.rel (%p13139_p8) target bundleno = 2228 (0x8b4), region = 48 }
  0x6a   : > { %s13280_s14 = sand.u32 1, %s13040_s25   ;;  %p15348_p4 = scmp.ne.s32.totalorder %s15338_s30, 0 }
  0x6b   : > { %s12787_s21 = smul.u32 384, %s13280_s14  ;;  %s284_s11 = scalar_lea.sflag [#allocation4], %s13280_s14 }
  0x6d   : > { %s13284_s18 = scalar_lea.vmem [#allocation3], %s12787_s21 }
  0x6e   : > { %13023 = dma.done.wait (%p15348_p4), %s284_s11, 6144  }
  0x6f   : > { %13025 = vsyncadd (%p15348_p4), %s284_s11, 4294961152  ;;  %p15349_p5 = scmp.eq.s32.totalorder %s13120_s28, 0 }
  0x71   : > { %13027 = dma.done.wait (%p15349_p5), [#allocation7], 36864   ;;  %p15350_p8 = pmov %p15349_p5 }
  0x72   : > { %v13055_v0 = vmov 0.0   ;;  %v547_v1 = vld [vmem:[#allocation6 + $0x80] sm:$0xff]  ;;  %v548_v2 = vld [vmem:[#allocation6 + $0x88] sm:$0xff]  ;;  %v549_v3 = vld [vmem:[#allocation6 + $0x90] sm:$0xff]  ;;  %s8406_s1 = sshll.u32 %s13280_s14, 8  ;;  %s8416_s29 = sshll.u32 %s13120_s28, 12 }
  0x73   : > { %13029 = vsyncadd (%p15350_p8), [#allocation7], 4294930432  ;;  %326 = vst [vmem:[#allocation2] sm:$0xff] %v13055_v0  ;;  %9601 = vmatprep.mubr.f32.mxu0 %v13055_v0  ;;  %10537 = vmatprep.mubr.f32.mxu1 %v13055_v0  ;;  %v11441_v4 = vpack.c.bf16 %v548_v2, %v547_v1  ;;  %v550_v5 = vld [vmem:[#allocation6 + $0x98] sm:$0xff]  ;;  %v551_v7 = vld [vmem:[#allocation6 + $0xa0] sm:$0xff]  ;;  %s14964_s23 = scalar_lea.vmem [#allocation9], %s8406_s1  ;;  %s15151_s30 = scalar_lea.hbm %s15206_s7, %s8416_s29 }
  0x74   : > { %329 = vst [vmem:[#allocation2 + $0x18] sm:$0xff] %v13055_v0  ;;  %328 = vst [vmem:[#allocation2 + $0x10] sm:$0xff] %v13055_v0  ;;  %v11445_v6 = vpack.c.bf16 %v550_v5, %v549_v3  ;;  %v552_v8 = vld [vmem:[#allocation6 + $0xa8] sm:$0xff]  ;;  %v553_v10 = vld [vmem:[#allocation6 + $0xb0] sm:$0xff]  ;;  %s8305_s21 = sshll.u32 %s14964_s23, 4  ;;  %s8292_s28 = scalar_lea.sflag [#allocation5], %s13280_s14  ;;  %s15153_s21 = int_to_ptr.vmem [resolvable:$true] %s8305_s21 }
  0x75   : > { %330 = vst [vmem:[#allocation2 + $0x20] sm:$0xff] %v13055_v0  ;;  %331 = vst [vmem:[#allocation2 + $0x28] sm:$0xff] %v13055_v0  ;;  %11442 = vmatprep.subr.bf16.mxu0 %v11441_v4  ;;  %v11449_v9 = vpack.c.bf16 %v552_v8, %v551_v7  ;;  %v554_v11 = vld [vmem:[#allocation6 + $0xb8] sm:$0xff]  ;;  %v13306_v12 = vld [vmem:[%s13284_s18] sm:$0xff]  ;;  %s12978_s9 = scalar_lea.vmem %s15153_s21, 4096  ;;  %p15601_p0 = scmp.ne.s32.totalorder %s15344_s16, 0 }
  0x76   : > { %332 = vst [vmem:[#allocation2 + $0x1b0] sm:$0xff] %v13055_v0  ;;  %333 = vst [vmem:[#allocation2 + $0x1b8] sm:$0xff] %v13055_v0  ;;  %11444 = vmatpush3.bf16.msra.mxu0 %v11441_v4  ;;  %v13309_v13 = vld [vmem:[%s13284_s18 + $0x8] sm:$0xff]  ;;  %v13312_v14 = vld [vmem:[%s13284_s18 + $0x10] sm:$0xff]  ;;  %v11453_v19 = vpack.c.bf16 %v554_v11, %v553_v10  ;;  %p12979_p11 = scmp.ne.s32.totalorder %s15153_s21, %s12978_s9  ;;  %s13056_s20 = smov [#allocation9]  }
  0x77   : > { %334 = vst [vmem:[#allocation2 + $0x1c0] sm:$0xff] %v13055_v0  ;;  %335 = vst [vmem:[#allocation2 + $0x1c8] sm:$0xff] %v13055_v0  ;;  %11446 = vmatprep.subr.bf16.mxu0 %v11445_v6  ;;  %v13318_v15 = vld [vmem:[%s13284_s18 + $0x18] sm:$0xff]  ;;  %v13321_v16 = vld [vmem:[%s13284_s18 + $0x20] sm:$0xff]  ;;  %s12982_s22 = sshll.u32 %s13056_s20, 4  ;;  %s12983_s22 = int_to_ptr.vmem [resolvable:$false] %s12982_s22 }
  0x78   : > { %15351 = vst [vmem:[#allocation13_spill] sm:$0xff] %v13306_v12  ;;  %15352 = vst [vmem:[#allocation14_spill] sm:$0xff] %v13309_v13  ;;  %v13326_v17 = vld [vmem:[%s13284_s18 + $0x28] sm:$0xff]  ;;  %v13329_v18 = vld [vmem:[%s13284_s18 + $0x30] sm:$0xff]  ;;  %p12980_p2 = pnand %p12979_p11, %p15601_p0  ;;  %s12984_s13 = scalar_lea.vmem %s12983_s22, 8192 }
  0x79   : > { %15353 = vst [vmem:[#allocation15_spill] sm:$0xff] %v13312_v14  ;;  %386 = vst [vmem:[#allocation2 + $0x30] sm:$0xff] %v13306_v12  ;;  %v13334_v20 = vld [vmem:[%s13284_s18 + $0x38] sm:$0xff]  ;;  %v13337_v21 = vld [vmem:[%s13284_s18 + $0x40] sm:$0xff]  ;;  %p12985_p7 = scmp.lt.s32.totalorder %s15153_s21, %s12983_s22  ;;  %p12986_p9 = scmp.lt.s32.totalorder %s12984_s13, %s12978_s9 }
  0x7a   : > { %387 = vst [vmem:[#allocation2 + $0x38] sm:$0xff] %v13309_v13  ;;  %388 = vst [vmem:[#allocation2 + $0x40] sm:$0xff] %v13312_v14  ;;  %11448 = vmatpush3.bf16.msra.mxu0 %v11445_v6  ;;  %v13340_v22 = vld [vmem:[%s13284_s18 + $0x48] sm:$0xff]  ;;  %v555_v23 = vld [vmem:[#allocation6 + $0xc0] sm:$0xff]  ;;  %p12981_p3 = pneg %p12980_p2 }
  0x7b   : > { %15354 = vst [vmem:[#allocation16_spill] sm:$0xff] %v13318_v15  ;;  %15355 = vst [vmem:[#allocation17_spill] sm:$0xff] %v13321_v16  ;;  %11450 = vmatprep.subr.bf16.mxu0 %v11449_v9  ;;  %v556_v24 = vld [vmem:[#allocation6 + $0xc8] sm:$0xff]  ;;  %v13346_v25 = vld [vmem:[%s13284_s18 + $0x50] sm:$0xff]  ;;  %p12987_p12 = por %p12986_p9, %p12985_p7 }
  0x7c   : > { %389 = vst [vmem:[#allocation2 + $0x48] sm:$0xff] %v13318_v15  ;;  %390 = vst [vmem:[#allocation2 + $0x50] sm:$0xff] %v13321_v16  ;;  %v13350_v26 = vld [vmem:[%s13284_s18 + $0x58] sm:$0xff]  ;;  %v13353_v27 = vld [vmem:[%s13284_s18 + $0x60] sm:$0xff]  ;;  %v11457_v32 = vpack.c.bf16 %v556_v24, %v555_v23 }
  0x7d   : > { %15356 = vst [vmem:[#allocation18_spill] sm:$0xff] %v13326_v17  ;;  %15357 = vst [vmem:[#allocation19_spill] sm:$0xff] %v13329_v18  ;;  %v13356_v28 = vld [vmem:[%s13284_s18 + $0x68] sm:$0xff]  ;;  %v13362_v29 = vld [vmem:[%s13284_s18 + $0x70] sm:$0xff]  ;;  %p12988_p1 = pnand %p12987_p12, %p12981_p3 }
  0x7e   : > { %391 = vst [vmem:[#allocation2 + $0x58] sm:$0xff] %v13326_v17  ;;  %392 = vst [vmem:[#allocation2 + $0x60] sm:$0xff] %v13329_v18  ;;  %11452 = vmatpush3.bf16.msra.mxu0 %v11449_v9  ;;  %v13365_v30 = vld [vmem:[%s13284_s18 + $0x78] sm:$0xff]  ;;  %v13368_v31 = vld [vmem:[%s13284_s18 + $0x80] sm:$0xff] }
  0x7f   : > { %15358 = vst [vmem:[#allocation20_spill] sm:$0xff] %v13334_v20  ;;  %15359 = vst [vmem:[#allocation21_spill] sm:$0xff] %v13337_v21  ;;  %11454 = vmatprep.subr.bf16.mxu0 %v11453_v19  ;;  %v557_v33 = vld [vmem:[#allocation6 + $0xd0] sm:$0xff]  ;;  %v558_v34 = vld [vmem:[#allocation6 + $0xd8] sm:$0xff] }
  0x80   : > { %15360 = vst [vmem:[#allocation22_spill] sm:$0xff] %v13340_v22  ;;  %393 = vst [vmem:[#allocation2 + $0x68] sm:$0xff] %v13334_v20  ;;  %v13374_v35 = vld [vmem:[%s13284_s18 + $0x88] sm:$0xff]  ;;  %v13378_v36 = vld [vmem:[%s13284_s18 + $0x90] sm:$0xff]  ;;  %v11461_v43 = vpack.c.bf16 %v558_v34, %v557_v33 }
  0x81   : > { %394 = vst [vmem:[#allocation2 + $0x70] sm:$0xff] %v13337_v21  ;;  %395 = vst [vmem:[#allocation2 + $0x78] sm:$0xff] %v13340_v22  ;;  %v13381_v37 = vld [vmem:[%s13284_s18 + $0x98] sm:$0xff]  ;;  %v13384_v38 = vld [vmem:[%s13284_s18 + $0xa0] sm:$0xff] }
  0x82   : > { %15361 = vst [vmem:[#allocation23_spill] sm:$0xff] %v13346_v25  ;;  %396 = vst [vmem:[#allocation2 + $0x80] sm:$0xff] %v13346_v25  ;;  %v13390_v39 = vld [vmem:[%s13284_s18 + $0xa8] sm:$0xff]  ;;  %v13393_v40 = vld [vmem:[%s13284_s18 + $0xb0] sm:$0xff]  ;;  %11456 = vmatpush3.bf16.msra.mxu0 %v11453_v19 }
  0x83   : > { %15362 = vst [vmem:[#allocation24_spill] sm:$0xff] %v13350_v26  ;;  %15363 = vst [vmem:[#allocation25_spill] sm:$0xff] %v13353_v27  ;;  %v13398_v41 = vld [vmem:[%s13284_s18 + $0xb8] sm:$0xff]  ;;  %v13401_v42 = vld [vmem:[%s13284_s18 + $0xc0] sm:$0xff]  ;;  %11458 = vmatprep.subr.bf16.mxu0 %v11457_v32 }
  0x84   : > { %15364 = vst [vmem:[#allocation26_spill] sm:$0xff] %v13356_v28  ;;  %397 = vst [vmem:[#allocation2 + $0x88] sm:$0xff] %v13350_v26  ;;  %v13406_v44 = vld [vmem:[%s13284_s18 + $0xc8] sm:$0xff]  ;;  %v13409_v45 = vld [vmem:[%s13284_s18 + $0xd0] sm:$0xff] }
  0x85   : > { %398 = vst [vmem:[#allocation2 + $0x90] sm:$0xff] %v13353_v27  ;;  %399 = vst [vmem:[#allocation2 + $0x98] sm:$0xff] %v13356_v28  ;;  %v13412_v46 = vld [vmem:[%s13284_s18 + $0xd8] sm:$0xff]  ;;  %v559_v47 = vld [vmem:[#allocation6 + $0xe0] sm:$0xff] }
  0x86   : > { %15365 = vst [vmem:[#allocation27_spill] sm:$0xff] %v13362_v29  ;;  %15366 = vst [vmem:[#allocation28_spill] sm:$0xff] %v13365_v30  ;;  %v560_v48 = vld [vmem:[#allocation6 + $0xe8] sm:$0xff]  ;;  %v13418_v49 = vld [vmem:[%s13284_s18 + $0xe0] sm:$0xff]  ;;  %11460 = vmatpush3.bf16.msra.mxu0 %v11457_v32 }
  0x87   : > { %15367 = vst [vmem:[#allocation29_spill] sm:$0xff] %v13368_v31  ;;  %400 = vst [vmem:[#allocation2 + $0xa0] sm:$0xff] %v13362_v29  ;;  %v13422_v50 = vld [vmem:[%s13284_s18 + $0xe8] sm:$0xff]  ;;  %v13425_v51 = vld [vmem:[%s13284_s18 + $0xf0] sm:$0xff]  ;;  %11462 = vmatprep.subr.bf16.mxu0 %v11461_v43  ;;  %v11465_v56 = vpack.c.bf16 %v560_v48, %v559_v47 }
  0x88   : > { %401 = vst [vmem:[#allocation2 + $0xa8] sm:$0xff] %v13365_v30  ;;  %402 = vst [vmem:[#allocation2 + $0xb0] sm:$0xff] %v13368_v31  ;;  %v13428_v52 = vld [vmem:[%s13284_s18 + $0xf8] sm:$0xff]  ;;  %v13434_v53 = vld [vmem:[%s13284_s18 + $0x100] sm:$0xff] }
  0x89   : > { %15368 = vst [vmem:[#allocation30_spill] sm:$0xff] %v13374_v35  ;;  %403 = vst [vmem:[#allocation2 + $0xb8] sm:$0xff] %v13374_v35  ;;  %v13437_v54 = vld [vmem:[%s13284_s18 + $0x108] sm:$0xff]  ;;  %v13440_v55 = vld [vmem:[%s13284_s18 + $0x110] sm:$0xff] }
  0x8a   : > { %15369 = vst [vmem:[#allocation31_spill] sm:$0xff] %v13378_v36  ;;  %15370 = vst [vmem:[#allocation32_spill] sm:$0xff] %v13381_v37  ;;  %v561_v57 = vld [vmem:[#allocation6 + $0xf0] sm:$0xff]  ;;  %v562_v58 = vld [vmem:[#allocation6 + $0xf8] sm:$0xff]  ;;  %11464 = vmatpush3.bf16.msra.mxu0 %v11461_v43 }
  0x8b   : > { %15371 = vst [vmem:[#allocation33_spill] sm:$0xff] %v13384_v38  ;;  %404 = vst [vmem:[#allocation2 + $0xc0] sm:$0xff] %v13378_v36  ;;  %v13446_v59 = vld [vmem:[%s13284_s18 + $0x118] sm:$0xff]  ;;  %v13450_v60 = vld [vmem:[%s13284_s18 + $0x120] sm:$0xff]  ;;  %11466 = vmatprep.subr.bf16.mxu0 %v11465_v56  ;;  %v11469_v4 = vpack.c.bf16 %v562_v58, %v561_v57 }
  0x8c   : > { %405 = vst [vmem:[#allocation2 + $0xc8] sm:$0xff] %v13381_v37  ;;  %406 = vst [vmem:[#allocation2 + $0xd0] sm:$0xff] %v13384_v38  ;;  %v13453_v61 = vld [vmem:[%s13284_s18 + $0x128] sm:$0xff]  ;;  %v13456_v62 = vld [vmem:[%s13284_s18 + $0x130] sm:$0xff] }
  0x8d   : > { %15372 = vst [vmem:[#allocation34_spill] sm:$0xff] %v13390_v39  ;;  %15373 = vst [vmem:[#allocation35_spill] sm:$0xff] %v13393_v40  ;;  %v13462_v63 = vld [vmem:[%s13284_s18 + $0x138] sm:$0xff]  ;;  %v13465_v1 = vld [vmem:[%s13284_s18 + $0x140] sm:$0xff] }
  0x8e   : > { %407 = vst [vmem:[#allocation2 + $0xd8] sm:$0xff] %v13390_v39  ;;  %408 = vst [vmem:[#allocation2 + $0xe0] sm:$0xff] %v13393_v40  ;;  %v13470_v2 = vld [vmem:[%s13284_s18 + $0x148] sm:$0xff]  ;;  %v13473_v3 = vld [vmem:[%s13284_s18 + $0x150] sm:$0xff]  ;;  %11468 = vmatpush3.bf16.msra.mxu0 %v11465_v56 }
  0x8f   : > { %15374 = vst [vmem:[#allocation36_spill] sm:$0xff] %v13398_v41  ;;  %15375 = vst [vmem:[#allocation37_spill] sm:$0xff] %v13401_v42  ;;  %v13478_v5 = vld [vmem:[%s13284_s18 + $0x158] sm:$0xff]  ;;  %v13481_v6 = vld [vmem:[%s13284_s18 + $0x160] sm:$0xff]  ;;  %11470 = vmatprep.subr.bf16.mxu0 %v11469_v4 }
  0x90   : > { %409 = vst [vmem:[#allocation2 + $0xe8] sm:$0xff] %v13398_v41  ;;  %410 = vst [vmem:[#allocation2 + $0xf0] sm:$0xff] %v13401_v42  ;;  %v482_v7 = vld [vmem:[#allocation6] sm:$0xff]  ;;  %v483_v8 = vld [vmem:[#allocation6 + $0x8] sm:$0xff] }
  0x91   : > { %15376 = vst [vmem:[#allocation38_spill] sm:$0xff] %v13406_v44  ;;  %15377 = vst [vmem:[#allocation39_spill] sm:$0xff] %v13409_v45  ;;  %v11473_v9 = vpack.c.bf16 %v483_v8, %v482_v7  ;;  %v484_v10 = vld [vmem:[#allocation6 + $0x10] sm:$0xff]  ;;  %v485_v11 = vld [vmem:[#allocation6 + $0x18] sm:$0xff] }
  0x92   : > { %15378 = vst [vmem:[#allocation40_spill] sm:$0xff] %v13412_v46  ;;  %411 = vst [vmem:[#allocation2 + $0xf8] sm:$0xff] %v13406_v44  ;;  %11472 = vmatpush3.bf16.msra.mxu0 %v11469_v4  ;;  %v11477_v19 = vpack.c.bf16 %v485_v11, %v484_v10  ;;  %v486_v23 = vld [vmem:[#allocation6 + $0x20] sm:$0xff]  ;;  %v487_v24 = vld [vmem:[#allocation6 + $0x28] sm:$0xff] }
  0x93   : > { %412 = vst [vmem:[#allocation2 + $0x100] sm:$0xff] %v13409_v45  ;;  %413 = vst [vmem:[#allocation2 + $0x108] sm:$0xff] %v13412_v46  ;;  %11474 = vmatprep.subr.bf16.mxu0 %v11473_v9  ;;  %v11481_v32 = vpack.c.bf16 %v487_v24, %v486_v23  ;;  %v488_v33 = vld [vmem:[#allocation6 + $0x30] sm:$0xff]  ;;  %v489_v34 = vld [vmem:[#allocation6 + $0x38] sm:$0xff] }
  0x94   : > { %15379 = vst [vmem:[#allocation41_spill] sm:$0xff] %v13418_v49  ;;  %414 = vst [vmem:[#allocation2 + $0x110] sm:$0xff] %v13418_v49  ;;  %v11485_v43 = vpack.c.bf16 %v489_v34, %v488_v33  ;;  %v490_v47 = vld [vmem:[#allocation6 + $0x40] sm:$0xff]  ;;  %v491_v48 = vld [vmem:[#allocation6 + $0x48] sm:$0xff] }
  0x95   : > { %15380 = vst [vmem:[#allocation42_spill] sm:$0xff] %v13422_v50  ;;  %15381 = vst [vmem:[#allocation43_spill] sm:$0xff] %v13425_v51  ;;  %9602 = vmatmul.mubr.f32.vlgmr.msra.gmra.mrb[0].mxu0 %v13055_v0  ;;  %v492_v56 = vld [vmem:[#allocation6 + $0x50] sm:$0xff]  ;;  %v493_v57 = vld [vmem:[#allocation6 + $0x58] sm:$0xff] }
  0x96   : > { %15382 = vst [vmem:[#allocation44_spill] sm:$0xff] %v13428_v52  ;;  %415 = vst [vmem:[#allocation2 + $0x118] sm:$0xff] %v13422_v50  ;;  %11476 = vmatpush3.bf16.msra.mxu0 %v11473_v9  ;;  %9604 = vmatprep.mubr.f32.mxu0 %v13055_v0  ;;  %v11489_v0 = vpack.c.bf16 %v491_v48, %v490_v47  ;;  %v11493_v58 = vpack.c.bf16 %v493_v57, %v492_v56  ;;  %v494_v4 = vld [vmem:[#allocation6 + $0x60] sm:$0xff]  ;;  %v495_v7 = vld [vmem:[#allocation6 + $0x68] sm:$0xff] }
  0x97   : > { %416 = vst [vmem:[#allocation2 + $0x120] sm:$0xff] %v13425_v51  ;;  %417 = vst [vmem:[#allocation2 + $0x128] sm:$0xff] %v13428_v52  ;;  %11478 = vmatprep.subr.bf16.mxu0 %v11477_v19  ;;  %v11497_v8 = vpack.c.bf16 %v495_v7, %v494_v4  ;;  %v496_v9 = vld [vmem:[#allocation6 + $0x70] sm:$0xff]  ;;  %v497_v10 = vld [vmem:[#allocation6 + $0x78] sm:$0xff] }
  0x98   : > { %15383 = vst [vmem:[#allocation45_spill] sm:$0xff] %v13434_v53  ;;  %15384 = vst [vmem:[#allocation46_spill] sm:$0xff] %v13437_v54  ;;  %v11501_v11 = vpack.c.bf16 %v497_v10, %v496_v9  ;;  %v1223_v23 = vld [vmem:[#allocation6 + $0x108] sm:$0xff]  ;;  %v1224_v33 = vld [vmem:[#allocation6 + $0x110] sm:$0xff] }
  0x99   : > { %15385 = vst [vmem:[#allocation47_spill] sm:$0xff] %v13440_v55  ;;  %418 = vst [vmem:[#allocation2 + $0x130] sm:$0xff] %v13434_v53  ;;  %9605 = vmatmul.mubr.f32.gmra.mrb[2].mxu0 %v13306_v12  ;;  %v1225_v34 = vld [vmem:[#allocation6 + $0x118] sm:$0xff]  ;;  %v436_v47 = vld [vmem:[#allocation2 + $0x27] sm:$0xff] }
  0x9a   : > { %419 = vst [vmem:[#allocation2 + $0x138] sm:$0xff] %v13437_v54  ;;  %420 = vst [vmem:[#allocation2 + $0x140] sm:$0xff] %v13440_v55  ;;  %9607 = vmatprep.mubr.f32.mxu0 %v13309_v13  ;;  %11480 = vmatpush3.bf16.msra.mxu0 %v11477_v19  ;;  %v1222_v19 = vld [vmem:[#allocation6 + $0x100] sm:$0xff]  ;;  %v11509_v48 = vpack.c.bf16 %v1225_v34, %v1224_v33  ;;  %v1227_v56 = vld [vmem:[#allocation6 + $0x128] sm:$0xff] }
  0x9b   : > { %15386 = vst [vmem:[#allocation48_spill] sm:$0xff] %v13446_v59  ;;  %421 = vst [vmem:[#allocation2 + $0x148] sm:$0xff] %v13446_v59  ;;  %11482 = vmatprep.subr.bf16.mxu0 %v11481_v32  ;;  %v11505_v24 = vpack.c.bf16 %v1223_v23, %v1222_v19  ;;  %v13532_v57 = vld [vmem:[#allocation2 + $0x2f] sm:$0xff]  ;;  %v13538_v9 = vld [vmem:[#allocation2 + $0x3f] sm:$0xff] }
  0x9c   : > { %15387 = vst [vmem:[#allocation49_spill] sm:$0xff] %v13450_v60  ;;  %15388 = vst [vmem:[#allocation50_spill] sm:$0xff] %v13453_v61  ;;  %v1228_v7 = vld [vmem:[#allocation6 + $0x130] sm:$0xff]  ;;  %v13540_v10 = vld [vmem:[#allocation2 + $0x47] sm:$0xff] }
  0x9d   : > { %15389 = vst [vmem:[#allocation51_spill] sm:$0xff] %v13456_v62  ;;  %422 = vst [vmem:[#allocation2 + $0x150] sm:$0xff] %v13450_v60  ;;  %9608 = vmatmul.mubr.f32.gmra.mrb[4].mxu0 %v13312_v14  ;;  %v1230_v19 = vld [vmem:[#allocation6 + $0x140] sm:$0xff]  ;;  %v1231_v23 = vld [vmem:[#allocation6 + $0x148] sm:$0xff] }
  0x9e   : > { %423 = vst [vmem:[#allocation2 + $0x158] sm:$0xff] %v13453_v61  ;;  %424 = vst [vmem:[#allocation2 + $0x160] sm:$0xff] %v13456_v62  ;;  %9610 = vmatprep.mubr.f32.mxu0 %v13318_v15  ;;  %11484 = vmatpush3.bf16.msra.mxu0 %v11481_v32  ;;  %v434_v32 = vld [vmem:[#allocation2 + $0x17] sm:$0xff]  ;;  %v11521_v33 = vpack.c.bf16 %v1231_v23, %v1230_v19  ;;  %v1652_v12 = vld [vmem:[#allocation6 + $0x1e0] sm:$0xff] }
  0x9f   : > { %15390 = vst [vmem:[#allocation52_spill] sm:$0xff] %v13462_v63  ;;  %15391 = vst [vmem:[#allocation53_spill] sm:$0xff] %v13465_v1  ;;  %11486 = vmatprep.subr.bf16.mxu0 %v11485_v43  ;;  %v1232_v34 = vld [vmem:[#allocation6 + $0x150] sm:$0xff]  ;;  %v1651_v15 = vld [vmem:[#allocation6 + $0x1d8] sm:$0xff] }
  0xa0   : > { %425 = vst [vmem:[#allocation2 + $0x168] sm:$0xff] %v13462_v63  ;;  %426 = vst [vmem:[#allocation2 + $0x170] sm:$0xff] %v13465_v1  ;;  %v1236_v23 = vld [vmem:[#allocation6 + $0x170] sm:$0xff]  ;;  %v1653_v13 = vld [vmem:[#allocation6 + $0x1e8] sm:$0xff] }
  0xa1   : > { %15392 = vst [vmem:[#allocation54_spill] sm:$0xff] %v13470_v2  ;;  %15393 = vst [vmem:[#allocation55_spill] sm:$0xff] %v13473_v3  ;;  %9611 = vmatmul.mubr.f32.gmra.mrb[6].mxu0 %v13321_v16  ;;  %v1646_v16 = vld [vmem:[#allocation6 + $0x1b0] sm:$0xff] }
  0xa2   : > { %427 = vst [vmem:[#allocation2 + $0x178] sm:$0xff] %v13470_v2  ;;  %428 = vst [vmem:[#allocation2 + $0x180] sm:$0xff] %v13473_v3  ;;  %9613 = vmatprep.mubr.f32.mxu0 %v13326_v17  ;;  %11488 = vmatpush3.bf16.msra.mxu0 %v11485_v43  ;;  %v435_v43 = vld [vmem:[#allocation2 + $0x1f] sm:$0xff]  ;;  %v1650_v14 = vld [vmem:[#allocation6 + $0x1d0] sm:$0xff] }
  0xa3   : > { %15394 = vst [vmem:[#allocation56_spill] sm:$0xff] %v13478_v5  ;;  %15395 = vst [vmem:[#allocation57_spill] sm:$0xff] %v13481_v6  ;;  %11490 = vmatprep.subr.bf16.mxu0 %v11489_v0  ;;  %v1647_v17 = vld [vmem:[#allocation6 + $0x1b8] sm:$0xff] }
  0xa4   : > { %429 = vst [vmem:[#allocation2 + $0x188] sm:$0xff] %v13478_v5  ;;  %430 = vst [vmem:[#allocation2 + $0x190] sm:$0xff] %v13481_v6 }
  0xa5   : > { %9614 = vmatmul.mubr.f32.gmra.mrb[8].mxu0 %v13329_v18  ;;  %v13677_v18 = vld [vmem:[#allocation2 + $0x39] sm:$0xff] }
  0xa6   : > { %9616 = vmatprep.mubr.f32.mxu0 %v13334_v20  ;;  %11492 = vmatpush3.bf16.msra.mxu0 %v11489_v0  ;;  %v1226_v0 = vld [vmem:[#allocation6 + $0x120] sm:$0xff] }
  0xa7   : > { %11494 = vmatprep.subr.bf16.mxu0 %v11493_v58  ;;  %v11513_v4 = vpack.c.bf16 %v1227_v56, %v1226_v0  ;;  %v1234_v56 = vld [vmem:[#allocation6 + $0x160] sm:$0xff] }
  0xa9   : > { %9617 = vmatmul.mubr.f32.gmra.mrb[10].mxu0 %v13337_v21  ;;  %v1645_v21 = vld [vmem:[#allocation6 + $0x1a8] sm:$0xff] }
  0xaa   : > { %9619 = vmatprep.mubr.f32.mxu0 %v13340_v22  ;;  %11496 = vmatpush3.bf16.msra.mxu0 %v11493_v58  ;;  %v13534_v58 = vld [vmem:[#allocation2 + $0x37] sm:$0xff] }
  0xab   : > { %11498 = vmatprep.subr.bf16.mxu0 %v11497_v8  ;;  %v13675_v22 = vld [vmem:[#allocation2 + $0x31] sm:$0xff] }
  0xad   : > { %9620 = vmatmul.mubr.f32.gmra.mrb[12].mxu0 %v13346_v25 }
  0xae   : > { %9622 = vmatprep.mubr.f32.mxu0 %v13350_v26  ;;  %11500 = vmatpush3.bf16.msra.mxu0 %v11497_v8  ;;  %v1229_v8 = vld [vmem:[#allocation6 + $0x138] sm:$0xff]  ;;  %v1644_v26 = vld [vmem:[#allocation6 + $0x1a0] sm:$0xff] }
  0xaf   : > { %11502 = vmatprep.subr.bf16.mxu0 %v11501_v11  ;;  %v11545_v20 = vpack.c.bf16 %v1645_v21, %v1644_v26  ;;  %v13687_v21 = vld [vmem:[#allocation2 + $0x51] sm:$0xff]  ;;  %v13689_v26 = vld [vmem:[#allocation2 + $0x59] sm:$0xff] }
  0xb0   : > { %15397 = vst [vmem:[#allocation59_spill] sm:$0xff] %v13687_v21  ;;  %15398 = vst [vmem:[#allocation60_spill] sm:$0xff] %v13689_v26 }
  0xb1   : > { %9623 = vmatmul.mubr.f32.gmra.mrb[14].mxu0 %v13353_v27  ;;  %v1174_v27 = vld [vmem:[#allocation2 + $0x21] sm:$0xff] }
  0xb2   : > { %9625 = vmatprep.mubr.f32.mxu0 %v13356_v28  ;;  %11504 = vmatpush3.bf16.msra.mxu0 %v11501_v11  ;;  %v11517_v11 = vpack.c.bf16 %v1229_v8, %v1228_v7  ;;  %v1235_v7 = vld [vmem:[#allocation6 + $0x168] sm:$0xff]  ;;  %v13558_v8 = vld [vmem:[#allocation2 + $0x77] sm:$0xff] }
  0xb3   : > { %11506 = vmatprep.subr.bf16.mxu0 %v11505_v24  ;;  %v11529_v19 = vpack.c.bf16 %v1235_v7, %v1234_v56  ;;  %v13570_v56 = vld [vmem:[#allocation2 + $0x97] sm:$0xff]  ;;  %v1175_v28 = vld [vmem:[#allocation2 + $0x29] sm:$0xff] }
  0xb5   : > { %9626 = vmatmul.mubr.f32.gmra.mrb[16].mxu0 %v13362_v29  ;;  %v1642_v29 = vld [vmem:[#allocation6 + $0x190] sm:$0xff] }
  0xb6   : > { %9628 = vmatprep.mubr.f32.mxu0 %v13365_v30  ;;  %v1643_v30 = vld [vmem:[#allocation6 + $0x198] sm:$0xff] }
  0xb7   : > { %v11541_v25 = vpack.c.bf16 %v1643_v30, %v1642_v29  ;;  %v13683_v29 = vld [vmem:[#allocation2 + $0x49] sm:$0xff] }
  0xb8   : > { %v1649_v30 = vld [vmem:[#allocation6 + $0x1c8] sm:$0xff] }
  0xb9   : > { %9629 = vmatmul.mubr.f32.gmra.mrb[18].mxu0 %v13368_v31  ;;  %v13671_v31 = vld [vmem:[#allocation2 + $0x18f] sm:$0xff] }
  0xba   : > { %9631 = vmatprep.mubr.f32.mxu0 %v13374_v35  ;;  %v1173_v35 = vld [vmem:[#allocation2 + $0x19] sm:$0xff] }
  0xbd   : > { %9632 = vmatmul.mubr.f32.gmra.mrb[20].mxu0 %v13378_v36  ;;  %v13665_v36 = vld [vmem:[#allocation2 + $0x17f] sm:$0xff] }
  0xbe   : > { %9634 = vmatprep.mubr.f32.mxu0 %v13381_v37  ;;  %v13667_v37 = vld [vmem:[#allocation2 + $0x187] sm:$0xff] }
  0xc1   : > { %9635 = vmatmul.mubr.f32.gmra.mrb[22].mxu0 %v13384_v38  ;;  %v13659_v38 = vld [vmem:[#allocation2 + $0x16f] sm:$0xff] }
  0xc2   : > { %9637 = vmatprep.mubr.f32.mxu0 %v13390_v39  ;;  %v13661_v39 = vld [vmem:[#allocation2 + $0x177] sm:$0xff] }
  0xc5   : > { %9638 = vmatmul.mubr.f32.gmra.mrb[24].mxu0 %v13393_v40  ;;  %v13653_v40 = vld [vmem:[#allocation2 + $0x15f] sm:$0xff] }
  0xc6   : > { %9640 = vmatprep.mubr.f32.mxu0 %v13398_v41  ;;  %v13655_v41 = vld [vmem:[#allocation2 + $0x167] sm:$0xff] }
  0xc9   : > { %9641 = vmatmul.mubr.f32.gmra.mrb[26].mxu0 %v13401_v42  ;;  %v13647_v42 = vld [vmem:[#allocation2 + $0x14f] sm:$0xff] }
  0xca   : > { %9643 = vmatprep.mubr.f32.mxu0 %v13406_v44  ;;  %v13649_v44 = vld [vmem:[#allocation2 + $0x157] sm:$0xff] }
  0xcd   : > { %9644 = vmatmul.mubr.f32.gmra.mrb[28].mxu0 %v13409_v45  ;;  %v13641_v45 = vld [vmem:[#allocation2 + $0x13f] sm:$0xff] }
  0xce   : > { %9646 = vmatprep.mubr.f32.mxu0 %v13412_v46  ;;  %v13643_v46 = vld [vmem:[#allocation2 + $0x147] sm:$0xff] }
  0xd1   : > { %9647 = vmatmul.mubr.f32.gmra.mrb[30].mxu0 %v13418_v49  ;;  %v13635_v49 = vld [vmem:[#allocation2 + $0x12f] sm:$0xff] }
  0xd2   : > { %9649 = vmatprep.mubr.f32.mxu0 %v13422_v50  ;;  %v13637_v50 = vld [vmem:[#allocation2 + $0x137] sm:$0xff] }
  0xd5   : > { %9650 = vmatmul.mubr.f32.gmra.mrb[32].mxu0 %v13425_v51  ;;  %v13629_v51 = vld [vmem:[#allocation2 + $0x11f] sm:$0xff] }
  0xd6   : > { %9652 = vmatprep.mubr.f32.mxu0 %v13428_v52  ;;  %v13631_v52 = vld [vmem:[#allocation2 + $0x127] sm:$0xff] }
  0xd9   : > { %9653 = vmatmul.mubr.f32.gmra.mrb[34].mxu0 %v13434_v53  ;;  %v13623_v53 = vld [vmem:[#allocation2 + $0x10f] sm:$0xff] }
  0xda   : > { %9655 = vmatprep.mubr.f32.mxu0 %v13437_v54  ;;  %v13625_v54 = vld [vmem:[#allocation2 + $0x117] sm:$0xff] }
  0xdd   : > { %9656 = vmatmul.mubr.f32.gmra.mrb[36].mxu0 %v13440_v55  ;;  %v13617_v55 = vld [vmem:[#allocation2 + $0xff] sm:$0xff] }
  0xde   : > { %9658 = vmatprep.mubr.f32.mxu0 %v13446_v59  ;;  %v13619_v59 = vld [vmem:[#allocation2 + $0x107] sm:$0xff] }
  0xe1   : > { %9659 = vmatmul.mubr.f32.gmra.mrb[38].mxu0 %v13450_v60  ;;  %v13609_v60 = vld [vmem:[#allocation2 + $0xf7] sm:$0xff] }
  0xe2   : > { %9661 = vmatprep.mubr.f32.mxu0 %v13453_v61  ;;  %v13612_v61 = vld [vmem:[%s13284_s18 + $0x168] sm:$0xff] }
  0xe3   : > { %15396 = vst [vmem:[#allocation58_spill] sm:$0xff] %v13612_v61  ;;  %431 = vst [vmem:[#allocation2 + $0x198] sm:$0xff] %v13612_v61 }
  0xe5   : > { %9662 = vmatmul.mubr.f32.gmra.mrb[40].mxu0 %v13456_v62  ;;  %v13603_v62 = vld [vmem:[#allocation2 + $0xe7] sm:$0xff] }
  0xe6   : > { %9664 = vmatprep.mubr.f32.mxu0 %v13462_v63  ;;  %v13607_v63 = vld [vmem:[#allocation2 + $0xef] sm:$0xff] }
  0xe9   : > { %9665 = vmatmul.mubr.f32.gmra.mrb[42].mxu0 %v13465_v1  ;;  %v13597_v1 = vld [vmem:[#allocation2 + $0xd7] sm:$0xff] }
  0xea   : > { %9667 = vmatprep.mubr.f32.mxu0 %v13470_v2  ;;  %v13601_v2 = vld [vmem:[#allocation2 + $0xdf] sm:$0xff] }
  0xed   : > { %9668 = vmatmul.mubr.f32.gmra.mrb[44].mxu0 %v13473_v3  ;;  %v1640_v3 = vld [vmem:[#allocation6 + $0x180] sm:$0xff] }
  0xee   : > { %9670 = vmatprep.mubr.f32.mxu0 %v13478_v5  ;;  %v1641_v5 = vld [vmem:[#allocation6 + $0x188] sm:$0xff] }
  0xef   : > { %v13572_v7 = vpack.c.bf16 %v1641_v5, %v1640_v3  ;;  %v13589_v3 = vld [vmem:[#allocation2 + $0xbf] sm:$0xff]  ;;  %v13591_v5 = vld [vmem:[#allocation2 + $0xc7] sm:$0xff] }
  0xf1   : > { %9671 = vmatmul.mubr.f32.gmra.mrb[46].mxu0 %v13481_v6  ;;  %v1237_v6 = vld [vmem:[#allocation6 + $0x178] sm:$0xff] }
  0xf2   : > { %9705 = vmatprep.mubr.f32.mxu0 %v434_v32  ;;  %v13546_v32 = vld [vmem:[#allocation2 + $0x57] sm:$0xff] }
  0xf5   : > { %9706 = vmatmul.mubr.f32.vlgmr.msra.gmra.mrb[0].mxu0 %v435_v43  ;;  %v1233_v43 = vld [vmem:[#allocation6 + $0x158] sm:$0xff] }
  0xf6   : > { %11508 = vmatpush3.bf16.msra.mxu0 %v11505_v24  ;;  %9708 = vmatprep.mubr.f32.mxu0 %v436_v47  ;;  %v13544_v24 = vld [vmem:[#allocation2 + $0x4f] sm:$0xff]  ;;  %v13550_v47 = vld [vmem:[#allocation2 + $0x5f] sm:$0xff]  ;;  %v11525_v0 = vpack.c.bf16 %v1233_v43, %v1232_v34  ;;  %v13564_v34 = vld [vmem:[#allocation2 + $0x87] sm:$0xff]  ;;  %v11533_v43 = vpack.c.bf16 %v1237_v6, %v1236_v23 }
  0xf7   : > { %11510 = vmatprep.subr.bf16.mxu0 %v11509_v48  ;;  %v13578_v6 = vld [vmem:[#allocation2 + $0xa7] sm:$0xff]  ;;  %v13585_v23 = vld [vmem:[#allocation2 + $0xb7] sm:$0xff] }
  0xf9   : > { %9709 = vmatmul.mubr.f32.gmra.mrb[2].mxu0 %v13532_v57 }
  0xfa   : > { %9711 = vmatprep.mubr.f32.mxu0 %v13534_v58  ;;  %11512 = vmatpush3.bf16.msra.mxu0 %v11509_v48  ;;  %v13552_v48 = vld [vmem:[#allocation2 + $0x67] sm:$0xff] }
  0xfb   : > { %11514 = vmatprep.subr.bf16.mxu0 %v11513_v4 }
  0xfd   : > { %9712 = vmatmul.mubr.f32.gmra.mrb[4].mxu0 %v13538_v9 }
  0xfe   : > { %9714 = vmatprep.mubr.f32.mxu0 %v13540_v10  ;;  %11516 = vmatpush3.bf16.msra.mxu0 %v11513_v4  ;;  %v13556_v4 = vld [vmem:[#allocation2 + $0x6f] sm:$0xff] }
  0xff   : > { %11518 = vmatprep.subr.bf16.mxu0 %v11517_v11 }
 0x101   : > { %9715 = vmatmul.mubr.f32.gmra.mrb[6].mxu0 %v13544_v24 }
 0x102   : > { %9717 = vmatprep.mubr.f32.mxu0 %v13546_v32  ;;  %11520 = vmatpush3.bf16.msra.mxu0 %v11517_v11  ;;  %v13562_v11 = vld [vmem:[#allocation2 + $0x7f] sm:$0xff] }
 0x103   : > { %11522 = vmatprep.subr.bf16.mxu0 %v11521_v33 }
 0x105   : > { %9718 = vmatmul.mubr.f32.gmra.mrb[8].mxu0 %v13550_v47 }
 0x106   : > { %9720 = vmatprep.mubr.f32.mxu0 %v13552_v48  ;;  %11524 = vmatpush3.bf16.msra.mxu0 %v11521_v33  ;;  %v13568_v33 = vld [vmem:[#allocation2 + $0x8f] sm:$0xff] }
 0x107   : > { %11526 = vmatprep.subr.bf16.mxu0 %v11525_v0 }
 0x109   : > { %9721 = vmatmul.mubr.f32.gmra.mrb[10].mxu0 %v13556_v4 }
 0x10a   : > { %9723 = vmatprep.mubr.f32.mxu0 %v13558_v8  ;;  %11528 = vmatpush3.bf16.msra.mxu0 %v11525_v0  ;;  %v13576_v0 = vld [vmem:[#allocation2 + $0x9f] sm:$0xff] }
 0x10b   : > { %11530 = vmatprep.subr.bf16.mxu0 %v11529_v19 }
 0x10d   : > { %9724 = vmatmul.mubr.f32.gmra.mrb[12].mxu0 %v13562_v11 }
 0x10e   : > { %9726 = vmatprep.mubr.f32.mxu0 %v13564_v34  ;;  %11532 = vmatpush3.bf16.msra.mxu0 %v11529_v19  ;;  %v13583_v19 = vld [vmem:[#allocation2 + $0xaf] sm:$0xff] }
 0x10f   : > { %11534 = vmatprep.subr.bf16.mxu0 %v11533_v43 }
 0x111   : > { %9727 = vmatmul.mubr.f32.gmra.mrb[14].mxu0 %v13568_v33 }
 0x112   : > { %9729 = vmatprep.mubr.f32.mxu0 %v13570_v56  ;;  %11536 = vmatpush3.bf16.msra.mxu0 %v11533_v43  ;;  %v13595_v43 = vld [vmem:[#allocation2 + $0xcf] sm:$0xff] }
 0x113   : > { %11538 = vmatprep.subr.bf16.mxu0 %v13572_v7 }
 0x115   : > { %9730 = vmatmul.mubr.f32.gmra.mrb[16].mxu0 %v13576_v0 }
 0x116   : > { %9732 = vmatprep.mubr.f32.mxu0 %v13578_v6 }
 0x119   : > { %9733 = vmatmul.mubr.f32.gmra.mrb[18].mxu0 %v13583_v19 }
 0x11a   : > { %9735 = vmatprep.mubr.f32.mxu0 %v13585_v23 }
 0x11d   : > { %9736 = vmatmul.mubr.f32.gmra.mrb[20].mxu0 %v13589_v3 }
 0x11e   : > { %9738 = vmatprep.mubr.f32.mxu0 %v13591_v5 }
 0x121   : > { %9739 = vmatmul.mubr.f32.gmra.mrb[22].mxu0 %v13595_v43 }
 0x122   : > { %9741 = vmatprep.mubr.f32.mxu0 %v13597_v1 }
 0x125   : > { %9742 = vmatmul.mubr.f32.gmra.mrb[24].mxu0 %v13601_v2 }
 0x126   : > { %9744 = vmatprep.mubr.f32.mxu0 %v13603_v62 }
 0x129   : > { %9745 = vmatmul.mubr.f32.gmra.mrb[26].mxu0 %v13607_v63 }
 0x12a   : > { %9747 = vmatprep.mubr.f32.mxu0 %v13609_v60 }
 0x12d   : > { %9748 = vmatmul.mubr.f32.gmra.mrb[28].mxu0 %v13617_v55 }
 0x12e   : > { %9750 = vmatprep.mubr.f32.mxu0 %v13619_v59 }
 0x131   : > { %9751 = vmatmul.mubr.f32.gmra.mrb[30].mxu0 %v13623_v53 }
 0x132   : > { %9753 = vmatprep.mubr.f32.mxu0 %v13625_v54 }
 0x135   : > { %9754 = vmatmul.mubr.f32.gmra.mrb[32].mxu0 %v13629_v51 }
 0x136   : > { %9756 = vmatprep.mubr.f32.mxu0 %v13631_v52 }
 0x139   : > { %9757 = vmatmul.mubr.f32.gmra.mrb[34].mxu0 %v13635_v49 }
 0x13a   : > { %9759 = vmatprep.mubr.f32.mxu0 %v13637_v50 }
 0x13d   : > { %9760 = vmatmul.mubr.f32.gmra.mrb[36].mxu0 %v13641_v45 }
 0x13e   : > { %9762 = vmatprep.mubr.f32.mxu0 %v13643_v46 }
 0x141   : > { %9763 = vmatmul.mubr.f32.gmra.mrb[38].mxu0 %v13647_v42 }
 0x142   : > { %9765 = vmatprep.mubr.f32.mxu0 %v13649_v44 }
 0x145   : > { %9766 = vmatmul.mubr.f32.gmra.mrb[40].mxu0 %v13653_v40 }
 0x146   : > { %9768 = vmatprep.mubr.f32.mxu0 %v13655_v41 }
 0x149   : > { %9769 = vmatmul.mubr.f32.gmra.mrb[42].mxu0 %v13659_v38 }
 0x14a   : > { %9771 = vmatprep.mubr.f32.mxu0 %v13661_v39 }
 0x14d   : > { %9772 = vmatmul.mubr.f32.gmra.mrb[44].mxu0 %v13665_v36 }
 0x14e   : > { %9774 = vmatprep.mubr.f32.mxu0 %v13667_v37 }
 0x151   : > { %9775 = vmatmul.mubr.f32.gmra.mrb[46].mxu0 %v13671_v31 }
 0x152   : > { %9809 = vmatprep.mubr.f32.mxu0 %v1173_v35  ;;  %v13681_v35 = vld [vmem:[#allocation2 + $0x41] sm:$0xff] }
 0x155   : > { %9810 = vmatmul.mubr.f32.vlgmr.msra.gmra.mrb[0].mxu0 %v1174_v27  ;;  %v11549_v27 = vpack.c.bf16 %v1647_v17, %v1646_v16  ;;  %v13693_v16 = vld [vmem:[#allocation2 + $0x61] sm:$0xff]  ;;  %v13695_v17 = vld [vmem:[#allocation2 + $0x69] sm:$0xff] }
 0x156   : > { %11540 = vmatpush3.bf16.msra.mxu0 %v13572_v7  ;;  %9812 = vmatprep.mubr.f32.mxu0 %v1175_v28  ;;  %v1648_v28 = vld [vmem:[#allocation6 + $0x1c0] sm:$0xff]  ;;  %15399 = vst [vmem:[#allocation61_spill] sm:$0xff] %v13693_v16  ;;  %15400 = vst [vmem:[#allocation62_spill] sm:$0xff] %v13695_v17 }
 0x157   : > { %11542 = vmatprep.subr.bf16.mxu0 %v11541_v25  ;;  %v11553_v7 = vpack.c.bf16 %v1649_v30, %v1648_v28  ;;  %v13701_v28 = vld [vmem:[#allocation2 + $0x79] sm:$0xff]  ;;  %v11561_v30 = vpack.c.bf16 %v1653_v13, %v1652_v12  ;;  %v13711_v12 = vld [vmem:[#allocation2 + $0x91] sm:$0xff] }
 0x158   : > { %15403 = vst [vmem:[#allocation65_spill] sm:$0xff] %v13711_v12  ;;  %v13713_v13 = vld [vmem:[#allocation2 + $0x99] sm:$0xff] }
 0x159   : > { %9813 = vmatmul.mubr.f32.gmra.mrb[2].mxu0 %v13675_v22  ;;  %15404 = vst [vmem:[#allocation66_spill] sm:$0xff] %v13713_v13 }
 0x15a   : > { %9815 = vmatprep.mubr.f32.mxu0 %v13677_v18  ;;  %11544 = vmatpush3.bf16.msra.mxu0 %v11541_v25  ;;  %v11557_v25 = vpack.c.bf16 %v1651_v15, %v1650_v14  ;;  %v13705_v14 = vld [vmem:[#allocation2 + $0x81] sm:$0xff]  ;;  %v13707_v15 = vld [vmem:[#allocation2 + $0x89] sm:$0xff] }
 0x15b   : > { %11546 = vmatprep.subr.bf16.mxu0 %v11545_v20  ;;  %15401 = vst [vmem:[#allocation63_spill] sm:$0xff] %v13705_v14  ;;  %15402 = vst [vmem:[#allocation64_spill] sm:$0xff] %v13707_v15 }
 0x15d   : > { %9816 = vmatmul.mubr.f32.gmra.mrb[4].mxu0 %v13681_v35 }
 0x15e   : > { %9818 = vmatprep.mubr.f32.mxu0 %v13683_v29  ;;  %11548 = vmatpush3.bf16.msra.mxu0 %v11545_v20  ;;  %v13699_v20 = vld [vmem:[#allocation2 + $0x71] sm:$0xff] }
 0x15f   : > { %11550 = vmatprep.subr.bf16.mxu0 %v11549_v27 }
 0x161   : > { %9819 = vmatmul.mubr.f32.gmra.mrb[6].mxu0 %v13687_v21  ;;  %v1655_v21 = vld [vmem:[#allocation6 + $0x1f8] sm:$0xff] }
 0x162   : > { %9821 = vmatprep.mubr.f32.mxu0 %v13689_v26  ;;  %11552 = vmatpush3.bf16.msra.mxu0 %v11549_v27  ;;  %v1654_v26 = vld [vmem:[#allocation6 + $0x1f0] sm:$0xff] }
 0x163   : > { %11554 = vmatprep.subr.bf16.mxu0 %v11553_v7  ;;  %v11565_v27 = vpack.c.bf16 %v1655_v21, %v1654_v26  ;;  %v13721_v21 = vld [vmem:[#allocation2 + $0xa9] sm:$0xff]  ;;  %v13726_v26 = vld [vmem:[#allocation2 + $0xb1] sm:$0xff] }
 0x164   : > { %15406 = vst [vmem:[#allocation68_spill] sm:$0xff] %v13721_v21  ;;  %15407 = vst [vmem:[#allocation69_spill] sm:$0xff] %v13726_v26 }
 0x165   : > { %9822 = vmatmul.mubr.f32.gmra.mrb[8].mxu0 %v13693_v16  ;;  %v2059_v16 = vld [vmem:[#allocation6 + $0x208] sm:$0xff] }
 0x166   : > { %9824 = vmatprep.mubr.f32.mxu0 %v13695_v17  ;;  %11556 = vmatpush3.bf16.msra.mxu0 %v11553_v7  ;;  %v2058_v17 = vld [vmem:[#allocation6 + $0x200] sm:$0xff] }
 0x167   : > { %11558 = vmatprep.subr.bf16.mxu0 %v11557_v25  ;;  %v13715_v7 = vpack.c.bf16 %v2059_v16, %v2058_v17  ;;  %v13732_v16 = vld [vmem:[#allocation2 + $0xc1] sm:$0xff]  ;;  %v13734_v17 = vld [vmem:[#allocation2 + $0xc9] sm:$0xff] }
 0x168   : > { %15409 = vst [vmem:[#allocation71_spill] sm:$0xff] %v13732_v16  ;;  %15410 = vst [vmem:[#allocation72_spill] sm:$0xff] %v13734_v17 }
 0x169   : > { %9825 = vmatmul.mubr.f32.gmra.mrb[10].mxu0 %v13699_v20 }
 0x16a   : > { %9827 = vmatprep.mubr.f32.mxu0 %v13701_v28  ;;  %11560 = vmatpush3.bf16.msra.mxu0 %v11557_v25  ;;  %v13719_v25 = vld [vmem:[#allocation2 + $0xa1] sm:$0xff] }
 0x16b   : > { %11562 = vmatprep.subr.bf16.mxu0 %v11561_v30  ;;  %15405 = vst [vmem:[#allocation67_spill] sm:$0xff] %v13719_v25 }
 0x16d   : > { %9828 = vmatmul.mubr.f32.gmra.mrb[12].mxu0 %v13705_v14  ;;  %v2063_v14 = vld [vmem:[#allocation6 + $0x228] sm:$0xff] }
 0x16e   : > { %9830 = vmatprep.mubr.f32.mxu0 %v13707_v15  ;;  %11564 = vmatpush3.bf16.msra.mxu0 %v11561_v30  ;;  %v13728_v30 = vld [vmem:[#allocation2 + $0xb9] sm:$0xff] }
 0x16f   : > { %11566 = vmatprep.subr.bf16.mxu0 %v11565_v27  ;;  %15408 = vst [vmem:[#allocation70_spill] sm:$0xff] %v13728_v30 }
 0x171   : > { %9831 = vmatmul.mubr.f32.gmra.mrb[14].mxu0 %v13711_v12  ;;  %v13778_v12 = vld [vmem:[#allocation2 + $0x129] sm:$0xff] }
 0x172   : > { %9833 = vmatprep.mubr.f32.mxu0 %v13713_v13  ;;  %11568 = vmatpush3.bf16.msra.mxu0 %v11565_v27  ;;  %v13738_v27 = vld [vmem:[#allocation2 + $0xd1] sm:$0xff]  ;;  %15424 = vst [vmem:[#allocation86_spill] sm:$0xff] %v13778_v12 }
 0x173   : > { %11570 = vmatprep.subr.bf16.mxu0 %v13715_v7  ;;  %15411 = vst [vmem:[#allocation73_spill] sm:$0xff] %v13738_v27  ;;  %v13759_v13 = vld [vmem:[%s13284_s18 + $0x178] sm:$0xff] }
 0x174   : > { %15418 = vst [vmem:[#allocation80_spill] sm:$0xff] %v13759_v13  ;;  %433 = vst [vmem:[#allocation2 + $0x1a8] sm:$0xff] %v13759_v13 }
 0x175   : > { %9834 = vmatmul.mubr.f32.gmra.mrb[16].mxu0 %v13719_v25  ;;  %v13750_v25 = vld [vmem:[#allocation2 + $0xf1] sm:$0xff] }
 0x176   : > { %9836 = vmatprep.mubr.f32.mxu0 %v13721_v21  ;;  %v13740_v21 = vld [vmem:[#allocation2 + $0xd9] sm:$0xff]  ;;  %15415 = vst [vmem:[#allocation77_spill] sm:$0xff] %v13750_v25 }
 0x177   : > { %15412 = vst [vmem:[#allocation74_spill] sm:$0xff] %v13740_v21 }
 0x179   : > { %9837 = vmatmul.mubr.f32.gmra.mrb[18].mxu0 %v13726_v26  ;;  %v13744_v26 = vld [vmem:[#allocation2 + $0xe1] sm:$0xff] }
 0x17a   : > { %9839 = vmatprep.mubr.f32.mxu0 %v13728_v30  ;;  %15413 = vst [vmem:[#allocation75_spill] sm:$0xff] %v13744_v26  ;;  %v13746_v30 = vld [vmem:[#allocation2 + $0xe9] sm:$0xff] }
 0x17b   : > { %15414 = vst [vmem:[#allocation76_spill] sm:$0xff] %v13746_v30 }
 0x17d   : > { %9840 = vmatmul.mubr.f32.gmra.mrb[20].mxu0 %v13732_v16  ;;  %v13752_v16 = vld [vmem:[#allocation2 + $0xf9] sm:$0xff] }
 0x17e   : > { %9842 = vmatprep.mubr.f32.mxu0 %v13734_v17  ;;  %15416 = vst [vmem:[#allocation78_spill] sm:$0xff] %v13752_v16  ;;  %v13755_v17 = vld [vmem:[%s13284_s18 + $0x170] sm:$0xff] }
 0x17f   : > { %15417 = vst [vmem:[#allocation79_spill] sm:$0xff] %v13755_v17  ;;  %432 = vst [vmem:[#allocation2 + $0x1a0] sm:$0xff] %v13755_v17 }
 0x181   : > { %9843 = vmatmul.mubr.f32.gmra.mrb[22].mxu0 %v13738_v27  ;;  %v13772_v27 = vld [vmem:[#allocation2 + $0x119] sm:$0xff] }
 0x182   : > { %9845 = vmatprep.mubr.f32.mxu0 %v13740_v21  ;;  %v13764_v21 = vld [vmem:[#allocation2 + $0x101] sm:$0xff]  ;;  %15422 = vst [vmem:[#allocation84_spill] sm:$0xff] %v13772_v27 }
 0x183   : > { %15419 = vst [vmem:[#allocation81_spill] sm:$0xff] %v13764_v21 }
 0x185   : > { %9846 = vmatmul.mubr.f32.gmra.mrb[24].mxu0 %v13744_v26  ;;  %v13766_v26 = vld [vmem:[#allocation2 + $0x109] sm:$0xff] }
 0x186   : > { %9848 = vmatprep.mubr.f32.mxu0 %v13746_v30  ;;  %15420 = vst [vmem:[#allocation82_spill] sm:$0xff] %v13766_v26  ;;  %v13770_v30 = vld [vmem:[#allocation2 + $0x111] sm:$0xff] }
 0x187   : > { %15421 = vst [vmem:[#allocation83_spill] sm:$0xff] %v13770_v30 }
 0x189   : > { %9849 = vmatmul.mubr.f32.gmra.mrb[26].mxu0 %v13750_v25  ;;  %v13776_v25 = vld [vmem:[#allocation2 + $0x121] sm:$0xff] }
 0x18a   : > { %9851 = vmatprep.mubr.f32.mxu0 %v13752_v16  ;;  %15423 = vst [vmem:[#allocation85_spill] sm:$0xff] %v13776_v25  ;;  %v13782_v16 = vld [vmem:[#allocation2 + $0x131] sm:$0xff] }
 0x18b   : > { %15425 = vst [vmem:[#allocation87_spill] sm:$0xff] %v13782_v16 }
 0x18d   : > { %9852 = vmatmul.mubr.f32.gmra.mrb[28].mxu0 %v13764_v21  ;;  %v13784_v21 = vld [vmem:[#allocation2 + $0x139] sm:$0xff] }
 0x18e   : > { %9854 = vmatprep.mubr.f32.mxu0 %v13766_v26  ;;  %15426 = vst [vmem:[#allocation88_spill] sm:$0xff] %v13784_v21  ;;  %v13788_v26 = vld [vmem:[#allocation2 + $0x141] sm:$0xff] }
 0x18f   : > { %15427 = vst [vmem:[#allocation89_spill] sm:$0xff] %v13788_v26 }
 0x191   : > { %9855 = vmatmul.mubr.f32.gmra.mrb[30].mxu0 %v13770_v30  ;;  %v13790_v30 = vld [vmem:[#allocation2 + $0x149] sm:$0xff] }
 0x192   : > { %9857 = vmatprep.mubr.f32.mxu0 %v13772_v27  ;;  %15428 = vst [vmem:[#allocation90_spill] sm:$0xff] %v13790_v30  ;;  %v13794_v27 = vld [vmem:[#allocation2 + $0x151] sm:$0xff] }
 0x193   : > { %15429 = vst [vmem:[#allocation91_spill] sm:$0xff] %v13794_v27 }
 0x195   : > { %9858 = vmatmul.mubr.f32.gmra.mrb[32].mxu0 %v13776_v25  ;;  %v13796_v25 = vld [vmem:[#allocation2 + $0x159] sm:$0xff] }
 0x196   : > { %9860 = vmatprep.mubr.f32.mxu0 %v13778_v12  ;;  %15430 = vst [vmem:[#allocation92_spill] sm:$0xff] %v13796_v25  ;;  %v13800_v12 = vld [vmem:[#allocation2 + $0x161] sm:$0xff] }
 0x197   : > { %15431 = vst [vmem:[#allocation93_spill] sm:$0xff] %v13800_v12 }
 0x199   : > { %9861 = vmatmul.mubr.f32.gmra.mrb[34].mxu0 %v13782_v16  ;;  %v13802_v16 = vld [vmem:[#allocation2 + $0x169] sm:$0xff] }
 0x19a   : > { %9863 = vmatprep.mubr.f32.mxu0 %v13784_v21  ;;  %15432 = vst [vmem:[#allocation94_spill] sm:$0xff] %v13802_v16  ;;  %v13806_v21 = vld [vmem:[#allocation2 + $0x171] sm:$0xff] }
 0x19b   : > { %15433 = vst [vmem:[#allocation95_spill] sm:$0xff] %v13806_v21 }
 0x19d   : > { %9864 = vmatmul.mubr.f32.gmra.mrb[36].mxu0 %v13788_v26  ;;  %v13808_v26 = vld [vmem:[#allocation2 + $0x179] sm:$0xff] }
 0x19e   : > { %9866 = vmatprep.mubr.f32.mxu0 %v13790_v30  ;;  %15434 = vst [vmem:[#allocation96_spill] sm:$0xff] %v13808_v26  ;;  %v13812_v30 = vld [vmem:[#allocation2 + $0x181] sm:$0xff] }
 0x19f   : > { %15435 = vst [vmem:[#allocation97_spill] sm:$0xff] %v13812_v30 }
 0x1a1   : > { %9867 = vmatmul.mubr.f32.gmra.mrb[38].mxu0 %v13794_v27  ;;  %v13814_v27 = vld [vmem:[#allocation2 + $0x189] sm:$0xff] }
 0x1a2   : > { %9869 = vmatprep.mubr.f32.mxu0 %v13796_v25  ;;  %15436 = vst [vmem:[#allocation98_spill] sm:$0xff] %v13814_v27  ;;  %v13818_v25 = vld [vmem:[#allocation2 + $0x191] sm:$0xff] }
 0x1a5   : > { %9870 = vmatmul.mubr.f32.gmra.mrb[40].mxu0 %v13800_v12  ;;  %v2060_v12 = vld [vmem:[#allocation6 + $0x210] sm:$0xff] }
 0x1a6   : > { %9872 = vmatprep.mubr.f32.mxu0 %v13802_v16  ;;  %v2061_v16 = vld [vmem:[#allocation6 + $0x218] sm:$0xff] }
 0x1a7   : > { %v11573_v15 = vpack.c.bf16 %v2061_v16, %v2060_v12  ;;  %v2066_v12 = vld [vmem:[#allocation6 + $0x240] sm:$0xff]  ;;  %v2067_v16 = vld [vmem:[#allocation6 + $0x248] sm:$0xff] }
 0x1a9   : > { %9873 = vmatmul.mubr.f32.gmra.mrb[42].mxu0 %v13806_v21  ;;  %v2062_v21 = vld [vmem:[#allocation6 + $0x220] sm:$0xff] }
 0x1aa   : > { %9875 = vmatprep.mubr.f32.mxu0 %v13808_v26  ;;  %v2065_v26 = vld [vmem:[#allocation6 + $0x238] sm:$0xff] }
 0x1ad   : > { %9876 = vmatmul.mubr.f32.gmra.mrb[44].mxu0 %v13812_v30  ;;  %v11577_v30 = vpack.c.bf16 %v2063_v14, %v2062_v21  ;;  %v2069_v14 = vld [vmem:[#allocation6 + $0x258] sm:$0xff]  ;;  %v2477_v21 = vld [vmem:[#allocation6 + $0x288] sm:$0xff] }
 0x1ae   : > { %9878 = vmatprep.mubr.f32.mxu0 %v13814_v27  ;;  %v2064_v27 = vld [vmem:[#allocation6 + $0x230] sm:$0xff] }
 0x1b1   : > { %9879 = vmatmul.mubr.f32.gmra.mrb[46].mxu0 %v13818_v25 }
 0x1b2   : > { %9913 = vmatprep.mubr.f32.mxu0 %v13532_v57  ;;  %v11581_v57 = vpack.c.bf16 %v2065_v26, %v2064_v27  ;;  %v2491_v26 = vld [vmem:[#allocation6 + $0x2f8] sm:$0xff]  ;;  %v13908_v27 = vld [vmem:[#allocation2 + $0xa0] sm:$0xff] }
 0x1b5   : > { %9914 = vmatmul.mubr.f32.vlgmr.msra.gmra.mrb[0].mxu0 %v13534_v58  ;;  %v11585_v58 = vpack.c.bf16 %v2067_v16, %v2066_v12  ;;  %v2894_v12 = vld [vmem:[#allocation6 + $0x300] sm:$0xff]  ;;  %v2895_v16 = vld [vmem:[#allocation6 + $0x308] sm:$0xff] }
 0x1b6   : > { %11572 = vmatpush3.bf16.msra.mxu0 %v13715_v7  ;;  %9916 = vmatprep.mubr.f32.mxu0 %v13538_v9  ;;  %v2068_v9 = vld [vmem:[#allocation6 + $0x250] sm:$0xff]  ;;  %v2073_v7 = vld [vmem:[#allocation6 + $0x278] sm:$0xff] }
 0x1b7   : > { %11574 = vmatprep.subr.bf16.mxu0 %v11573_v15 }
 0x1b9   : > { %9917 = vmatmul.mubr.f32.gmra.mrb[2].mxu0 %v13540_v10  ;;  %v11589_v10 = vpack.c.bf16 %v2069_v14, %v2068_v9  ;;  %v13914_v9 = vld [vmem:[#allocation2 + $0xb0] sm:$0xff]  ;;  %v13916_v14 = vpack.c.bf16 %v2895_v16, %v2894_v12  ;;  %v2901_v16 = vld [vmem:[#allocation6 + $0x338] sm:$0xff] }
 0x1ba   : > { %9919 = vmatprep.mubr.f32.mxu0 %v13544_v24  ;;  %11576 = vmatpush3.bf16.msra.mxu0 %v11573_v15  ;;  %v2070_v24 = vld [vmem:[#allocation6 + $0x260] sm:$0xff]  ;;  %v2071_v15 = vld [vmem:[#allocation6 + $0x268] sm:$0xff]  ;;  %v2900_v12 = vld [vmem:[#allocation6 + $0x330] sm:$0xff] }
 0x1bb   : > { %11578 = vmatprep.subr.bf16.mxu0 %v11577_v30 }
 0x1bd   : > { %9920 = vmatmul.mubr.f32.gmra.mrb[4].mxu0 %v13546_v32  ;;  %v11593_v32 = vpack.c.bf16 %v2071_v15, %v2070_v24  ;;  %v13922_v24 = vld [vmem:[#allocation2 + $0xc0] sm:$0xff]  ;;  %v13927_v15 = vld [vmem:[#allocation2 + $0xc8] sm:$0xff] }
 0x1be   : > { %9922 = vmatprep.mubr.f32.mxu0 %v13550_v47  ;;  %11580 = vmatpush3.bf16.msra.mxu0 %v11577_v30  ;;  %v2072_v47 = vld [vmem:[#allocation6 + $0x270] sm:$0xff]  ;;  %v13906_v30 = vld [vmem:[#allocation2 + $0x98] sm:$0xff] }
 0x1bf   : > { %11582 = vmatprep.subr.bf16.mxu0 %v11581_v57 }
 0x1c1   : > { %9923 = vmatmul.mubr.f32.gmra.mrb[6].mxu0 %v13552_v48  ;;  %v11597_v48 = vpack.c.bf16 %v2073_v7, %v2072_v47  ;;  %v13933_v47 = vld [vmem:[#allocation2 + $0xd8] sm:$0xff]  ;;  %v13935_v7 = vld [vmem:[#allocation2 + $0xe0] sm:$0xff] }
 0x1c2   : > { %9925 = vmatprep.mubr.f32.mxu0 %v13556_v4  ;;  %11584 = vmatpush3.bf16.msra.mxu0 %v11581_v57  ;;  %v2476_v4 = vld [vmem:[#allocation6 + $0x280] sm:$0xff] }
 0x1c3   : > { %11586 = vmatprep.subr.bf16.mxu0 %v11585_v58 }
 0x1c5   : > { %9926 = vmatmul.mubr.f32.gmra.mrb[8].mxu0 %v13558_v8  ;;  %v11601_v8 = vpack.c.bf16 %v2477_v21, %v2476_v4  ;;  %v13941_v4 = vld [vmem:[#allocation2 + $0xf0] sm:$0xff]  ;;  %v13945_v21 = vld [vmem:[#allocation2 + $0xf8] sm:$0xff] }
 0x1c6   : > { %9928 = vmatprep.mubr.f32.mxu0 %v13562_v11  ;;  %11588 = vmatpush3.bf16.msra.mxu0 %v11585_v58  ;;  %v2486_v11 = vld [vmem:[#allocation6 + $0x2d0] sm:$0xff]  ;;  %v13912_v58 = vld [vmem:[#allocation2 + $0xa8] sm:$0xff] }
 0x1c7   : > { %11590 = vmatprep.subr.bf16.mxu0 %v11589_v10 }
 0x1c9   : > { %9929 = vmatmul.mubr.f32.gmra.mrb[10].mxu0 %v13564_v34  ;;  %v2487_v34 = vld [vmem:[#allocation6 + $0x2d8] sm:$0xff] }
 0x1ca   : > { %9931 = vmatprep.mubr.f32.mxu0 %v13568_v33  ;;  %11592 = vmatpush3.bf16.msra.mxu0 %v11589_v10  ;;  %v13894_v33 = vld [vmem:[#allocation2 + $0x78] sm:$0xff] }
 0x1cb   : > { %11594 = vmatprep.subr.bf16.mxu0 %v11593_v32  ;;  %v13920_v10 = vld [vmem:[#allocation2 + $0xb8] sm:$0xff] }
 0x1cd   : > { %9932 = vmatmul.mubr.f32.gmra.mrb[12].mxu0 %v13570_v56  ;;  %v13896_v56 = vld [vmem:[#allocation2 + $0x80] sm:$0xff] }
 0x1ce   : > { %9934 = vmatprep.mubr.f32.mxu0 %v13576_v0  ;;  %11596 = vmatpush3.bf16.msra.mxu0 %v11593_v32  ;;  %v11621_v0 = vpack.c.bf16 %v2487_v34, %v2486_v11  ;;  %v13929_v32 = vld [vmem:[#allocation2 + $0xd0] sm:$0xff]  ;;  %v13995_v11 = vld [vmem:[#allocation2 + $0x180] sm:$0xff]  ;;  %v13999_v34 = vld [vmem:[#allocation2 + $0x188] sm:$0xff] }
 0x1cf   : > { %11598 = vmatprep.subr.bf16.mxu0 %v11597_v48 }
 0x1d1   : > { %9935 = vmatmul.mubr.f32.gmra.mrb[14].mxu0 %v13578_v6  ;;  %v2488_v6 = vld [vmem:[#allocation6 + $0x2e0] sm:$0xff] }
 0x1d2   : > { %9937 = vmatprep.mubr.f32.mxu0 %v13583_v19  ;;  %11600 = vmatpush3.bf16.msra.mxu0 %v11597_v48  ;;  %v2489_v19 = vld [vmem:[#allocation6 + $0x2e8] sm:$0xff] }
 0x1d3   : > { %11602 = vmatprep.subr.bf16.mxu0 %v11601_v8  ;;  %v13939_v48 = vld [vmem:[#allocation2 + $0xe8] sm:$0xff] }
 0x1d5   : > { %9938 = vmatmul.mubr.f32.gmra.mrb[16].mxu0 %v13585_v23  ;;  %v13900_v23 = vld [vmem:[#allocation2 + $0x88] sm:$0xff] }
 0x1d6   : > { %9940 = vmatprep.mubr.f32.mxu0 %v13589_v3  ;;  %v13902_v3 = vld [vmem:[#allocation2 + $0x90] sm:$0xff] }
 0x1d9   : > { %9941 = vmatmul.mubr.f32.gmra.mrb[18].mxu0 %v13591_v5  ;;  %v11625_v5 = vpack.c.bf16 %v2489_v19, %v2488_v6  ;;  %v2896_v6 = vld [vmem:[#allocation6 + $0x310] sm:$0xff]  ;;  %v2897_v19 = vld [vmem:[#allocation6 + $0x318] sm:$0xff] }
 0x1da   : > { %9943 = vmatprep.mubr.f32.mxu0 %v13595_v43  ;;  %v2490_v43 = vld [vmem:[#allocation6 + $0x2f0] sm:$0xff] }
 0x1db   : > { %v11629_v57 = vpack.c.bf16 %v2491_v26, %v2490_v43  ;;  %v2898_v43 = vld [vmem:[#allocation6 + $0x320] sm:$0xff]  ;;  %v2899_v26 = vld [vmem:[#allocation6 + $0x328] sm:$0xff] }
 0x1dd   : > { %9944 = vmatmul.mubr.f32.gmra.mrb[20].mxu0 %v13597_v1  ;;  %v13890_v1 = vld [vmem:[#allocation2 + $0x70] sm:$0xff] }
 0x1de   : > { %9946 = vmatprep.mubr.f32.mxu0 %v13601_v2 }
 0x1e1   : > { %9947 = vmatmul.mubr.f32.gmra.mrb[22].mxu0 %v13603_v62  ;;  %v2485_v62 = vld [vmem:[#allocation6 + $0x2c8] sm:$0xff] }
 0x1e2   : > { %9949 = vmatprep.mubr.f32.mxu0 %v13607_v63  ;;  %v13888_v63 = vld [vmem:[#allocation2 + $0x68] sm:$0xff] }
 0x1e5   : > { %9950 = vmatmul.mubr.f32.gmra.mrb[24].mxu0 %v13609_v60  ;;  %v2484_v60 = vld [vmem:[#allocation6 + $0x2c0] sm:$0xff] }
 0x1e6   : > { %9952 = vmatprep.mubr.f32.mxu0 %v13617_v55  ;;  %v13884_v55 = vld [vmem:[#allocation2 + $0x60] sm:$0xff]  ;;  %v11617_v2 = vpack.c.bf16 %v2485_v62, %v2484_v60  ;;  %v13987_v60 = vld [vmem:[#allocation2 + $0x168] sm:$0xff]  ;;  %v13989_v62 = vld [vmem:[#allocation2 + $0x170] sm:$0xff] }
 0x1e9   : > { %9953 = vmatmul.mubr.f32.gmra.mrb[26].mxu0 %v13619_v59 }
 0x1ea   : > { %9955 = vmatprep.mubr.f32.mxu0 %v13623_v53  ;;  %v2483_v53 = vld [vmem:[#allocation6 + $0x2b8] sm:$0xff] }
 0x1ed   : > { %9956 = vmatmul.mubr.f32.gmra.mrb[28].mxu0 %v13625_v54  ;;  %v13882_v54 = vld [vmem:[#allocation2 + $0x58] sm:$0xff] }
 0x1ee   : > { %9958 = vmatprep.mubr.f32.mxu0 %v13629_v51 }
 0x1f1   : > { %9959 = vmatmul.mubr.f32.gmra.mrb[30].mxu0 %v13631_v52  ;;  %v2482_v52 = vld [vmem:[#allocation6 + $0x2b0] sm:$0xff] }
 0x1f2   : > { %9961 = vmatprep.mubr.f32.mxu0 %v13635_v49  ;;  %v13876_v49 = vld [vmem:[#allocation2 + $0x48] sm:$0xff]  ;;  %v11613_v59 = vpack.c.bf16 %v2483_v53, %v2482_v52  ;;  %v13977_v52 = vld [vmem:[#allocation2 + $0x150] sm:$0xff]  ;;  %v13981_v53 = vld [vmem:[#allocation2 + $0x158] sm:$0xff] }
 0x1f5   : > { %9962 = vmatmul.mubr.f32.gmra.mrb[32].mxu0 %v13637_v50  ;;  %v13878_v50 = vld [vmem:[#allocation2 + $0x50] sm:$0xff] }
 0x1f6   : > { %9964 = vmatprep.mubr.f32.mxu0 %v13641_v45  ;;  %v13867_v45 = vld [vmem:[#allocation2 + $0x197] sm:$0xff] }
 0x1f9   : > { %9965 = vmatmul.mubr.f32.gmra.mrb[34].mxu0 %v13643_v46  ;;  %v13869_v46 = vld [vmem:[#allocation2 + $0x19f] sm:$0xff] }
 0x1fa   : > { %9967 = vmatprep.mubr.f32.mxu0 %v13647_v42  ;;  %v2479_v42 = vld [vmem:[#allocation6 + $0x298] sm:$0xff] }
 0x1fd   : > { %9968 = vmatmul.mubr.f32.gmra.mrb[36].mxu0 %v13649_v44  ;;  %v2481_v44 = vld [vmem:[#allocation6 + $0x2a8] sm:$0xff] }
 0x1fe   : > { %9970 = vmatprep.mubr.f32.mxu0 %v13653_v40  ;;  %v13873_v40 = vld [vmem:[#allocation2 + $0x1a7] sm:$0xff] }
 0x201   : > { %9971 = vmatmul.mubr.f32.gmra.mrb[38].mxu0 %v13655_v41  ;;  %v2009_v41 = vld [vmem:[#allocation2 + $0x30] sm:$0xff] }
 0x202   : > { %9973 = vmatprep.mubr.f32.mxu0 %v13659_v38  ;;  %v2478_v38 = vld [vmem:[#allocation6 + $0x290] sm:$0xff] }
 0x205   : > { %9974 = vmatmul.mubr.f32.gmra.mrb[40].mxu0 %v13661_v39  ;;  %v11605_v39 = vpack.c.bf16 %v2479_v42, %v2478_v38  ;;  %v13953_v38 = vld [vmem:[#allocation2 + $0x110] sm:$0xff]  ;;  %v13957_v42 = vld [vmem:[#allocation2 + $0x118] sm:$0xff] }
 0x206   : > { %9976 = vmatprep.mubr.f32.mxu0 %v13665_v36  ;;  %v2010_v36 = vld [vmem:[#allocation2 + $0x38] sm:$0xff] }
 0x209   : > { %9977 = vmatmul.mubr.f32.gmra.mrb[42].mxu0 %v13667_v37  ;;  %v2011_v37 = vld [vmem:[#allocation2 + $0x40] sm:$0xff] }
 0x20a   : > { %9979 = vmatprep.mubr.f32.mxu0 %v13671_v31  ;;  %v2480_v31 = vld [vmem:[#allocation6 + $0x2a0] sm:$0xff] }
 0x20b   : > { %v11609_v51 = vpack.c.bf16 %v2481_v44, %v2480_v31  ;;  %v13969_v31 = vld [vmem:[#allocation2 + $0x138] sm:$0xff]  ;;  %v13971_v44 = vld [vmem:[#allocation2 + $0x140] sm:$0xff] }
 0x20d   : > { %9980 = vmatmul.mubr.f32.gmra.mrb[44].mxu0 %v13867_v45 }
 0x20e   : > { %9982 = vmatprep.mubr.f32.mxu0 %v13869_v46 }
 0x211   : > { %9983 = vmatmul.mubr.f32.gmra.mrb[46].mxu0 %v13873_v40 }
 0x212   : > { %10017 = vmatprep.mubr.f32.mxu0 %v2009_v41  ;;  %v13951_v41 = vld [vmem:[#allocation2 + $0x108] sm:$0xff] }
 0x215   : > { %10018 = vmatmul.mubr.f32.vlgmr.msra.gmra.mrb[0].mxu0 %v2010_v36  ;;  %v13959_v36 = vld [vmem:[#allocation2 + $0x120] sm:$0xff] }
 0x216   : > { %11604 = vmatpush3.bf16.msra.mxu0 %v11601_v8  ;;  %10020 = vmatprep.mubr.f32.mxu0 %v2011_v37  ;;  %v13947_v8 = vld [vmem:[#allocation2 + $0x100] sm:$0xff]  ;;  %v13963_v37 = vld [vmem:[#allocation2 + $0x128] sm:$0xff] }
 0x217   : > { %11606 = vmatprep.subr.bf16.mxu0 %v11605_v39 }
 0x219   : > { %10021 = vmatmul.mubr.f32.gmra.mrb[2].mxu0 %v13876_v49 }
 0x21a   : > { %10023 = vmatprep.mubr.f32.mxu0 %v13878_v50  ;;  %11608 = vmatpush3.bf16.msra.mxu0 %v11605_v39  ;;  %v13965_v39 = vld [vmem:[#allocation2 + $0x130] sm:$0xff] }
 0x21b   : > { %11610 = vmatprep.subr.bf16.mxu0 %v11609_v51 }
 0x21d   : > { %10024 = vmatmul.mubr.f32.gmra.mrb[4].mxu0 %v13882_v54 }
 0x21e   : > { %10026 = vmatprep.mubr.f32.mxu0 %v13884_v55  ;;  %11612 = vmatpush3.bf16.msra.mxu0 %v11609_v51  ;;  %v13975_v51 = vld [vmem:[#allocation2 + $0x148] sm:$0xff] }
 0x21f   : > { %11614 = vmatprep.subr.bf16.mxu0 %v11613_v59 }
 0x221   : > { %10027 = vmatmul.mubr.f32.gmra.mrb[6].mxu0 %v13888_v63 }
 0x222   : > { %10029 = vmatprep.mubr.f32.mxu0 %v13890_v1  ;;  %11616 = vmatpush3.bf16.msra.mxu0 %v11613_v59  ;;  %v13983_v59 = vld [vmem:[#allocation2 + $0x160] sm:$0xff] }
 0x223   : > { %11618 = vmatprep.subr.bf16.mxu0 %v11617_v2 }
 0x225   : > { %10030 = vmatmul.mubr.f32.gmra.mrb[8].mxu0 %v13894_v33 }
 0x226   : > { %10032 = vmatprep.mubr.f32.mxu0 %v13896_v56  ;;  %11620 = vmatpush3.bf16.msra.mxu0 %v11617_v2  ;;  %v13993_v2 = vld [vmem:[#allocation2 + $0x178] sm:$0xff] }
 0x227   : > { %11622 = vmatprep.subr.bf16.mxu0 %v11621_v0 }
 0x229   : > { %10033 = vmatmul.mubr.f32.gmra.mrb[10].mxu0 %v13900_v23 }
 0x22a   : > { %10035 = vmatprep.mubr.f32.mxu0 %v13902_v3  ;;  %11624 = vmatpush3.bf16.msra.mxu0 %v11621_v0  ;;  %v14001_v0 = vld [vmem:[#allocation2 + $0x190] sm:$0xff] }
 0x22b   : > { %11626 = vmatprep.subr.bf16.mxu0 %v11625_v5 }
 0x22d   : > { %10036 = vmatmul.mubr.f32.gmra.mrb[12].mxu0 %v13906_v30 }
 0x22e   : > { %10038 = vmatprep.mubr.f32.mxu0 %v13908_v27  ;;  %11628 = vmatpush3.bf16.msra.mxu0 %v11625_v5  ;;  %v11637_v5 = vpack.c.bf16 %v2897_v19, %v2896_v6  ;;  %v2902_v6 = vld [vmem:[#allocation6 + $0x340] sm:$0xff]  ;;  %v2903_v19 = vld [vmem:[#allocation6 + $0x348] sm:$0xff] }
 0x22f   : > { %11630 = vmatprep.subr.bf16.mxu0 %v11629_v57 }
 0x231   : > { %10039 = vmatmul.mubr.f32.gmra.mrb[14].mxu0 %v13912_v58 }
 0x232   : > { %10041 = vmatprep.mubr.f32.mxu0 %v13914_v9  ;;  %11632 = vmatpush3.bf16.msra.mxu0 %v11629_v57  ;;  %v11641_v57 = vpack.c.bf16 %v2899_v26, %v2898_v43  ;;  %v2905_v43 = vld [vmem:[#allocation6 + $0x358] sm:$0xff]  ;;  %v15440_v26 = vld [vmem:[#allocation62_spill] sm:$0xff] }
 0x233   : > { %11634 = vmatprep.subr.bf16.mxu0 %v13916_v14 }
 0x235   : > { %10042 = vmatmul.mubr.f32.gmra.mrb[16].mxu0 %v13920_v10 }
 0x236   : > { %10044 = vmatprep.mubr.f32.mxu0 %v13922_v24 }
 0x239   : > { %10045 = vmatmul.mubr.f32.gmra.mrb[18].mxu0 %v13927_v15 }
 0x23a   : > { %10047 = vmatprep.mubr.f32.mxu0 %v13929_v32 }
 0x23d   : > { %10048 = vmatmul.mubr.f32.gmra.mrb[20].mxu0 %v13933_v47 }
 0x23e   : > { %10050 = vmatprep.mubr.f32.mxu0 %v13935_v7 }
 0x241   : > { %10051 = vmatmul.mubr.f32.gmra.mrb[22].mxu0 %v13939_v48 }
 0x242   : > { %10053 = vmatprep.mubr.f32.mxu0 %v13941_v4 }
 0x245   : > { %10054 = vmatmul.mubr.f32.gmra.mrb[24].mxu0 %v13945_v21 }
 0x246   : > { %10056 = vmatprep.mubr.f32.mxu0 %v13947_v8 }
 0x249   : > { %10057 = vmatmul.mubr.f32.gmra.mrb[26].mxu0 %v13951_v41 }
 0x24a   : > { %10059 = vmatprep.mubr.f32.mxu0 %v13953_v38 }
 0x24d   : > { %10060 = vmatmul.mubr.f32.gmra.mrb[28].mxu0 %v13957_v42 }
 0x24e   : > { %10062 = vmatprep.mubr.f32.mxu0 %v13959_v36 }
 0x251   : > { %10063 = vmatmul.mubr.f32.gmra.mrb[30].mxu0 %v13963_v37 }
 0x252   : > { %10065 = vmatprep.mubr.f32.mxu0 %v13965_v39 }
 0x255   : > { %10066 = vmatmul.mubr.f32.gmra.mrb[32].mxu0 %v13969_v31 }
 0x256   : > { %10068 = vmatprep.mubr.f32.mxu0 %v13971_v44 }
 0x259   : > { %10069 = vmatmul.mubr.f32.gmra.mrb[34].mxu0 %v13975_v51 }
 0x25a   : > { %10071 = vmatprep.mubr.f32.mxu0 %v13977_v52 }
 0x25d   : > { %10072 = vmatmul.mubr.f32.gmra.mrb[36].mxu0 %v13981_v53 }
 0x25e   : > { %10074 = vmatprep.mubr.f32.mxu0 %v13983_v59 }
 0x261   : > { %10075 = vmatmul.mubr.f32.gmra.mrb[38].mxu0 %v13987_v60 }
 0x262   : > { %10077 = vmatprep.mubr.f32.mxu0 %v13989_v62 }
 0x265   : > { %10078 = vmatmul.mubr.f32.gmra.mrb[40].mxu0 %v13993_v2 }
 0x266   : > { %10080 = vmatprep.mubr.f32.mxu0 %v13995_v11 }
 0x269   : > { %10081 = vmatmul.mubr.f32.gmra.mrb[42].mxu0 %v13999_v34 }
 0x26a   : > { %10083 = vmatprep.mubr.f32.mxu0 %v14001_v0 }
 0x26d   : > { %10084 = vmatmul.mubr.f32.gmra.mrb[44].mxu0 %v13612_v61  ;;  %v2851_v61 = vld [vmem:[#allocation2 + $0x77] sm:$0xff] }
 0x26e   : > { %10086 = vmatprep.mubr.f32.mxu0 %v13755_v17  ;;  %v15437_v17 = vld [vmem:[#allocation59_spill] sm:$0xff] }
 0x271   : > { %10087 = vmatmul.mubr.f32.gmra.mrb[46].mxu0 %v13759_v13  ;;  %v15438_v13 = vld [vmem:[#allocation60_spill] sm:$0xff] }
 0x272   : > { %10121 = vmatprep.mubr.f32.mxu0 %v13675_v22  ;;  %v11645_v22 = vpack.c.bf16 %v2901_v16, %v2900_v12  ;;  %v15441_v12 = vld [vmem:[#allocation63_spill] sm:$0xff]  ;;  %v2909_v16 = vld [vmem:[#allocation6 + $0x378] sm:$0xff] }
 0x275   : > { %10122 = vmatmul.mubr.f32.vlgmr.msra.gmra.mrb[0].mxu0 %v13677_v18  ;;  %v15439_v18 = vld [vmem:[#allocation61_spill] sm:$0xff] }
 0x276   : > { %11636 = vmatpush3.bf16.msra.mxu0 %v13916_v14  ;;  %10124 = vmatprep.mubr.f32.mxu0 %v13681_v35  ;;  %v11649_v35 = vpack.c.bf16 %v2903_v19, %v2902_v6  ;;  %v2904_v14 = vld [vmem:[#allocation6 + $0x350] sm:$0xff]  ;;  %v15442_v6 = vld [vmem:[#allocation64_spill] sm:$0xff]  ;;  %v15443_v19 = vld [vmem:[#allocation65_spill] sm:$0xff] }
 0x277   : > { %11638 = vmatprep.subr.bf16.mxu0 %v11637_v5 }
 0x279   : > { %10125 = vmatmul.mubr.f32.gmra.mrb[2].mxu0 %v13683_v29  ;;  %v11653_v29 = vpack.c.bf16 %v2905_v43, %v2904_v14  ;;  %v15444_v14 = vld [vmem:[#allocation66_spill] sm:$0xff]  ;;  %v15445_v43 = vld [vmem:[#allocation67_spill] sm:$0xff] }
 0x27a   : > { %10127 = vmatprep.mubr.f32.mxu0 %v15437_v17  ;;  %11640 = vmatpush3.bf16.msra.mxu0 %v11637_v5  ;;  %v2906_v17 = vld [vmem:[#allocation6 + $0x360] sm:$0xff]  ;;  %v2907_v5 = vld [vmem:[#allocation6 + $0x368] sm:$0xff] }
 0x27b   : > { %11642 = vmatprep.subr.bf16.mxu0 %v11641_v57 }
 0x27d   : > { %10128 = vmatmul.mubr.f32.gmra.mrb[4].mxu0 %v15438_v13  ;;  %v11657_v13 = vpack.c.bf16 %v2907_v5, %v2906_v17  ;;  %v15448_v17 = vld [vmem:[#allocation70_spill] sm:$0xff]  ;;  %v15450_v5 = vld [vmem:[#allocation72_spill] sm:$0xff] }
 0x27e   : > { %10130 = vmatprep.mubr.f32.mxu0 %v15439_v18  ;;  %11644 = vmatpush3.bf16.msra.mxu0 %v11641_v57  ;;  %v2908_v57 = vld [vmem:[#allocation6 + $0x370] sm:$0xff]  ;;  %v3313_v18 = vld [vmem:[#allocation6 + $0x388] sm:$0xff] }
 0x27f   : > { %11646 = vmatprep.subr.bf16.mxu0 %v11645_v22 }
 0x281   : > { %10131 = vmatmul.mubr.f32.gmra.mrb[6].mxu0 %v15440_v26  ;;  %v15447_v26 = vld [vmem:[#allocation69_spill] sm:$0xff] }
 0x282   : > { %10133 = vmatprep.mubr.f32.mxu0 %v13699_v20  ;;  %11648 = vmatpush3.bf16.msra.mxu0 %v11645_v22  ;;  %v11661_v20 = vpack.c.bf16 %v2909_v16, %v2908_v57  ;;  %v3312_v22 = vld [vmem:[#allocation6 + $0x380] sm:$0xff]  ;;  %v15452_v57 = vld [vmem:[#allocation74_spill] sm:$0xff]  ;;  %v15453_v16 = vld [vmem:[#allocation75_spill] sm:$0xff] }
 0x283   : > { %11650 = vmatprep.subr.bf16.mxu0 %v11649_v35 }
 0x285   : > { %10134 = vmatmul.mubr.f32.gmra.mrb[8].mxu0 %v13701_v28  ;;  %v11665_v28 = vpack.c.bf16 %v3313_v18, %v3312_v22  ;;  %v15458_v22 = vld [vmem:[#allocation82_spill] sm:$0xff]  ;;  %v15459_v18 = vld [vmem:[#allocation83_spill] sm:$0xff] }
 0x286   : > { %10136 = vmatprep.mubr.f32.mxu0 %v15441_v12  ;;  %11652 = vmatpush3.bf16.msra.mxu0 %v11649_v35  ;;  %v15446_v35 = vld [vmem:[#allocation68_spill] sm:$0xff]  ;;  %v15451_v12 = vld [vmem:[#allocation73_spill] sm:$0xff] }
 0x287   : > { %11654 = vmatprep.subr.bf16.mxu0 %v11653_v29 }
 0x289   : > { %10137 = vmatmul.mubr.f32.gmra.mrb[10].mxu0 %v15442_v6  ;;  %v15455_v6 = vld [vmem:[#allocation77_spill] sm:$0xff] }
 0x28a   : > { %10139 = vmatprep.mubr.f32.mxu0 %v15443_v19  ;;  %11656 = vmatpush3.bf16.msra.mxu0 %v11653_v29  ;;  %v15449_v29 = vld [vmem:[#allocation71_spill] sm:$0xff]  ;;  %v15456_v19 = vld [vmem:[#allocation78_spill] sm:$0xff] }
 0x28b   : > { %11658 = vmatprep.subr.bf16.mxu0 %v11657_v13 }
 0x28d   : > { %10140 = vmatmul.mubr.f32.gmra.mrb[12].mxu0 %v15444_v14  ;;  %v15460_v14 = vld [vmem:[#allocation84_spill] sm:$0xff] }
 0x28e   : > { %10142 = vmatprep.mubr.f32.mxu0 %v15445_v43  ;;  %11660 = vmatpush3.bf16.msra.mxu0 %v11657_v13  ;;  %v15454_v13 = vld [vmem:[#allocation76_spill] sm:$0xff]  ;;  %v15461_v43 = vld [vmem:[#allocation85_spill] sm:$0xff] }
 0x28f   : > { %11662 = vmatprep.subr.bf16.mxu0 %v11661_v20 }
 0x291   : > { %10143 = vmatmul.mubr.f32.gmra.mrb[14].mxu0 %v15446_v35  ;;  %v15462_v35 = vld [vmem:[#allocation86_spill] sm:$0xff] }
 0x292   : > { %10145 = vmatprep.mubr.f32.mxu0 %v15447_v26  ;;  %11664 = vmatpush3.bf16.msra.mxu0 %v11661_v20  ;;  %v15457_v20 = vld [vmem:[#allocation81_spill] sm:$0xff]  ;;  %v15463_v26 = vld [vmem:[#allocation87_spill] sm:$0xff] }
 0x293   : > { %11666 = vmatprep.subr.bf16.mxu0 %v11665_v28 }
 0x295   : > { %10146 = vmatmul.mubr.f32.gmra.mrb[16].mxu0 %v15448_v17  ;;  %v15464_v17 = vld [vmem:[#allocation88_spill] sm:$0xff] }
 0x296   : > { %10148 = vmatprep.mubr.f32.mxu0 %v15449_v29  ;;  %v15465_v29 = vld [vmem:[#allocation89_spill] sm:$0xff] }
 0x299   : > { %10149 = vmatmul.mubr.f32.gmra.mrb[18].mxu0 %v15450_v5  ;;  %v15466_v5 = vld [vmem:[#allocation90_spill] sm:$0xff] }
 0x29a   : > { %10151 = vmatprep.mubr.f32.mxu0 %v15451_v12  ;;  %v15467_v12 = vld [vmem:[#allocation91_spill] sm:$0xff] }
 0x29d   : > { %10152 = vmatmul.mubr.f32.gmra.mrb[20].mxu0 %v15452_v57  ;;  %v15468_v57 = vld [vmem:[#allocation92_spill] sm:$0xff] }
 0x29e   : > { %10154 = vmatprep.mubr.f32.mxu0 %v15453_v16  ;;  %v15469_v16 = vld [vmem:[#allocation93_spill] sm:$0xff] }
 0x2a1   : > { %10155 = vmatmul.mubr.f32.gmra.mrb[22].mxu0 %v15454_v13  ;;  %v15470_v13 = vld [vmem:[#allocation94_spill] sm:$0xff] }
 0x2a2   : > { %10157 = vmatprep.mubr.f32.mxu0 %v15455_v6  ;;  %v15471_v6 = vld [vmem:[#allocation95_spill] sm:$0xff] }
 0x2a5   : > { %10158 = vmatmul.mubr.f32.gmra.mrb[24].mxu0 %v15456_v19  ;;  %v15472_v19 = vld [vmem:[#allocation96_spill] sm:$0xff] }
 0x2a6   : > { %10160 = vmatprep.mubr.f32.mxu0 %v15457_v20  ;;  %v15473_v20 = vld [vmem:[#allocation97_spill] sm:$0xff] }
 0x2a9   : > { %10161 = vmatmul.mubr.f32.gmra.mrb[26].mxu0 %v15458_v22  ;;  %v15474_v22 = vld [vmem:[#allocation98_spill] sm:$0xff] }
 0x2aa   : > { %10163 = vmatprep.mubr.f32.mxu0 %v15459_v18  ;;  %v14054_v18 = vld [vmem:[#allocation2 + $0x199] sm:$0xff] }
 0x2ad   : > { %10164 = vmatmul.mubr.f32.gmra.mrb[28].mxu0 %v15460_v14  ;;  %v14056_v14 = vld [vmem:[#allocation2 + $0x1a1] sm:$0xff] }
 0x2ae   : > { %10166 = vmatprep.mubr.f32.mxu0 %v15461_v43  ;;  %v14060_v43 = vld [vmem:[#allocation2 + $0x1a9] sm:$0xff] }
 0x2af   : > { %15475 = vst [vmem:[#allocation59_spill] sm:$0xff] %v14060_v43 }
 0x2b1   : > { %10167 = vmatmul.mubr.f32.gmra.mrb[30].mxu0 %v15462_v35  ;;  %v2845_v35 = vld [vmem:[#allocation2 + $0x47] sm:$0xff] }
 0x2b2   : > { %10169 = vmatprep.mubr.f32.mxu0 %v15463_v26  ;;  %v3314_v26 = vld [vmem:[#allocation6 + $0x390] sm:$0xff] }
 0x2b5   : > { %10170 = vmatmul.mubr.f32.gmra.mrb[32].mxu0 %v15464_v17  ;;  %v3315_v17 = vld [vmem:[#allocation6 + $0x398] sm:$0xff] }
 0x2b6   : > { %10172 = vmatprep.mubr.f32.mxu0 %v15465_v29  ;;  %v2846_v29 = vld [vmem:[#allocation2 + $0x4f] sm:$0xff] }
 0x2b9   : > { %10173 = vmatmul.mubr.f32.gmra.mrb[34].mxu0 %v15466_v5  ;;  %v2847_v5 = vld [vmem:[#allocation2 + $0x57] sm:$0xff] }
 0x2ba   : > { %10175 = vmatprep.mubr.f32.mxu0 %v15467_v12  ;;  %v11669_v12 = vpack.c.bf16 %v3315_v17, %v3314_v26  ;;  %v3321_v26 = vld [vmem:[#allocation6 + $0x3c8] sm:$0xff]  ;;  %v2852_v17 = vld [vmem:[#allocation2 + $0x7f] sm:$0xff] }
 0x2bd   : > { %10176 = vmatmul.mubr.f32.gmra.mrb[36].mxu0 %v15468_v57  ;;  %v3317_v57 = vld [vmem:[#allocation6 + $0x3a8] sm:$0xff] }
 0x2be   : > { %10178 = vmatprep.mubr.f32.mxu0 %v15469_v16  ;;  %v2848_v16 = vld [vmem:[#allocation2 + $0x5f] sm:$0xff] }
 0x2c1   : > { %10179 = vmatmul.mubr.f32.gmra.mrb[38].mxu0 %v15470_v13  ;;  %v2849_v13 = vld [vmem:[#allocation2 + $0x67] sm:$0xff] }
 0x2c2   : > { %10181 = vmatprep.mubr.f32.mxu0 %v15471_v6 }
 0x2c5   : > { %10182 = vmatmul.mubr.f32.gmra.mrb[40].mxu0 %v15472_v19  ;;  %v3318_v19 = vld [vmem:[#allocation6 + $0x3b0] sm:$0xff] }
 0x2c6   : > { %10184 = vmatprep.mubr.f32.mxu0 %v15473_v20  ;;  %v3319_v20 = vld [vmem:[#allocation6 + $0x3b8] sm:$0xff] }
 0x2c9   : > { %10185 = vmatmul.mubr.f32.gmra.mrb[42].mxu0 %v15474_v22  ;;  %v2850_v22 = vld [vmem:[#allocation2 + $0x6f] sm:$0xff] }
 0x2ca   : > { %10187 = vmatprep.mubr.f32.mxu0 %v13818_v25  ;;  %v3316_v25 = vld [vmem:[#allocation6 + $0x3a0] sm:$0xff] }
 0x2cb   : > { %v11673_v6 = vpack.c.bf16 %v3317_v57, %v3316_v25  ;;  %v3323_v25 = vld [vmem:[#allocation6 + $0x3d8] sm:$0xff]  ;;  %v2854_v57 = vld [vmem:[#allocation2 + $0x8f] sm:$0xff] }
 0x2cd   : > { %10188 = vmatmul.mubr.f32.gmra.mrb[44].mxu0 %v14054_v18 }
 0x2ce   : > { %10190 = vmatprep.mubr.f32.mxu0 %v14056_v14 }
 0x2d1   : > { %10191 = vmatmul.mubr.f32.gmra.mrb[46].mxu0 %v14060_v43  ;;  %v3320_v43 = vld [vmem:[#allocation6 + $0x3c0] sm:$0xff] }
 0x2d2   : > { %10225 = vmatprep.mubr.f32.mxu0 %v2845_v35  ;;  %v11677_v35 = vpack.c.bf16 %v3319_v20, %v3318_v19  ;;  %v3325_v19 = vld [vmem:[#allocation6 + $0x3e8] sm:$0xff]  ;;  %v2856_v20 = vld [vmem:[#allocation2 + $0x9f] sm:$0xff] }
 0x2d5   : > { %10226 = vmatmul.mubr.f32.vlgmr.msra.gmra.mrb[0].mxu0 %v2846_v29  ;;  %v11681_v29 = vpack.c.bf16 %v3321_v26, %v3320_v43  ;;  %v3327_v43 = vld [vmem:[#allocation6 + $0x3f8] sm:$0xff]  ;;  %v2858_v26 = vld [vmem:[#allocation2 + $0xaf] sm:$0xff] }
 0x2d6   : > { %11668 = vmatpush3.bf16.msra.mxu0 %v11665_v28  ;;  %10228 = vmatprep.mubr.f32.mxu0 %v2847_v5  ;;  %v2853_v28 = vld [vmem:[#allocation2 + $0x87] sm:$0xff]  ;;  %v3322_v5 = vld [vmem:[#allocation6 + $0x3d0] sm:$0xff] }
 0x2d7   : > { %11670 = vmatprep.subr.bf16.mxu0 %v11669_v12 }
 0x2d9   : > { %10229 = vmatmul.mubr.f32.gmra.mrb[2].mxu0 %v2848_v16  ;;  %v2855_v16 = vld [vmem:[#allocation2 + $0x97] sm:$0xff] }
 0x2da   : > { %10231 = vmatprep.mubr.f32.mxu0 %v2849_v13  ;;  %11672 = vmatpush3.bf16.msra.mxu0 %v11669_v12  ;;  %v11685_v12 = vpack.c.bf16 %v3323_v25, %v3322_v5  ;;  %v3324_v13 = vld [vmem:[#allocation6 + $0x3e0] sm:$0xff]  ;;  %v3731_v5 = vld [vmem:[#allocation6 + $0x408] sm:$0xff] }
 0x2db   : > { %11674 = vmatprep.subr.bf16.mxu0 %v11673_v6  ;;  %v2860_v25 = vld [vmem:[#allocation2 + $0xbf] sm:$0xff] }
 0x2dd   : > { %10232 = vmatmul.mubr.f32.gmra.mrb[4].mxu0 %v2850_v22  ;;  %v3326_v22 = vld [vmem:[#allocation6 + $0x3f0] sm:$0xff] }
 0x2de   : > { %10234 = vmatprep.mubr.f32.mxu0 %v2851_v61  ;;  %11676 = vmatpush3.bf16.msra.mxu0 %v11673_v6  ;;  %v2857_v61 = vld [vmem:[#allocation2 + $0xa7] sm:$0xff]  ;;  %v11689_v6 = vpack.c.bf16 %v3325_v19, %v3324_v13  ;;  %v2863_v13 = vld [vmem:[#allocation2 + $0xd7] sm:$0xff] }
 0x2df   : > { %11678 = vmatprep.subr.bf16.mxu0 %v11677_v35  ;;  %v2865_v19 = vld [vmem:[#allocation2 + $0xe7] sm:$0xff] }
 0x2e1   : > { %10235 = vmatmul.mubr.f32.gmra.mrb[6].mxu0 %v2852_v17  ;;  %v2859_v17 = vld [vmem:[#allocation2 + $0xb7] sm:$0xff] }
 0x2e2   : > { %10237 = vmatprep.mubr.f32.mxu0 %v2853_v28  ;;  %11680 = vmatpush3.bf16.msra.mxu0 %v11677_v35  ;;  %v11693_v35 = vpack.c.bf16 %v3327_v43, %v3326_v22  ;;  %v3730_v28 = vld [vmem:[#allocation6 + $0x400] sm:$0xff]  ;;  %v2870_v43 = vld [vmem:[#allocation2 + $0x10f] sm:$0xff] }
 0x2e3   : > { %11682 = vmatprep.subr.bf16.mxu0 %v11681_v29  ;;  %v2869_v22 = vld [vmem:[#allocation2 + $0x107] sm:$0xff] }
 0x2e5   : > { %10238 = vmatmul.mubr.f32.gmra.mrb[8].mxu0 %v2854_v57  ;;  %v2861_v57 = vld [vmem:[#allocation2 + $0xc7] sm:$0xff] }
 0x2e6   : > { %10240 = vmatprep.mubr.f32.mxu0 %v2855_v16  ;;  %11684 = vmatpush3.bf16.msra.mxu0 %v11681_v29  ;;  %v14063_v29 = vpack.c.bf16 %v3731_v5, %v3730_v28  ;;  %v2862_v16 = vld [vmem:[#allocation2 + $0xcf] sm:$0xff]  ;;  %v2875_v5 = vld [vmem:[#allocation2 + $0x137] sm:$0xff] }
 0x2e7   : > { %11686 = vmatprep.subr.bf16.mxu0 %v11685_v12  ;;  %v2874_v28 = vld [vmem:[#allocation2 + $0x12f] sm:$0xff] }
 0x2e9   : > { %10241 = vmatmul.mubr.f32.gmra.mrb[10].mxu0 %v2856_v20  ;;  %v2866_v20 = vld [vmem:[#allocation2 + $0xef] sm:$0xff] }
 0x2ea   : > { %10243 = vmatprep.mubr.f32.mxu0 %v2857_v61  ;;  %11688 = vmatpush3.bf16.msra.mxu0 %v11685_v12  ;;  %v2864_v12 = vld [vmem:[#allocation2 + $0xdf] sm:$0xff]  ;;  %v2867_v61 = vld [vmem:[#allocation2 + $0xf7] sm:$0xff] }
 0x2eb   : > { %11690 = vmatprep.subr.bf16.mxu0 %v11689_v6 }
 0x2ed   : > { %10244 = vmatmul.mubr.f32.gmra.mrb[12].mxu0 %v2858_v26  ;;  %v2871_v26 = vld [vmem:[#allocation2 + $0x117] sm:$0xff] }
 0x2ee   : > { %10246 = vmatprep.mubr.f32.mxu0 %v2859_v17  ;;  %11692 = vmatpush3.bf16.msra.mxu0 %v11689_v6  ;;  %v2868_v6 = vld [vmem:[#allocation2 + $0xff] sm:$0xff] }
 0x2ef   : > { %11694 = vmatprep.subr.bf16.mxu0 %v11693_v35  ;;  %v2872_v17 = vld [vmem:[#allocation2 + $0x11f] sm:$0xff] }
 0x2f1   : > { %10247 = vmatmul.mubr.f32.gmra.mrb[14].mxu0 %v2860_v25  ;;  %v2876_v25 = vld [vmem:[#allocation2 + $0x13f] sm:$0xff] }
 0x2f2   : > { %10249 = vmatprep.mubr.f32.mxu0 %v2861_v57  ;;  %11696 = vmatpush3.bf16.msra.mxu0 %v11693_v35  ;;  %v2873_v35 = vld [vmem:[#allocation2 + $0x127] sm:$0xff] }
 0x2f3   : > { %11698 = vmatprep.subr.bf16.mxu0 %v14063_v29  ;;  %v2877_v57 = vld [vmem:[#allocation2 + $0x147] sm:$0xff] }
 0x2f5   : > { %10250 = vmatmul.mubr.f32.gmra.mrb[16].mxu0 %v2862_v16  ;;  %v2878_v16 = vld [vmem:[#allocation2 + $0x14f] sm:$0xff] }
 0x2f6   : > { %10252 = vmatprep.mubr.f32.mxu0 %v2863_v13  ;;  %v2879_v13 = vld [vmem:[#allocation2 + $0x157] sm:$0xff] }
 0x2f9   : > { %10253 = vmatmul.mubr.f32.gmra.mrb[18].mxu0 %v2864_v12  ;;  %v2880_v12 = vld [vmem:[#allocation2 + $0x15f] sm:$0xff] }
 0x2fa   : > { %10255 = vmatprep.mubr.f32.mxu0 %v2865_v19  ;;  %v2881_v19 = vld [vmem:[#allocation2 + $0x167] sm:$0xff] }
 0x2fd   : > { %10256 = vmatmul.mubr.f32.gmra.mrb[20].mxu0 %v2866_v20  ;;  %v2882_v20 = vld [vmem:[#allocation2 + $0x16f] sm:$0xff] }
 0x2fe   : > { %10258 = vmatprep.mubr.f32.mxu0 %v2867_v61  ;;  %v2883_v61 = vld [vmem:[#allocation2 + $0x177] sm:$0xff] }
 0x301   : > { %10259 = vmatmul.mubr.f32.gmra.mrb[22].mxu0 %v2868_v6  ;;  %v2884_v6 = vld [vmem:[#allocation2 + $0x17f] sm:$0xff] }
 0x302   : > { %10261 = vmatprep.mubr.f32.mxu0 %v2869_v22  ;;  %v2885_v22 = vld [vmem:[#allocation2 + $0x187] sm:$0xff] }
 0x305   : > { %10262 = vmatmul.mubr.f32.gmra.mrb[24].mxu0 %v2870_v43  ;;  %v2886_v43 = vld [vmem:[#allocation2 + $0x18f] sm:$0xff] }
 0x306   : > { %10264 = vmatprep.mubr.f32.mxu0 %v2871_v26  ;;  %v2890_v26 = vld [vmem:[#allocation2 + $0x1af] sm:$0xff] }
 0x309   : > { %10265 = vmatmul.mubr.f32.gmra.mrb[26].mxu0 %v2872_v17  ;;  %v2891_v17 = vld [vmem:[#allocation2 + $0x1b7] sm:$0xff] }
 0x30a   : > { %10267 = vmatprep.mubr.f32.mxu0 %v2873_v35  ;;  %v2892_v35 = vld [vmem:[#allocation2 + $0x1bf] sm:$0xff] }
 0x30d   : > { %10268 = vmatmul.mubr.f32.gmra.mrb[28].mxu0 %v2874_v28  ;;  %v3732_v28 = vld [vmem:[#allocation6 + $0x410] sm:$0xff] }
 0x30e   : > { %10270 = vmatprep.mubr.f32.mxu0 %v2875_v5  ;;  %v3733_v5 = vld [vmem:[#allocation6 + $0x418] sm:$0xff] }
 0x311   : > { %10271 = vmatmul.mubr.f32.gmra.mrb[30].mxu0 %v2876_v25  ;;  %v11701_v25 = vpack.c.bf16 %v3733_v5, %v3732_v28  ;;  %v3703_v28 = vld [vmem:[#allocation2 + $0xf9] sm:$0xff]  ;;  %v3704_v5 = vld [vmem:[#allocation2 + $0x101] sm:$0xff] }
 0x312   : > { %10273 = vmatprep.mubr.f32.mxu0 %v2877_v57  ;;  %v3734_v57 = vld [vmem:[#allocation6 + $0x420] sm:$0xff] }
 0x315   : > { %10274 = vmatmul.mubr.f32.gmra.mrb[32].mxu0 %v2878_v16  ;;  %v3735_v16 = vld [vmem:[#allocation6 + $0x428] sm:$0xff] }
 0x316   : > { %10276 = vmatprep.mubr.f32.mxu0 %v2879_v13  ;;  %v3738_v13 = vld [vmem:[#allocation6 + $0x440] sm:$0xff] }
 0x319   : > { %10277 = vmatmul.mubr.f32.gmra.mrb[34].mxu0 %v2880_v12  ;;  %v3739_v12 = vld [vmem:[#allocation6 + $0x448] sm:$0xff] }
 0x31a   : > { %10279 = vmatprep.mubr.f32.mxu0 %v2881_v19  ;;  %v3743_v19 = vld [vmem:[#allocation6 + $0x468] sm:$0xff] }
 0x31d   : > { %10280 = vmatmul.mubr.f32.gmra.mrb[36].mxu0 %v2882_v20  ;;  %v3745_v20 = vld [vmem:[#allocation6 + $0x478] sm:$0xff] }
 0x31e   : > { %10282 = vmatprep.mubr.f32.mxu0 %v2883_v61  ;;  %v3696_v61 = vld [vmem:[#allocation2 + $0xc1] sm:$0xff] }
 0x321   : > { %10283 = vmatmul.mubr.f32.gmra.mrb[38].mxu0 %v2884_v6  ;;  %v3697_v6 = vld [vmem:[#allocation2 + $0xc9] sm:$0xff] }
 0x322   : > { %10285 = vmatprep.mubr.f32.mxu0 %v2885_v22  ;;  %v3698_v22 = vld [vmem:[#allocation2 + $0xd1] sm:$0xff] }
 0x325   : > { %10286 = vmatmul.mubr.f32.gmra.mrb[40].mxu0 %v2886_v43  ;;  %v3699_v43 = vld [vmem:[#allocation2 + $0xd9] sm:$0xff] }
 0x326   : > { %10288 = vmatprep.mubr.f32.mxu0 %v13867_v45  ;;  %v11705_v45 = vpack.c.bf16 %v3735_v16, %v3734_v57  ;;  %v3706_v57 = vld [vmem:[#allocation2 + $0x111] sm:$0xff]  ;;  %v3707_v16 = vld [vmem:[#allocation2 + $0x119] sm:$0xff] }
 0x329   : > { %10289 = vmatmul.mubr.f32.gmra.mrb[42].mxu0 %v13869_v46  ;;  %v3736_v46 = vld [vmem:[#allocation6 + $0x430] sm:$0xff] }
 0x32a   : > { %10291 = vmatprep.mubr.f32.mxu0 %v13873_v40  ;;  %v3737_v40 = vld [vmem:[#allocation6 + $0x438] sm:$0xff] }
 0x32d   : > { %10292 = vmatmul.mubr.f32.gmra.mrb[44].mxu0 %v2890_v26  ;;  %v3700_v26 = vld [vmem:[#allocation2 + $0xe1] sm:$0xff] }
 0x32e   : > { %10294 = vmatprep.mubr.f32.mxu0 %v2891_v17  ;;  %v3701_v17 = vld [vmem:[#allocation2 + $0xe9] sm:$0xff] }
 0x331   : > { %10295 = vmatmul.mubr.f32.gmra.mrb[46].mxu0 %v2892_v35  ;;  %v3702_v35 = vld [vmem:[#allocation2 + $0xf1] sm:$0xff] }
 0x332   : > { %10329 = vmatprep.mubr.f32.mxu0 %v13876_v49  ;;  %v11709_v49 = vpack.c.bf16 %v3737_v40, %v3736_v46  ;;  %v3709_v46 = vld [vmem:[#allocation2 + $0x129] sm:$0xff]  ;;  %v3710_v40 = vld [vmem:[#allocation2 + $0x131] sm:$0xff] }
 0x335   : > { %10330 = vmatmul.mubr.f32.vlgmr.msra.gmra.mrb[0].mxu0 %v13878_v50  ;;  %v11713_v50 = vpack.c.bf16 %v3739_v12, %v3738_v13  ;;  %v3712_v13 = vld [vmem:[#allocation2 + $0x141] sm:$0xff]  ;;  %v3713_v12 = vld [vmem:[#allocation2 + $0x149] sm:$0xff] }
 0x336   : > { %11700 = vmatpush3.bf16.msra.mxu0 %v14063_v29  ;;  %10332 = vmatprep.mubr.f32.mxu0 %v13882_v54  ;;  %v3740_v54 = vld [vmem:[#allocation6 + $0x450] sm:$0xff]  ;;  %v3741_v29 = vld [vmem:[#allocation6 + $0x458] sm:$0xff] }
 0x337   : > { %11702 = vmatprep.subr.bf16.mxu0 %v11701_v25 }
 0x339   : > { %10333 = vmatmul.mubr.f32.gmra.mrb[2].mxu0 %v13884_v55  ;;  %v11717_v55 = vpack.c.bf16 %v3741_v29, %v3740_v54  ;;  %v3715_v54 = vld [vmem:[#allocation2 + $0x159] sm:$0xff]  ;;  %v3716_v29 = vld [vmem:[#allocation2 + $0x161] sm:$0xff] }
 0x33a   : > { %10335 = vmatprep.mubr.f32.mxu0 %v13888_v63  ;;  %11704 = vmatpush3.bf16.msra.mxu0 %v11701_v25  ;;  %v3742_v63 = vld [vmem:[#allocation6 + $0x460] sm:$0xff]  ;;  %v3705_v25 = vld [vmem:[#allocation2 + $0x109] sm:$0xff] }
 0x33b   : > { %11706 = vmatprep.subr.bf16.mxu0 %v11705_v45 }
 0x33d   : > { %10336 = vmatmul.mubr.f32.gmra.mrb[4].mxu0 %v13890_v1  ;;  %v11721_v1 = vpack.c.bf16 %v3743_v19, %v3742_v63  ;;  %v3718_v63 = vld [vmem:[#allocation2 + $0x171] sm:$0xff]  ;;  %v3719_v19 = vld [vmem:[#allocation2 + $0x179] sm:$0xff] }
 0x33e   : > { %10338 = vmatprep.mubr.f32.mxu0 %v13894_v33  ;;  %11708 = vmatpush3.bf16.msra.mxu0 %v11705_v45  ;;  %v3744_v33 = vld [vmem:[#allocation6 + $0x470] sm:$0xff]  ;;  %v3708_v45 = vld [vmem:[#allocation2 + $0x121] sm:$0xff] }
 0x33f   : > { %11710 = vmatprep.subr.bf16.mxu0 %v11709_v49 }
 0x341   : > { %10339 = vmatmul.mubr.f32.gmra.mrb[6].mxu0 %v13896_v56  ;;  %v11725_v56 = vpack.c.bf16 %v3745_v20, %v3744_v33  ;;  %v4495_v33 = vld [vmem:[#allocation8 + $0xd0] sm:$0xff]  ;;  %v4496_v20 = vld [vmem:[#allocation8 + $0xd8] sm:$0xff] }
 0x342   : > { %10341 = vmatprep.mubr.f32.mxu0 %v13900_v23  ;;  %11712 = vmatpush3.bf16.msra.mxu0 %v11709_v49  ;;  %v4485_v23 = vld [vmem:[#allocation8 + $0x80] sm:$0xff] }
 0x343   : > { %11714 = vmatprep.subr.bf16.mxu0 %v11713_v50  ;;  %v3711_v49 = vld [vmem:[#allocation2 + $0x139] sm:$0xff] }
 0x345   : > { %10342 = vmatmul.mubr.f32.gmra.mrb[8].mxu0 %v13902_v3  ;;  %v4486_v3 = vld [vmem:[#allocation8 + $0x88] sm:$0xff] }
 0x346   : > { %10344 = vmatprep.mubr.f32.mxu0 %v13906_v30  ;;  %11716 = vmatpush3.bf16.msra.mxu0 %v11713_v50  ;;  %v4487_v30 = vld [vmem:[#allocation8 + $0x90] sm:$0xff] }
 0x347   : > { %11718 = vmatprep.subr.bf16.mxu0 %v11717_v55  ;;  %v3714_v50 = vld [vmem:[#allocation2 + $0x151] sm:$0xff] }
 0x349   : > { %10345 = vmatmul.mubr.f32.gmra.mrb[10].mxu0 %v13908_v27  ;;  %v11729_v27 = vpack.c.bf16 %v4486_v3, %v4485_v23  ;;  %v11749_v23 = vpack.c.bf16 %v4496_v20, %v4495_v33  ;;  %v3722_v3 = vld [vmem:[#allocation2 + $0x191] sm:$0xff] }
 0x34a   : > { %10347 = vmatprep.mubr.f32.mxu0 %v13912_v58  ;;  %11720 = vmatpush3.bf16.msra.mxu0 %v11717_v55  ;;  %v4488_v58 = vld [vmem:[#allocation8 + $0x98] sm:$0xff]  ;;  %v3717_v55 = vld [vmem:[#allocation2 + $0x169] sm:$0xff] }
 0x34b   : > { %11722 = vmatprep.subr.bf16.mxu0 %v11721_v1  ;;  %11730 = vmatprep.subr.bf16.mxu1 %v11729_v27 }
 0x34c   : > { %11732 = vmatpush3.bf16.msra.mxu1 %v11729_v27  ;;  %v4498_v27 = vld [vmem:[#allocation8 + $0xe8] sm:$0xff] }
 0x34d   : > { %10348 = vmatmul.mubr.f32.gmra.mrb[12].mxu0 %v13914_v9  ;;  %v11733_v9 = vpack.c.bf16 %v4488_v58, %v4487_v30  ;;  %v4497_v30 = vld [vmem:[#allocation8 + $0xe0] sm:$0xff] }
 0x34e   : > { %10350 = vmatprep.mubr.f32.mxu0 %v13920_v10  ;;  %11724 = vmatpush3.bf16.msra.mxu0 %v11721_v1  ;;  %v4489_v10 = vld [vmem:[#allocation8 + $0xa0] sm:$0xff]  ;;  %v11753_v58 = vpack.c.bf16 %v4498_v27, %v4497_v30 }
 0x34f   : > { %11726 = vmatprep.subr.bf16.mxu0 %v11725_v56  ;;  %11734 = vmatprep.subr.bf16.mxu1 %v11733_v9  ;;  %v3720_v1 = vld [vmem:[#allocation2 + $0x181] sm:$0xff] }
 0x350   : > { %11736 = vmatpush3.bf16.msra.mxu1 %v11733_v9  ;;  %v4499_v9 = vld [vmem:[#allocation8 + $0xf0] sm:$0xff] }
 0x351   : > { %10351 = vmatmul.mubr.f32.gmra.mrb[14].mxu0 %v13922_v24  ;;  %v4490_v24 = vld [vmem:[#allocation8 + $0xa8] sm:$0xff] }
 0x352   : > { %10353 = vmatprep.mubr.f32.mxu0 %v13927_v15  ;;  %11728 = vmatpush3.bf16.msra.mxu0 %v11725_v56  ;;  %v11737_v15 = vpack.c.bf16 %v4490_v24, %v4489_v10  ;;  %v3721_v56 = vld [vmem:[#allocation2 + $0x189] sm:$0xff]  ;;  %v4500_v10 = vld [vmem:[#allocation8 + $0xf8] sm:$0xff] }
 0x353   : > { %v11757_v24 = vpack.c.bf16 %v4500_v10, %v4499_v9 }
 0x354   : > { %11738 = vmatprep.subr.bf16.mxu1 %v11737_v15 }
 0x355   : > { %10354 = vmatmul.mubr.f32.gmra.mrb[16].mxu0 %v13929_v32  ;;  %v4491_v32 = vld [vmem:[#allocation8 + $0xb0] sm:$0xff]  ;;  %11740 = vmatpush3.bf16.msra.mxu1 %v11737_v15 }
 0x356   : > { %10356 = vmatprep.mubr.f32.mxu0 %v13933_v47  ;;  %v4492_v47 = vld [vmem:[#allocation8 + $0xb8] sm:$0xff]  ;;  %v15476_v15 = vld [vmem:[#allocation59_spill] sm:$0xff] }
 0x359   : > { %10357 = vmatmul.mubr.f32.gmra.mrb[18].mxu0 %v13935_v7  ;;  %v11741_v7 = vpack.c.bf16 %v4492_v47, %v4491_v32  ;;  %v3726_v32 = vld [vmem:[#allocation2 + $0x1b1] sm:$0xff]  ;;  %v3727_v47 = vld [vmem:[#allocation2 + $0x1b9] sm:$0xff] }
 0x35a   : > { %10359 = vmatprep.mubr.f32.mxu0 %v13939_v48  ;;  %v4493_v48 = vld [vmem:[#allocation8 + $0xc0] sm:$0xff] }
 0x35b   : > { %11742 = vmatprep.subr.bf16.mxu1 %v11741_v7 }
 0x35c   : > { %11744 = vmatpush3.bf16.msra.mxu1 %v11741_v7  ;;  %v3728_v7 = vld [vmem:[#allocation2 + $0x1c1] sm:$0xff] }
 0x35d   : > { %10360 = vmatmul.mubr.f32.gmra.mrb[20].mxu0 %v13941_v4  ;;  %v4494_v4 = vld [vmem:[#allocation8 + $0xc8] sm:$0xff] }
 0x35e   : > { %10362 = vmatprep.mubr.f32.mxu0 %v13945_v21  ;;  %v11745_v21 = vpack.c.bf16 %v4494_v4, %v4493_v48  ;;  %v4421_v48 = vld [vmem:[#allocation8 + $0x8] sm:$0xff] }
 0x360   : > { %11746 = vmatprep.subr.bf16.mxu1 %v11745_v21 }
 0x361   : > { %10363 = vmatmul.mubr.f32.gmra.mrb[22].mxu0 %v13947_v8  ;;  %v3305_v8 = vld [vmem:[#allocation2 + $0x198] sm:$0xff]  ;;  %11748 = vmatpush3.bf16.msra.mxu1 %v11745_v21 }
 0x362   : > { %10365 = vmatprep.mubr.f32.mxu0 %v13951_v41  ;;  %v3306_v41 = vld [vmem:[#allocation2 + $0x1a0] sm:$0xff]  ;;  %11750 = vmatprep.subr.bf16.mxu1 %v11749_v23  ;;  %v4423_v21 = vld [vmem:[#allocation8 + $0x18] sm:$0xff] }
 0x365   : > { %10366 = vmatmul.mubr.f32.gmra.mrb[24].mxu0 %v13953_v38  ;;  %v3307_v38 = vld [vmem:[#allocation2 + $0x1a8] sm:$0xff]  ;;  %11752 = vmatpush3.bf16.msra.mxu1 %v11749_v23 }
 0x366   : > { %10368 = vmatprep.mubr.f32.mxu0 %v13957_v42  ;;  %v14112_v42 = vld [vmem:[#allocation2] sm:$0xff]  ;;  %11754 = vmatprep.subr.bf16.mxu1 %v11753_v58 }
 0x369   : > { %10369 = vmatmul.mubr.f32.gmra.mrb[26].mxu0 %v13959_v36  ;;  %v3681_v36 = vld [vmem:[#allocation2 + $0x49] sm:$0xff]  ;;  %11756 = vmatpush3.bf16.msra.mxu1 %v11753_v58 }
 0x36a   : > { %10371 = vmatprep.mubr.f32.mxu0 %v13963_v37  ;;  %v3682_v37 = vld [vmem:[#allocation2 + $0x51] sm:$0xff]  ;;  %11758 = vmatprep.subr.bf16.mxu1 %v11757_v24 }
 0x36d   : > { %10372 = vmatmul.mubr.f32.gmra.mrb[28].mxu0 %v13965_v39  ;;  %v3683_v39 = vld [vmem:[#allocation2 + $0x59] sm:$0xff]  ;;  %11760 = vmatpush3.bf16.msra.mxu1 %v11757_v24 }
 0x36e   : > { %10374 = vmatprep.mubr.f32.mxu0 %v13969_v31  ;;  %v3684_v31 = vld [vmem:[#allocation2 + $0x61] sm:$0xff] }
 0x370   : > { %10538 = vmatmul.mubr.f32.vlgmr.msra.gmra.mrb[0].mxu1 %v14112_v42 }
 0x371   : > { %10375 = vmatmul.mubr.f32.gmra.mrb[30].mxu0 %v13971_v44  ;;  %v3685_v44 = vld [vmem:[#allocation2 + $0x69] sm:$0xff]  ;;  %10540 = vmatprep.mubr.f32.mxu1 %v14112_v42 }
 0x372   : > { %10377 = vmatprep.mubr.f32.mxu0 %v13975_v51  ;;  %v3686_v51 = vld [vmem:[#allocation2 + $0x71] sm:$0xff] }
 0x375   : > { %10378 = vmatmul.mubr.f32.gmra.mrb[32].mxu0 %v13977_v52  ;;  %v3687_v52 = vld [vmem:[#allocation2 + $0x79] sm:$0xff] }
 0x376   : > { %10380 = vmatprep.mubr.f32.mxu0 %v13981_v53  ;;  %v3688_v53 = vld [vmem:[#allocation2 + $0x81] sm:$0xff] }
 0x379   : > { %10381 = vmatmul.mubr.f32.gmra.mrb[34].mxu0 %v13983_v59  ;;  %v3689_v59 = vld [vmem:[#allocation2 + $0x89] sm:$0xff] }
 0x37a   : > { %10383 = vmatprep.mubr.f32.mxu0 %v13987_v60  ;;  %v3690_v60 = vld [vmem:[#allocation2 + $0x91] sm:$0xff] }
 0x37d   : > { %10384 = vmatmul.mubr.f32.gmra.mrb[36].mxu0 %v13989_v62  ;;  %v3691_v62 = vld [vmem:[#allocation2 + $0x99] sm:$0xff] }
 0x37e   : > { %10386 = vmatprep.mubr.f32.mxu0 %v13993_v2  ;;  %v3692_v2 = vld [vmem:[#allocation2 + $0xa1] sm:$0xff] }
 0x381   : > { %10387 = vmatmul.mubr.f32.gmra.mrb[38].mxu0 %v13995_v11  ;;  %v3693_v11 = vld [vmem:[#allocation2 + $0xa9] sm:$0xff] }
 0x382   : > { %10389 = vmatprep.mubr.f32.mxu0 %v13999_v34  ;;  %v3694_v34 = vld [vmem:[#allocation2 + $0xb1] sm:$0xff] }
 0x385   : > { %10390 = vmatmul.mubr.f32.gmra.mrb[40].mxu0 %v14001_v0  ;;  %v3695_v0 = vld [vmem:[#allocation2 + $0xb9] sm:$0xff] }
 0x386   : > { %10392 = vmatprep.mubr.f32.mxu0 %v3305_v8 }
 0x389   : > { %10393 = vmatmul.mubr.f32.gmra.mrb[42].mxu0 %v3306_v41  ;;  %v4424_v41 = vld [vmem:[#allocation8 + $0x20] sm:$0xff] }
 0x38a   : > { %10395 = vmatprep.mubr.f32.mxu0 %v3307_v38  ;;  %v4425_v38 = vld [vmem:[#allocation8 + $0x28] sm:$0xff] }
 0x38d   : > { %10396 = vmatmul.mubr.f32.gmra.mrb[44].mxu0 %v14112_v42 }
 0x38e   : > { %10398 = vmatprep.mubr.f32.mxu0 %v14112_v42 }
 0x391   : > { %10399 = vmatmul.mubr.f32.gmra.mrb[46].mxu0 %v14112_v42  ;;  %v4428_v42 = vld [vmem:[#allocation8 + $0x40] sm:$0xff] }
 0x392   : > { %10433 = vmatprep.mubr.f32.mxu0 %v3681_v36  ;;  %v11769_v36 = vpack.c.bf16 %v4425_v38, %v4424_v41 }
 0x395   : > { %10434 = vmatmul.mubr.f32.vlgmr.msra.gmra.mrb[0].mxu0 %v3682_v37  ;;  %v4426_v37 = vld [vmem:[#allocation8 + $0x30] sm:$0xff] }
 0x396   : > { %10436 = vmatprep.mubr.f32.mxu0 %v3683_v39  ;;  %v4427_v39 = vld [vmem:[#allocation8 + $0x38] sm:$0xff] }
 0x399   : > { %10437 = vmatmul.mubr.f32.gmra.mrb[2].mxu0 %v3684_v31  ;;  %v11773_v31 = vpack.c.bf16 %v4427_v39, %v4426_v37 }
 0x39a   : > { %10439 = vmatprep.mubr.f32.mxu0 %v3685_v44  ;;  %v4429_v44 = vld [vmem:[#allocation8 + $0x48] sm:$0xff] }
 0x39d   : > { %10440 = vmatmul.mubr.f32.gmra.mrb[4].mxu0 %v3686_v51  ;;  %v11777_v51 = vpack.c.bf16 %v4429_v44, %v4428_v42 }
 0x39e   : > { %10442 = vmatprep.mubr.f32.mxu0 %v3687_v52  ;;  %v4430_v52 = vld [vmem:[#allocation8 + $0x50] sm:$0xff] }
 0x3a1   : > { %10443 = vmatmul.mubr.f32.gmra.mrb[6].mxu0 %v3688_v53  ;;  %v4431_v53 = vld [vmem:[#allocation8 + $0x58] sm:$0xff] }
 0x3a2   : > { %10445 = vmatprep.mubr.f32.mxu0 %v3689_v59  ;;  %v11781_v59 = vpack.c.bf16 %v4431_v53, %v4430_v52 }
 0x3a5   : > { %10446 = vmatmul.mubr.f32.gmra.mrb[8].mxu0 %v3690_v60  ;;  %v4432_v60 = vld [vmem:[#allocation8 + $0x60] sm:$0xff] }
 0x3a6   : > { %10448 = vmatprep.mubr.f32.mxu0 %v3691_v62  ;;  %v4433_v62 = vld [vmem:[#allocation8 + $0x68] sm:$0xff] }
 0x3a9   : > { %10449 = vmatmul.mubr.f32.gmra.mrb[10].mxu0 %v3692_v2  ;;  %v11785_v2 = vpack.c.bf16 %v4433_v62, %v4432_v60 }
 0x3aa   : > { %10451 = vmatprep.mubr.f32.mxu0 %v3693_v11  ;;  %v4434_v11 = vld [vmem:[#allocation8 + $0x70] sm:$0xff] }
 0x3ad   : > { %10452 = vmatmul.mubr.f32.gmra.mrb[12].mxu0 %v3694_v34  ;;  %v4435_v34 = vld [vmem:[#allocation8 + $0x78] sm:$0xff] }
 0x3ae   : > { %10454 = vmatprep.mubr.f32.mxu0 %v3695_v0  ;;  %v11789_v0 = vpack.c.bf16 %v4435_v34, %v4434_v11 }
 0x3b1   : > { %10455 = vmatmul.mubr.f32.gmra.mrb[14].mxu0 %v3696_v61  ;;  %v5160_v61 = vld [vmem:[#allocation8 + $0x100] sm:$0xff] }
 0x3b2   : > { %10457 = vmatprep.mubr.f32.mxu0 %v3697_v6  ;;  %v5161_v6 = vld [vmem:[#allocation8 + $0x108] sm:$0xff] }
 0x3b5   : > { %10458 = vmatmul.mubr.f32.gmra.mrb[16].mxu0 %v3698_v22  ;;  %v14122_v22 = vpack.c.bf16 %v5161_v6, %v5160_v61 }
 0x3b6   : > { %10460 = vmatprep.mubr.f32.mxu0 %v3699_v43  ;;  %v4257_v43 = vlaneseq }
 0x3b9   : > { %10461 = vmatmul.mubr.f32.gmra.mrb[18].mxu0 %v3700_v26  ;;  %v14128_v26 = vld [vmem:[%s15201_s2] ss:$0 sm:$0xff] }
 0x3ba   : > { %10463 = vmatprep.mubr.f32.mxu0 %v3701_v17 }
 0x3bd   : > { %10464 = vmatmul.mubr.f32.gmra.mrb[20].mxu0 %v3702_v35  ;;  %v14133_v35 = vld [vmem:[%s15202_s3] ss:$0 sm:$0xff] }
 0x3be   : > { %10466 = vmatprep.mubr.f32.mxu0 %v3703_v28 }
 0x3c1   : > { %10467 = vmatmul.mubr.f32.gmra.mrb[22].mxu0 %v3704_v5 }
 0x3c2   : > { %10469 = vmatprep.mubr.f32.mxu0 %v3705_v25  ;;  %v14136_v25 = vshrl.u32 %v4257_v43, 7 }
 0x3c4   : > { %vm4261_vm0 = vcmp.ge.s32.totalorder %v14136_v25, 1 }
 0x3c5   : > { %10470 = vmatmul.mubr.f32.gmra.mrb[24].mxu0 %v3706_v57 }
 0x3c6   : > { %10472 = vmatprep.mubr.f32.mxu0 %v3707_v16 }
 0x3c9   : > { %10473 = vmatmul.mubr.f32.gmra.mrb[26].mxu0 %v3708_v45 }
 0x3ca   : > { %10475 = vmatprep.mubr.f32.mxu0 %v3709_v46 }
 0x3cd   : > { %10476 = vmatmul.mubr.f32.gmra.mrb[28].mxu0 %v3710_v40 }
 0x3ce   : > { %10478 = vmatprep.mubr.f32.mxu0 %v3711_v49 }
 0x3d1   : > { %10479 = vmatmul.mubr.f32.gmra.mrb[30].mxu0 %v3712_v13 }
 0x3d2   : > { %10481 = vmatprep.mubr.f32.mxu0 %v3713_v12  ;;  %v14144_v12 = vadd.s32 16, %v14136_v25  ;;  %v4373_v25 = vld [vmem:[#allocation2 + $0x1f] sm:$0xff] }
 0x3d4   : > { %vm4266_vm1 = vcmp.lt.s32.totalorder %v14144_v12, 17 }
 0x3d5   : > { %10482 = vmatmul.mubr.f32.gmra.mrb[32].mxu0 %v3714_v50 }
 0x3d6   : > { %10484 = vmatprep.mubr.f32.mxu0 %v3715_v54 }
 0x3d9   : > { %10485 = vmatmul.mubr.f32.gmra.mrb[34].mxu0 %v3716_v29 }
 0x3da   : > { %10487 = vmatprep.mubr.f32.mxu0 %v3717_v55 }
 0x3dd   : > { %10488 = vmatmul.mubr.f32.gmra.mrb[36].mxu0 %v3718_v63 }
 0x3de   : > { %10490 = vmatprep.mubr.f32.mxu0 %v3719_v19 }
 0x3e1   : > { %10491 = vmatmul.mubr.f32.gmra.mrb[38].mxu0 %v3720_v1 }
 0x3e2   : > { %10493 = vmatprep.mubr.f32.mxu0 %v3721_v56 }
 0x3e5   : > { %10494 = vmatmul.mubr.f32.gmra.mrb[40].mxu0 %v3722_v3 }
 0x3e6   : > { %10496 = vmatprep.mubr.f32.mxu0 %v14054_v18  ;;  %v4420_v18 = vld [vmem:[#allocation8] sm:$0xff] }
 0x3e7   : > { %v11761_v4 = vpack.c.bf16 %v4421_v48, %v4420_v18 }
 0x3e9   : > { %10497 = vmatmul.mubr.f32.gmra.mrb[42].mxu0 %v14056_v14  ;;  %11762 = vmatprep.subr.bf16.mxu1 %v11761_v4  ;;  %v4422_v14 = vld [vmem:[#allocation8 + $0x10] sm:$0xff] }
 0x3ea   : > { %10499 = vmatprep.mubr.f32.mxu0 %v15476_v15  ;;  %11764 = vmatpush3.bf16.msra.mxu1 %v11761_v4  ;;  %v11765_v8 = vpack.c.bf16 %v4423_v21, %v4422_v14 }
 0x3ec   : > { %11766 = vmatprep.subr.bf16.mxu1 %v11765_v8 }
 0x3ed   : > { %10500 = vmatmul.mubr.f32.gmra.mrb[44].mxu0 %v3726_v32 }
 0x3ee   : > { %10502 = vmatprep.mubr.f32.mxu0 %v3727_v47  ;;  %11768 = vmatpush3.bf16.msra.mxu1 %v11765_v8 }
 0x3ef   : > { %11770 = vmatprep.subr.bf16.mxu1 %v11769_v36 }
 0x3f1   : > { %10503 = vmatmul.mubr.f32.gmra.mrb[46].mxu0 %v3728_v7 }
 0x3f2   : > { %11772 = vmatpush3.bf16.msra.mxu1 %v11769_v36 }
 0x3f3   : > { %11774 = vmatprep.subr.bf16.mxu1 %v11773_v31 }
 0x3f6   : > { %11776 = vmatpush3.bf16.msra.mxu1 %v11773_v31 }
 0x3f7   : > { %11778 = vmatprep.subr.bf16.mxu1 %v11777_v51 }
 0x3fa   : > { %11780 = vmatpush3.bf16.msra.mxu1 %v11777_v51 }
 0x3fb   : > { %11782 = vmatprep.subr.bf16.mxu1 %v11781_v59 }
 0x3fe   : > { %11784 = vmatpush3.bf16.msra.mxu1 %v11781_v59 }
 0x3ff   : > { %11786 = vmatprep.subr.bf16.mxu1 %v11785_v2 }
 0x402   : > { %11788 = vmatpush3.bf16.msra.mxu1 %v11785_v2 }
 0x403   : > { %11790 = vmatprep.subr.bf16.mxu1 %v11789_v0 }
 0x406   : > { %11792 = vmatpush3.bf16.msra.mxu1 %v11789_v0 }
 0x407   : > { %11794 = vmatprep.subr.bf16.mxu1 %v14122_v22 }
 0x468   : > { %v10435_v17 = vpop.f32.mrb[0].mxu0 }
 0x469   : > { %v4107_v28 = vmul.f32 %v10435_v17, %v14128_v26  ;;  %v3812_v5 = vpop.f32.mrb[1].mxu0 }
 0x46a   : > { %v4106_v57 = vmul.f32 %v14128_v26, %v3812_v5 }
 0x46b   : > { %v4162_v16 = vadd.f32 %v14133_v35, %v4107_v28 }
 0x46c   : > { %v4161_v45 = vadd.f32 %v14133_v35, %v4106_v57  ;;  %v10438_v46 = vpop.f32.mrb[2].mxu0 }
 0x46d   : > { %v4210_v40 = vmax.f32 %v4162_v16, 0.0  ;;  %v4109_v49 = vmul.f32 %v10438_v46, %v14128_v26  ;;  %v3822_v13 = vpop.f32.mrb[3].mxu0 }
 0x46e   : > { %v4209_v50 = vmax.f32 %v4161_v45, 0.0  ;;  %v4108_v54 = vmul.f32 %v14128_v26, %v3822_v13 }
 0x46f   : > { %4325 = vst [vmem:[#allocation2 + $0x38] sm:$0xff] %v4210_v40  ;;  %v4164_v29 = vadd.f32 %v14133_v35, %v4109_v49 }
 0x470   : > { %v4276_v55 = vsel %vm4261_vm0, %v4209_v50, 0.0  ;;  %v4163_v63 = vadd.f32 %v14133_v35, %v4108_v54  ;;  %v10441_v19 = vpop.f32.mrb[4].mxu0  ;;  %12862 = vmatmul.mubr.msk.f32.gmra.mrb[2].mxu1 %vm4261_vm0, %v4209_v50 }
 0x471   : > { %4324 = vst [vmem:[#allocation2 + $0x30] sm:$0xff] %v4276_v55  ;;  %v4212_v1 = vmax.f32 %v4164_v29, 0.0  ;;  %v4111_v33 = vmul.f32 %v10441_v19, %v14128_v26  ;;  %v3832_v20 = vpop.f32.mrb[5].mxu0  ;;  %10543 = vmatprep.mubr.f32.mxu1 %v4210_v40 }
 0x472   : > { %v4211_v56 = vmax.f32 %v4163_v63, 0.0  ;;  %v4110_v23 = vmul.f32 %v14128_v26, %v3832_v20 }
 0x473   : > { %v4279_v3 = vsel %vm4261_vm0, %v4212_v1, 0.0  ;;  %v4166_v30 = vadd.f32 %v14133_v35, %v4111_v33 }
 0x474   : > { %4327 = vst [vmem:[#allocation2 + $0x48] sm:$0xff] %v4279_v3  ;;  %v4278_v27 = vsel %vm4266_vm1, %v4211_v56, 0.0  ;;  %v4165_v58 = vadd.f32 %v14133_v35, %v4110_v23  ;;  %v10444_v9 = vpop.f32.mrb[6].mxu0  ;;  %12863 = vmatmul.mubr.msk.f32.gmra.mrb[4].mxu1 %vm4266_vm1, %v4211_v56 }
 0x475   : > { %4326 = vst [vmem:[#allocation2 + $0x40] sm:$0xff] %v4278_v27  ;;  %v4214_v10 = vmax.f32 %v4166_v30, 0.0  ;;  %v4113_v24 = vmul.f32 %v10444_v9, %v14128_v26  ;;  %v3842_v15 = vpop.f32.mrb[7].mxu0  ;;  %12864 = vmatprep.mubr.msk.f32.mxu1 %vm4261_vm0, %v4212_v1 }
 0x476   : > { %v4213_v32 = vmax.f32 %v4165_v58, 0.0  ;;  %v4112_v47 = vmul.f32 %v14128_v26, %v3842_v15 }
 0x477   : > { %v4281_v7 = vsel %vm4266_vm1, %v4214_v10, 0.0  ;;  %v4168_v18 = vadd.f32 %v14133_v35, %v4113_v24 }
 0x478   : > { %4329 = vst [vmem:[#allocation2 + $0x58] sm:$0xff] %v4281_v7  ;;  %4328 = vst [vmem:[#allocation2 + $0x50] sm:$0xff] %v4213_v32  ;;  %v4167_v48 = vadd.f32 %v14133_v35, %v4112_v47  ;;  %v10447_v4 = vpop.f32.mrb[8].mxu0  ;;  %10547 = vmatmul.mubr.f32.gmra.mrb[6].mxu1 %v4213_v32  ;;  %v14366_v12 = vld [vmem:[#allocation2 + $0x37] sm:$0xff] }
 0x479   : > { %v4216_v14 = vmax.f32 %v4168_v18, 0.0  ;;  %v4115_v21 = vmul.f32 %v10447_v4, %v14128_v26  ;;  %v3852_v8 = vpop.f32.mrb[9].mxu0  ;;  %12865 = vmatprep.mubr.msk.f32.mxu1 %vm4266_vm1, %v4214_v10 }
 0x47a   : > { %v4215_v41 = vmax.f32 %v4167_v48, 0.0  ;;  %v4114_v38 = vmul.f32 %v14128_v26, %v3852_v8 }
 0x47b   : > { %4331 = vst [vmem:[#allocation2 + $0x68] sm:$0xff] %v4216_v14  ;;  %v4170_v36 = vadd.f32 %v14133_v35, %v4115_v21 }
 0x47c   : > { %v4282_v37 = vsel %vm4261_vm0, %v4215_v41, 0.0  ;;  %v4169_v39 = vadd.f32 %v14133_v35, %v4114_v38  ;;  %v10450_v31 = vpop.f32.mrb[10].mxu0  ;;  %12866 = vmatmul.mubr.msk.f32.gmra.mrb[8].mxu1 %vm4261_vm0, %v4215_v41 }
 0x47d   : > { %4330 = vst [vmem:[#allocation2 + $0x60] sm:$0xff] %v4282_v37  ;;  %v4218_v42 = vmax.f32 %v4170_v36, 0.0  ;;  %v4117_v44 = vmul.f32 %v10450_v31, %v14128_v26  ;;  %v3862_v51 = vpop.f32.mrb[11].mxu0  ;;  %10552 = vmatprep.mubr.f32.mxu1 %v4216_v14 }
 0x47e   : > { %v4217_v52 = vmax.f32 %v4169_v39, 0.0  ;;  %v4116_v53 = vmul.f32 %v14128_v26, %v3862_v51 }
 0x47f   : > { %v4285_v59 = vsel %vm4261_vm0, %v4218_v42, 0.0  ;;  %v4172_v60 = vadd.f32 %v14133_v35, %v4117_v44 }
 0x480   : > { %4333 = vst [vmem:[#allocation2 + $0x78] sm:$0xff] %v4285_v59  ;;  %v4284_v62 = vsel %vm4266_vm1, %v4217_v52, 0.0  ;;  %v4171_v2 = vadd.f32 %v14133_v35, %v4116_v53  ;;  %v10453_v11 = vpop.f32.mrb[12].mxu0  ;;  %12867 = vmatmul.mubr.msk.f32.gmra.mrb[10].mxu1 %vm4266_vm1, %v4217_v52 }
 0x481   : > { %4332 = vst [vmem:[#allocation2 + $0x70] sm:$0xff] %v4284_v62  ;;  %v4220_v34 = vmax.f32 %v4172_v60, 0.0  ;;  %v4119_v0 = vmul.f32 %v10453_v11, %v14128_v26  ;;  %v3872_v61 = vpop.f32.mrb[13].mxu0  ;;  %12868 = vmatprep.mubr.msk.f32.mxu1 %vm4261_vm0, %v4218_v42 }
 0x482   : > { %v4219_v6 = vmax.f32 %v4171_v2, 0.0  ;;  %v4118_v43 = vmul.f32 %v14128_v26, %v3872_v61 }
 0x483   : > { %v4287_v17 = vsel %vm4266_vm1, %v4220_v34, 0.0  ;;  %v4174_v28 = vadd.f32 %v14133_v35, %v4119_v0 }
 0x484   : > { %4335 = vst [vmem:[#allocation2 + $0x88] sm:$0xff] %v4287_v17  ;;  %4334 = vst [vmem:[#allocation2 + $0x80] sm:$0xff] %v4219_v6  ;;  %v4173_v5 = vadd.f32 %v14133_v35, %v4118_v43  ;;  %v10456_v57 = vpop.f32.mrb[14].mxu0  ;;  %10556 = vmatmul.mubr.f32.gmra.mrb[12].mxu1 %v4219_v6 }
 0x485   : > { %v4222_v16 = vmax.f32 %v4174_v28, 0.0  ;;  %v4121_v45 = vmul.f32 %v10456_v57, %v14128_v26  ;;  %v3882_v46 = vpop.f32.mrb[15].mxu0  ;;  %12869 = vmatprep.mubr.msk.f32.mxu1 %vm4266_vm1, %v4220_v34 }
 0x486   : > { %v4221_v40 = vmax.f32 %v4173_v5, 0.0  ;;  %v4120_v49 = vmul.f32 %v14128_v26, %v3882_v46 }
 0x487   : > { %4337 = vst [vmem:[#allocation2 + $0x98] sm:$0xff] %v4222_v16  ;;  %v4176_v13 = vadd.f32 %v14133_v35, %v4121_v45 }
 0x488   : > { %v4288_v50 = vsel %vm4261_vm0, %v4221_v40, 0.0  ;;  %v4175_v54 = vadd.f32 %v14133_v35, %v4120_v49  ;;  %v10459_v29 = vpop.f32.mrb[16].mxu0  ;;  %12870 = vmatmul.mubr.msk.f32.gmra.mrb[14].mxu1 %vm4261_vm0, %v4221_v40 }
 0x489   : > { %4336 = vst [vmem:[#allocation2 + $0x90] sm:$0xff] %v4288_v50  ;;  %v4224_v55 = vmax.f32 %v4176_v13, 0.0  ;;  %v4123_v63 = vmul.f32 %v10459_v29, %v14128_v26  ;;  %v3892_v19 = vpop.f32.mrb[17].mxu0  ;;  %10561 = vmatprep.mubr.f32.mxu1 %v4222_v16 }
 0x48a   : > { %v4223_v1 = vmax.f32 %v4175_v54, 0.0  ;;  %v4122_v33 = vmul.f32 %v14128_v26, %v3892_v19 }
 0x48b   : > { %v4291_v20 = vsel %vm4261_vm0, %v4224_v55, 0.0  ;;  %v4178_v56 = vadd.f32 %v14133_v35, %v4123_v63 }
 0x48c   : > { %4339 = vst [vmem:[#allocation2 + $0xa8] sm:$0xff] %v4291_v20  ;;  %v4290_v23 = vsel %vm4266_vm1, %v4223_v1, 0.0  ;;  %v4177_v3 = vadd.f32 %v14133_v35, %v4122_v33  ;;  %v10462_v30 = vpop.f32.mrb[18].mxu0  ;;  %12871 = vmatmul.mubr.msk.f32.gmra.mrb[16].mxu1 %vm4266_vm1, %v4223_v1 }
 0x48d   : > { %4338 = vst [vmem:[#allocation2 + $0xa0] sm:$0xff] %v4290_v23  ;;  %v4226_v27 = vmax.f32 %v4178_v56, 0.0  ;;  %v4125_v58 = vmul.f32 %v10462_v30, %v14128_v26  ;;  %v3902_v9 = vpop.f32.mrb[19].mxu0  ;;  %12872 = vmatprep.mubr.msk.f32.mxu1 %vm4261_vm0, %v4224_v55 }
 0x48e   : > { %v4225_v10 = vmax.f32 %v4177_v3, 0.0  ;;  %v4124_v24 = vmul.f32 %v14128_v26, %v3902_v9 }
 0x48f   : > { %v4293_v15 = vsel %vm4266_vm1, %v4226_v27, 0.0  ;;  %v4180_v32 = vadd.f32 %v14133_v35, %v4125_v58 }
 0x490   : > { %4341 = vst [vmem:[#allocation2 + $0xb8] sm:$0xff] %v4293_v15  ;;  %4340 = vst [vmem:[#allocation2 + $0xb0] sm:$0xff] %v4225_v10  ;;  %v4179_v47 = vadd.f32 %v14133_v35, %v4124_v24  ;;  %v10465_v7 = vpop.f32.mrb[20].mxu0  ;;  %10565 = vmatmul.mubr.f32.gmra.mrb[18].mxu1 %v4225_v10 }
 0x491   : > { %v4228_v18 = vmax.f32 %v4180_v32, 0.0  ;;  %v4127_v48 = vmul.f32 %v10465_v7, %v14128_v26  ;;  %v3912_v4 = vpop.f32.mrb[21].mxu0  ;;  %12873 = vmatprep.mubr.msk.f32.mxu1 %vm4266_vm1, %v4226_v27 }
 0x492   : > { %v4227_v14 = vmax.f32 %v4179_v47, 0.0  ;;  %v4126_v21 = vmul.f32 %v14128_v26, %v3912_v4 }
 0x493   : > { %4343 = vst [vmem:[#allocation2 + $0xc8] sm:$0xff] %v4228_v18  ;;  %v4182_v8 = vadd.f32 %v14133_v35, %v4127_v48 }
 0x494   : > { %v4294_v41 = vsel %vm4261_vm0, %v4227_v14, 0.0  ;;  %v4181_v38 = vadd.f32 %v14133_v35, %v4126_v21  ;;  %v10468_v36 = vpop.f32.mrb[22].mxu0  ;;  %12874 = vmatmul.mubr.msk.f32.gmra.mrb[20].mxu1 %vm4261_vm0, %v4227_v14 }
 0x495   : > { %4342 = vst [vmem:[#allocation2 + $0xc0] sm:$0xff] %v4294_v41  ;;  %v4230_v37 = vmax.f32 %v4182_v8, 0.0  ;;  %v4129_v39 = vmul.f32 %v10468_v36, %v14128_v26  ;;  %v3922_v31 = vpop.f32.mrb[23].mxu0  ;;  %10570 = vmatprep.mubr.f32.mxu1 %v4228_v18 }
 0x496   : > { %v4229_v42 = vmax.f32 %v4181_v38, 0.0  ;;  %v4128_v44 = vmul.f32 %v14128_v26, %v3922_v31 }
 0x497   : > { %v4297_v51 = vsel %vm4261_vm0, %v4230_v37, 0.0  ;;  %v4184_v52 = vadd.f32 %v14133_v35, %v4129_v39 }
 0x498   : > { %4345 = vst [vmem:[#allocation2 + $0xd8] sm:$0xff] %v4297_v51  ;;  %v4296_v53 = vsel %vm4266_vm1, %v4229_v42, 0.0  ;;  %v4183_v59 = vadd.f32 %v14133_v35, %v4128_v44  ;;  %v10471_v60 = vpop.f32.mrb[24].mxu0  ;;  %12875 = vmatmul.mubr.msk.f32.gmra.mrb[22].mxu1 %vm4266_vm1, %v4229_v42 }
 0x499   : > { %4344 = vst [vmem:[#allocation2 + $0xd0] sm:$0xff] %v4296_v53  ;;  %v4232_v62 = vmax.f32 %v4184_v52, 0.0  ;;  %v4131_v2 = vmul.f32 %v10471_v60, %v14128_v26  ;;  %v3932_v11 = vpop.f32.mrb[25].mxu0  ;;  %12876 = vmatprep.mubr.msk.f32.mxu1 %vm4261_vm0, %v4230_v37 }
 0x49a   : > { %v4231_v34 = vmax.f32 %v4183_v59, 0.0  ;;  %v4130_v0 = vmul.f32 %v14128_v26, %v3932_v11 }
 0x49b   : > { %v4299_v61 = vsel %vm4266_vm1, %v4232_v62, 0.0  ;;  %v4186_v6 = vadd.f32 %v14133_v35, %v4131_v2 }
 0x49c   : > { %4347 = vst [vmem:[#allocation2 + $0xe8] sm:$0xff] %v4299_v61  ;;  %4346 = vst [vmem:[#allocation2 + $0xe0] sm:$0xff] %v4231_v34  ;;  %v4185_v43 = vadd.f32 %v14133_v35, %v4130_v0  ;;  %v10474_v17 = vpop.f32.mrb[26].mxu0  ;;  %10574 = vmatmul.mubr.f32.gmra.mrb[24].mxu1 %v4231_v34 }
 0x49d   : > { %v4234_v28 = vmax.f32 %v4186_v6, 0.0  ;;  %v4133_v5 = vmul.f32 %v10474_v17, %v14128_v26  ;;  %v3942_v57 = vpop.f32.mrb[27].mxu0  ;;  %12877 = vmatprep.mubr.msk.f32.mxu1 %vm4266_vm1, %v4232_v62 }
 0x49e   : > { %v4233_v16 = vmax.f32 %v4185_v43, 0.0  ;;  %v4132_v45 = vmul.f32 %v14128_v26, %v3942_v57 }
 0x49f   : > { %4349 = vst [vmem:[#allocation2 + $0xf8] sm:$0xff] %v4234_v28  ;;  %v4188_v46 = vadd.f32 %v14133_v35, %v4133_v5 }
 0x4a0   : > { %v4300_v40 = vsel %vm4261_vm0, %v4233_v16, 0.0  ;;  %v4187_v49 = vadd.f32 %v14133_v35, %v4132_v45  ;;  %v10477_v13 = vpop.f32.mrb[28].mxu0  ;;  %12878 = vmatmul.mubr.msk.f32.gmra.mrb[26].mxu1 %vm4261_vm0, %v4233_v16 }
 0x4a1   : > { %4348 = vst [vmem:[#allocation2 + $0xf0] sm:$0xff] %v4300_v40  ;;  %v4236_v50 = vmax.f32 %v4188_v46, 0.0  ;;  %v4135_v54 = vmul.f32 %v10477_v13, %v14128_v26  ;;  %v3952_v29 = vpop.f32.mrb[29].mxu0  ;;  %10579 = vmatprep.mubr.f32.mxu1 %v4234_v28 }
 0x4a2   : > { %v4235_v55 = vmax.f32 %v4187_v49, 0.0  ;;  %v4134_v63 = vmul.f32 %v14128_v26, %v3952_v29 }
 0x4a3   : > { %v4303_v19 = vsel %vm4261_vm0, %v4236_v50, 0.0  ;;  %v4190_v1 = vadd.f32 %v14133_v35, %v4135_v54 }
 0x4a4   : > { %4351 = vst [vmem:[#allocation2 + $0x108] sm:$0xff] %v4303_v19  ;;  %v4302_v33 = vsel %vm4266_vm1, %v4235_v55, 0.0  ;;  %v4189_v20 = vadd.f32 %v14133_v35, %v4134_v63  ;;  %v10480_v56 = vpop.f32.mrb[30].mxu0  ;;  %12879 = vmatmul.mubr.msk.f32.gmra.mrb[28].mxu1 %vm4266_vm1, %v4235_v55 }
 0x4a5   : > { %4350 = vst [vmem:[#allocation2 + $0x100] sm:$0xff] %v4302_v33  ;;  %v4238_v23 = vmax.f32 %v4190_v1, 0.0  ;;  %v4137_v3 = vmul.f32 %v10480_v56, %v14128_v26  ;;  %v3962_v30 = vpop.f32.mrb[31].mxu0  ;;  %12880 = vmatprep.mubr.msk.f32.mxu1 %vm4261_vm0, %v4236_v50 }
 0x4a6   : > { %v4237_v27 = vmax.f32 %v4189_v20, 0.0  ;;  %v4136_v58 = vmul.f32 %v14128_v26, %v3962_v30 }
 0x4a7   : > { %v4305_v9 = vsel %vm4266_vm1, %v4238_v23, 0.0  ;;  %v4192_v10 = vadd.f32 %v14133_v35, %v4137_v3 }
 0x4a8   : > { %4353 = vst [vmem:[#allocation2 + $0x118] sm:$0xff] %v4305_v9  ;;  %4352 = vst [vmem:[#allocation2 + $0x110] sm:$0xff] %v4237_v27  ;;  %v4191_v24 = vadd.f32 %v14133_v35, %v4136_v58  ;;  %v10483_v15 = vpop.f32.mrb[32].mxu0  ;;  %10583 = vmatmul.mubr.f32.gmra.mrb[30].mxu1 %v4237_v27 }
 0x4a9   : > { %v4240_v32 = vmax.f32 %v4192_v10, 0.0  ;;  %v4139_v47 = vmul.f32 %v10483_v15, %v14128_v26  ;;  %v3972_v7 = vpop.f32.mrb[33].mxu0  ;;  %12881 = vmatprep.mubr.msk.f32.mxu1 %vm4266_vm1, %v4238_v23 }
 0x4aa   : > { %v4239_v18 = vmax.f32 %v4191_v24, 0.0  ;;  %v4138_v48 = vmul.f32 %v14128_v26, %v3972_v7 }
 0x4ab   : > { %4355 = vst [vmem:[#allocation2 + $0x128] sm:$0xff] %v4240_v32  ;;  %v4194_v4 = vadd.f32 %v14133_v35, %v4139_v47 }
 0x4ac   : > { %v4306_v14 = vsel %vm4261_vm0, %v4239_v18, 0.0  ;;  %v4193_v21 = vadd.f32 %v14133_v35, %v4138_v48  ;;  %v10486_v8 = vpop.f32.mrb[34].mxu0  ;;  %12882 = vmatmul.mubr.msk.f32.gmra.mrb[32].mxu1 %vm4261_vm0, %v4239_v18 }
 0x4ad   : > { %4354 = vst [vmem:[#allocation2 + $0x120] sm:$0xff] %v4306_v14  ;;  %v4242_v41 = vmax.f32 %v4194_v4, 0.0  ;;  %v4141_v38 = vmul.f32 %v10486_v8, %v14128_v26  ;;  %v3982_v36 = vpop.f32.mrb[35].mxu0  ;;  %10588 = vmatprep.mubr.f32.mxu1 %v4240_v32 }
 0x4ae   : > { %v4241_v37 = vmax.f32 %v4193_v21, 0.0  ;;  %v4140_v39 = vmul.f32 %v14128_v26, %v3982_v36 }
 0x4af   : > { %v4309_v31 = vsel %vm4261_vm0, %v4242_v41, 0.0  ;;  %v4196_v42 = vadd.f32 %v14133_v35, %v4141_v38 }
 0x4b0   : > { %4357 = vst [vmem:[#allocation2 + $0x138] sm:$0xff] %v4309_v31  ;;  %v4308_v44 = vsel %vm4266_vm1, %v4241_v37, 0.0  ;;  %v4195_v51 = vadd.f32 %v14133_v35, %v4140_v39  ;;  %v10489_v52 = vpop.f32.mrb[36].mxu0  ;;  %12883 = vmatmul.mubr.msk.f32.gmra.mrb[34].mxu1 %vm4266_vm1, %v4241_v37  ;;  %v4372_v39 = vld [vmem:[#allocation2 + $0x17] sm:$0xff] }
 0x4b1   : > { %4356 = vst [vmem:[#allocation2 + $0x130] sm:$0xff] %v4308_v44  ;;  %v4244_v53 = vmax.f32 %v4196_v42, 0.0  ;;  %v4143_v59 = vmul.f32 %v10489_v52, %v14128_v26  ;;  %v3992_v60 = vpop.f32.mrb[37].mxu0  ;;  %12884 = vmatprep.mubr.msk.f32.mxu1 %vm4261_vm0, %v4242_v41  ;;  %v5162_v44 = vld [vmem:[#allocation8 + $0x110] sm:$0xff] }
 0x4b2   : > { %v4243_v62 = vmax.f32 %v4195_v51, 0.0  ;;  %v4142_v2 = vmul.f32 %v14128_v26, %v3992_v60  ;;  %v5163_v51 = vld [vmem:[#allocation8 + $0x118] sm:$0xff] }
 0x4b3   : > { %v4311_v11 = vsel %vm4266_vm1, %v4244_v53, 0.0  ;;  %v4198_v34 = vadd.f32 %v14133_v35, %v4143_v59  ;;  %v4374_v59 = vld [vmem:[#allocation2 + $0x27] sm:$0xff]  ;;  %v11797_v60 = vpack.c.bf16 %v5163_v51, %v5162_v44 }
 0x4b4   : > { %4359 = vst [vmem:[#allocation2 + $0x148] sm:$0xff] %v4311_v11  ;;  %4358 = vst [vmem:[#allocation2 + $0x140] sm:$0xff] %v4243_v62  ;;  %v4197_v0 = vadd.f32 %v14133_v35, %v4142_v2  ;;  %v10492_v61 = vpop.f32.mrb[38].mxu0  ;;  %10592 = vmatmul.mubr.f32.gmra.mrb[36].mxu1 %v4243_v62  ;;  %v5164_v62 = vld [vmem:[#allocation8 + $0x120] sm:$0xff]  ;;  %v5165_v2 = vld [vmem:[#allocation8 + $0x128] sm:$0xff] }
 0x4b5   : > { %v4246_v6 = vmax.f32 %v4198_v34, 0.0  ;;  %v4145_v43 = vmul.f32 %v10492_v61, %v14128_v26  ;;  %v4002_v17 = vpop.f32.mrb[39].mxu0  ;;  %12885 = vmatprep.mubr.msk.f32.mxu1 %vm4266_vm1, %v4244_v53  ;;  %v14363_v11 = vld [vmem:[#allocation2 + $0x2f] sm:$0xff] }
 0x4b6   : > { %v4245_v28 = vmax.f32 %v4197_v0, 0.0  ;;  %v4144_v5 = vmul.f32 %v14128_v26, %v4002_v17  ;;  %v5166_v34 = vld [vmem:[#allocation8 + $0x130] sm:$0xff]  ;;  %v5167_v0 = vld [vmem:[#allocation8 + $0x138] sm:$0xff]  ;;  %v14372_v17 = vld [vmem:[#allocation2 + $0x47] sm:$0xff] }
 0x4b7   : > { %4361 = vst [vmem:[#allocation2 + $0x158] sm:$0xff] %v4246_v6  ;;  %v4200_v57 = vadd.f32 %v14133_v35, %v4145_v43  ;;  %v11805_v61 = vpack.c.bf16 %v5167_v0, %v5166_v34  ;;  %v5168_v43 = vld [vmem:[#allocation8 + $0x140] sm:$0xff]  ;;  %v5580_v34 = vld [vmem:[#allocation8 + $0x190] sm:$0xff]  ;;  %v5581_v0 = vld [vmem:[#allocation8 + $0x198] sm:$0xff] }
 0x4b8   : > { %v4312_v16 = vsel %vm4261_vm0, %v4245_v28, 0.0  ;;  %v4199_v45 = vadd.f32 %v14133_v35, %v4144_v5  ;;  %v10495_v46 = vpop.f32.mrb[40].mxu0  ;;  %12886 = vmatmul.mubr.msk.f32.gmra.mrb[38].mxu1 %vm4261_vm0, %v4245_v28  ;;  %v14375_v5 = vld [vmem:[#allocation2 + $0x4f] sm:$0xff] }
 0x4b9   : > { %4360 = vst [vmem:[#allocation2 + $0x150] sm:$0xff] %v4312_v16  ;;  %v4248_v40 = vmax.f32 %v4200_v57, 0.0  ;;  %v4147_v49 = vmul.f32 %v10495_v46, %v14128_v26  ;;  %v4012_v13 = vpop.f32.mrb[41].mxu0  ;;  %10597 = vmatprep.mubr.f32.mxu1 %v4246_v6  ;;  %v14369_v6 = vld [vmem:[#allocation2 + $0x3f] sm:$0xff]  ;;  %v5170_v57 = vld [vmem:[#allocation8 + $0x150] sm:$0xff] }
 0x4ba   : > { %v4247_v50 = vmax.f32 %v4199_v45, 0.0  ;;  %v4146_v54 = vmul.f32 %v14128_v26, %v4012_v13  ;;  %v5171_v16 = vld [vmem:[#allocation8 + $0x158] sm:$0xff]  ;;  %v5173_v13 = vld [vmem:[#allocation8 + $0x168] sm:$0xff] }
 0x4bb   : > { %v4315_v29 = vsel %vm4261_vm0, %v4248_v40, 0.0  ;;  %v4202_v55 = vadd.f32 %v14133_v35, %v4147_v49  ;;  %v14378_v45 = vld [vmem:[#allocation2 + $0x57] sm:$0xff]  ;;  %v11813_v46 = vpack.c.bf16 %v5171_v16, %v5170_v57  ;;  %v5172_v49 = vld [vmem:[#allocation8 + $0x160] sm:$0xff]  ;;  %v5113_v57 = vld [vmem:[#allocation2 + $0x29] sm:$0xff] }
 0x4bc   : > { %4363 = vst [vmem:[#allocation2 + $0x168] sm:$0xff] %v4315_v29  ;;  %v4314_v63 = vsel %vm4266_vm1, %v4247_v50, 0.0  ;;  %v4201_v19 = vadd.f32 %v14133_v35, %v4146_v54  ;;  %v10498_v1 = vpop.f32.mrb[42].mxu0  ;;  %12887 = vmatmul.mubr.msk.f32.gmra.mrb[40].mxu1 %vm4266_vm1, %v4247_v50  ;;  %v14384_v50 = vld [vmem:[#allocation2 + $0x67] sm:$0xff]  ;;  %v11817_v54 = vpack.c.bf16 %v5173_v13, %v5172_v49  ;;  %v14387_v29 = vld [vmem:[#allocation2 + $0x6f] sm:$0xff]  ;;  %v5585_v13 = vld [vmem:[#allocation8 + $0x1b8] sm:$0xff] }
 0x4bd   : > { %4362 = vst [vmem:[#allocation2 + $0x160] sm:$0xff] %v4314_v63  ;;  %v4250_v33 = vmax.f32 %v4202_v55, 0.0  ;;  %v4149_v20 = vmul.f32 %v10498_v1, %v14128_v26  ;;  %v4022_v56 = vpop.f32.mrb[43].mxu0  ;;  %12888 = vmatprep.mubr.msk.f32.mxu1 %vm4261_vm0, %v4248_v40  ;;  %v14381_v40 = vld [vmem:[#allocation2 + $0x5f] sm:$0xff]  ;;  %v5174_v55 = vld [vmem:[#allocation8 + $0x170] sm:$0xff]  ;;  %v14471_v44 = vld [vmem:[#allocation2 + $0x147] sm:$0xff] }
 0x4be   : > { %v4249_v23 = vmax.f32 %v4201_v19, 0.0  ;;  %v4148_v3 = vmul.f32 %v14128_v26, %v4022_v56  ;;  %v5175_v63 = vld [vmem:[#allocation8 + $0x178] sm:$0xff]  ;;  %v5579_v56 = vld [vmem:[#allocation8 + $0x188] sm:$0xff]  ;;  %v5584_v49 = vld [vmem:[#allocation8 + $0x1b0] sm:$0xff] }
 0x4bf   : > { %v4317_v30 = vsel %vm4266_vm1, %v4250_v33, 0.0  ;;  %v4204_v27 = vadd.f32 %v14133_v35, %v4149_v20  ;;  %v14390_v19 = vld [vmem:[#allocation2 + $0x77] sm:$0xff]  ;;  %v11821_v1 = vpack.c.bf16 %v5175_v63, %v5174_v55  ;;  %v5578_v20 = vld [vmem:[#allocation8 + $0x180] sm:$0xff]  ;;  %v11837_v55 = vpack.c.bf16 %v5585_v13, %v5584_v49 }
 0x4c0   : > { %4365 = vst [vmem:[#allocation2 + $0x178] sm:$0xff] %v4317_v30  ;;  %4364 = vst [vmem:[#allocation2 + $0x170] sm:$0xff] %v4249_v23  ;;  %v4203_v58 = vadd.f32 %v14133_v35, %v4148_v3  ;;  %v10501_v9 = vpop.f32.mrb[44].mxu0  ;;  %10601 = vmatmul.mubr.f32.gmra.mrb[42].mxu1 %v4249_v23  ;;  %v14396_v23 = vld [vmem:[#allocation2 + $0x87] sm:$0xff]  ;;  %v14399_v3 = vpack.c.bf16 %v5579_v56, %v5578_v20  ;;  %v14401_v30 = vld [vmem:[#allocation2 + $0x8f] sm:$0xff] }
 0x4c1   : > { %v4252_v10 = vmax.f32 %v4204_v27, 0.0  ;;  %v4151_v24 = vmul.f32 %v10501_v9, %v14128_v26  ;;  %v4032_v15 = vpop.f32.mrb[45].mxu0  ;;  %12889 = vmatprep.mubr.msk.f32.mxu1 %vm4266_vm1, %v4250_v33  ;;  %v14393_v33 = vld [vmem:[#allocation2 + $0x7f] sm:$0xff]  ;;  %v14404_v27 = vld [vmem:[#allocation2 + $0x97] sm:$0xff]  ;;  %v14411_v9 = vld [vmem:[#allocation2 + $0xa7] sm:$0xff] }
 0x4c2   : > { %v4251_v32 = vmax.f32 %v4203_v58, 0.0  ;;  %v4150_v47 = vmul.f32 %v14128_v26, %v4032_v15  ;;  %v14408_v58 = vld [vmem:[#allocation2 + $0x9f] sm:$0xff]  ;;  %v14474_v51 = vld [vmem:[#allocation2 + $0x14f] sm:$0xff] }
 0x4c3   : > { %4367 = vst [vmem:[#allocation2 + $0x188] sm:$0xff] %v4252_v10  ;;  %v4206_v7 = vadd.f32 %v14133_v35, %v4151_v24  ;;  %v14417_v24 = vld [vmem:[#allocation2 + $0xb7] sm:$0xff]  ;;  %v14420_v15 = vld [vmem:[#allocation2 + $0xbf] sm:$0xff]  ;;  %v5587_v20 = vld [vmem:[#allocation8 + $0x1c8] sm:$0xff] }
 0x4c4   : > { %v4318_v18 = vsel %vm4261_vm0, %v4251_v32, 0.0  ;;  %v4205_v48 = vadd.f32 %v14133_v35, %v4150_v47  ;;  %v10504_v4 = vpop.f32.mrb[46].mxu0  ;;  %12890 = vmatmul.mubr.msk.f32.gmra.mrb[44].mxu1 %vm4261_vm0, %v4251_v32  ;;  %v14423_v32 = vld [vmem:[#allocation2 + $0xc7] sm:$0xff]  ;;  %v14426_v47 = vld [vmem:[#allocation2 + $0xcf] sm:$0xff] }
 0x4c5   : > { %4366 = vst [vmem:[#allocation2 + $0x180] sm:$0xff] %v4318_v18  ;;  %v4254_v14 = vmax.f32 %v4206_v7, 0.0  ;;  %v4153_v21 = vmul.f32 %v10504_v4, %v14128_v26  ;;  %v4042_v8 = vpop.f32.mrb[47].mxu0  ;;  %10606 = vmatprep.mubr.f32.mxu1 %v4252_v10  ;;  %v14414_v10 = vld [vmem:[#allocation2 + $0xaf] sm:$0xff]  ;;  %v14429_v7 = vld [vmem:[#allocation2 + $0xd7] sm:$0xff]  ;;  %v14432_v18 = vld [vmem:[#allocation2 + $0xdf] sm:$0xff] }
 0x4c6   : > { %v4253_v41 = vmax.f32 %v4205_v48, 0.0  ;;  %v4152_v38 = vmul.f32 %v14128_v26, %v4042_v8  ;;  %v14435_v48 = vld [vmem:[#allocation2 + $0xe7] sm:$0xff]  ;;  %v14438_v4 = vld [vmem:[#allocation2 + $0xef] sm:$0xff] }
 0x4c7   : > { %v4321_v36 = vsel %vm4261_vm0, %v4254_v14, 0.0  ;;  %v4208_v37 = vadd.f32 %v14133_v35, %v4153_v21  ;;  %v14441_v14 = vld [vmem:[#allocation2 + $0xf7] sm:$0xff]  ;;  %v14444_v21 = vld [vmem:[#allocation2 + $0xff] sm:$0xff]  ;;  %v14447_v8 = vld [vmem:[#allocation2 + $0x107] sm:$0xff] }
 0x4c8   : > { %4369 = vst [vmem:[#allocation2 + $0x198] sm:$0xff] %v4321_v36  ;;  %v4320_v31 = vsel %vm4266_vm1, %v4253_v41, 0.0  ;;  %v4207_v42 = vadd.f32 %v14133_v35, %v4152_v38  ;;  %12891 = vmatmul.mubr.msk.f32.gmra.mrb[46].mxu1 %vm4266_vm1, %v4253_v41  ;;  %v11801_v35 = vpack.c.bf16 %v5165_v2, %v5164_v62  ;;  %v14450_v41 = vld [vmem:[#allocation2 + $0x10f] sm:$0xff]  ;;  %v14453_v38 = vld [vmem:[#allocation2 + $0x117] sm:$0xff]  ;;  %v14456_v36 = vld [vmem:[#allocation2 + $0x11f] sm:$0xff] }
 0x4c9   : > { %4368 = vst [vmem:[#allocation2 + $0x190] sm:$0xff] %v4320_v31  ;;  %v4256_v52 = vmax.f32 %v4208_v37, 0.0  ;;  %10641 = vmatprep.mubr.f32.mxu1 %v4372_v39  ;;  %v14459_v37 = vld [vmem:[#allocation2 + $0x127] sm:$0xff]  ;;  %v14462_v39 = vld [vmem:[#allocation2 + $0x12f] sm:$0xff]  ;;  %v14465_v31 = vld [vmem:[#allocation2 + $0x137] sm:$0xff] }
 0x4ca   : > { %v4255_v26 = vmax.f32 %v4207_v42, 0.0  ;;  %v14468_v42 = vld [vmem:[#allocation2 + $0x13f] sm:$0xff]  ;;  %v14511_v56 = vld [vmem:[#allocation2 + $0x49] sm:$0xff]  ;;  %v14526_v13 = vld [vmem:[#allocation2 + $0x71] sm:$0xff] }
 0x4cb   : > { %v4323_v53 = vsel %vm4266_vm1, %v4256_v52, 0.0  ;;  %v14477_v52 = vld [vmem:[#allocation2 + $0x157] sm:$0xff]  ;;  %v14508_v63 = vld [vmem:[#allocation2 + $0x41] sm:$0xff] }
 0x4cc   : > { %4371 = vst [vmem:[#allocation2 + $0x1a8] sm:$0xff] %v4323_v53  ;;  %4370 = vst [vmem:[#allocation2 + $0x1a0] sm:$0xff] %v4255_v26  ;;  %10642 = vmatmul.mubr.f32.vlgmr.msra.gmra.mrb[0].mxu1 %v4373_v25  ;;  %v14480_v26 = vld [vmem:[#allocation2 + $0x15f] sm:$0xff]  ;;  %v14483_v25 = vld [vmem:[#allocation2 + $0x167] sm:$0xff] }
 0x4cd   : > { %11796 = vmatpush3.bf16.msra.mxu1 %v14122_v22  ;;  %10644 = vmatprep.mubr.f32.mxu1 %v4374_v59  ;;  %v5169_v22 = vld [vmem:[#allocation8 + $0x148] sm:$0xff]  ;;  %v14489_v59 = vld [vmem:[#allocation2 + $0x177] sm:$0xff] }
 0x4ce   : > { %11798 = vmatprep.subr.bf16.mxu1 %v11797_v60  ;;  %v11809_v28 = vpack.c.bf16 %v5169_v22, %v5168_v43  ;;  %v14486_v53 = vld [vmem:[#allocation2 + $0x16f] sm:$0xff]  ;;  %v14495_v62 = vld [vmem:[#allocation2 + $0x187] sm:$0xff]  ;;  %v5111_v2 = vld [vmem:[#allocation2 + $0x19] sm:$0xff]  ;;  %v11829_v43 = vpack.c.bf16 %v5581_v0, %v5580_v34 }
 0x4cf   : > { %v5582_v22 = vld [vmem:[#allocation8 + $0x1a0] sm:$0xff]  ;;  %v5588_v34 = vld [vmem:[#allocation8 + $0x1d0] sm:$0xff]  ;;  %v5589_v0 = vld [vmem:[#allocation8 + $0x1d8] sm:$0xff] }
 0x4d0   : > { %10645 = vmatmul.mubr.f32.gmra.mrb[2].mxu1 %v14363_v11 }
 0x4d1   : > { %10647 = vmatprep.mubr.f32.mxu1 %v14366_v12  ;;  %11800 = vmatpush3.bf16.msra.mxu1 %v11797_v60  ;;  %v14492_v60 = vld [vmem:[#allocation2 + $0x17f] sm:$0xff] }
 0x4d2   : > { %11802 = vmatprep.subr.bf16.mxu1 %v11801_v35 }
 0x4d4   : > { %10648 = vmatmul.mubr.f32.gmra.mrb[4].mxu1 %v14369_v6 }
 0x4d5   : > { %10650 = vmatprep.mubr.f32.mxu1 %v14372_v17  ;;  %11804 = vmatpush3.bf16.msra.mxu1 %v11801_v35  ;;  %v14498_v35 = vld [vmem:[#allocation2 + $0x18f] sm:$0xff] }
 0x4d6   : > { %11806 = vmatprep.subr.bf16.mxu1 %v11805_v61 }
 0x4d8   : > { %10651 = vmatmul.mubr.f32.gmra.mrb[6].mxu1 %v14375_v5 }
 0x4d9   : > { %10653 = vmatprep.mubr.f32.mxu1 %v14378_v45  ;;  %11808 = vmatpush3.bf16.msra.mxu1 %v11805_v61  ;;  %v5112_v61 = vld [vmem:[#allocation2 + $0x21] sm:$0xff] }
 0x4da   : > { %11810 = vmatprep.subr.bf16.mxu1 %v11809_v28 }
 0x4dc   : > { %10654 = vmatmul.mubr.f32.gmra.mrb[8].mxu1 %v14381_v40 }
 0x4dd   : > { %10656 = vmatprep.mubr.f32.mxu1 %v14384_v50  ;;  %11812 = vmatpush3.bf16.msra.mxu1 %v11809_v28  ;;  %v5583_v28 = vld [vmem:[#allocation8 + $0x1a8] sm:$0xff] }
 0x4de   : > { %11814 = vmatprep.subr.bf16.mxu1 %v11813_v46  ;;  %v11833_v16 = vpack.c.bf16 %v5583_v28, %v5582_v22  ;;  %v14520_v22 = vld [vmem:[#allocation2 + $0x61] sm:$0xff] }
 0x4df   : > { %15477 = vst [vmem:[#allocation60_spill] sm:$0xff] %v14520_v22  ;;  %v5590_v28 = vld [vmem:[#allocation8 + $0x1e0] sm:$0xff] }
 0x4e0   : > { %10657 = vmatmul.mubr.f32.gmra.mrb[10].mxu1 %v14387_v29 }
 0x4e1   : > { %10659 = vmatprep.mubr.f32.mxu1 %v14390_v19  ;;  %11816 = vmatpush3.bf16.msra.mxu1 %v11813_v46  ;;  %v14502_v46 = vld [vmem:[#allocation2 + $0x31] sm:$0xff] }
 0x4e2   : > { %11818 = vmatprep.subr.bf16.mxu1 %v11817_v54 }
 0x4e4   : > { %10660 = vmatmul.mubr.f32.gmra.mrb[12].mxu1 %v14393_v33 }
 0x4e5   : > { %10662 = vmatprep.mubr.f32.mxu1 %v14396_v23  ;;  %11820 = vmatpush3.bf16.msra.mxu1 %v11817_v54  ;;  %v14505_v54 = vld [vmem:[#allocation2 + $0x39] sm:$0xff] }
 0x4e6   : > { %11822 = vmatprep.subr.bf16.mxu1 %v11821_v1 }
 0x4e8   : > { %10663 = vmatmul.mubr.f32.gmra.mrb[14].mxu1 %v14401_v30 }
 0x4e9   : > { %10665 = vmatprep.mubr.f32.mxu1 %v14404_v27  ;;  %11824 = vmatpush3.bf16.msra.mxu1 %v11821_v1  ;;  %v5586_v1 = vld [vmem:[#allocation8 + $0x1c0] sm:$0xff] }
 0x4ea   : > { %11826 = vmatprep.subr.bf16.mxu1 %v14399_v3 }
 0x4ec   : > { %10666 = vmatmul.mubr.f32.gmra.mrb[16].mxu1 %v14408_v58 }
 0x4ed   : > { %10668 = vmatprep.mubr.f32.mxu1 %v14411_v9 }
 0x4f0   : > { %10669 = vmatmul.mubr.f32.gmra.mrb[18].mxu1 %v14414_v10 }
 0x4f1   : > { %10671 = vmatprep.mubr.f32.mxu1 %v14417_v24 }
 0x4f4   : > { %10672 = vmatmul.mubr.f32.gmra.mrb[20].mxu1 %v14420_v15 }
 0x4f5   : > { %10674 = vmatprep.mubr.f32.mxu1 %v14423_v32 }
 0x4f8   : > { %10675 = vmatmul.mubr.f32.gmra.mrb[22].mxu1 %v14426_v47 }
 0x4f9   : > { %10677 = vmatprep.mubr.f32.mxu1 %v14429_v7 }
 0x4fc   : > { %10678 = vmatmul.mubr.f32.gmra.mrb[24].mxu1 %v14432_v18 }
 0x4fd   : > { %10680 = vmatprep.mubr.f32.mxu1 %v14435_v48 }
 0x500   : > { %10681 = vmatmul.mubr.f32.gmra.mrb[26].mxu1 %v14438_v4 }
 0x501   : > { %10683 = vmatprep.mubr.f32.mxu1 %v14441_v14 }
 0x504   : > { %10684 = vmatmul.mubr.f32.gmra.mrb[28].mxu1 %v14444_v21 }
 0x505   : > { %10686 = vmatprep.mubr.f32.mxu1 %v14447_v8 }
 0x508   : > { %10687 = vmatmul.mubr.f32.gmra.mrb[30].mxu1 %v14450_v41 }
 0x509   : > { %10689 = vmatprep.mubr.f32.mxu1 %v14453_v38 }
 0x50c   : > { %10690 = vmatmul.mubr.f32.gmra.mrb[32].mxu1 %v14456_v36 }
 0x50d   : > { %10692 = vmatprep.mubr.f32.mxu1 %v14459_v37 }
 0x510   : > { %10693 = vmatmul.mubr.f32.gmra.mrb[34].mxu1 %v14462_v39 }
 0x511   : > { %10695 = vmatprep.mubr.f32.mxu1 %v14465_v31 }
 0x514   : > { %10696 = vmatmul.mubr.f32.gmra.mrb[36].mxu1 %v14468_v42 }
 0x515   : > { %10698 = vmatprep.mubr.f32.mxu1 %v14471_v44 }
 0x518   : > { %10699 = vmatmul.mubr.f32.gmra.mrb[38].mxu1 %v14474_v51 }
 0x519   : > { %10701 = vmatprep.mubr.f32.mxu1 %v14477_v52 }
 0x51c   : > { %10702 = vmatmul.mubr.f32.gmra.mrb[40].mxu1 %v14480_v26 }
 0x51d   : > { %10704 = vmatprep.mubr.f32.mxu1 %v14483_v25 }
 0x520   : > { %10705 = vmatmul.mubr.f32.gmra.mrb[42].mxu1 %v14486_v53 }
 0x521   : > { %10707 = vmatprep.mubr.f32.mxu1 %v14489_v59 }
 0x524   : > { %10708 = vmatmul.mubr.f32.gmra.mrb[44].mxu1 %v14492_v60 }
 0x525   : > { %10710 = vmatprep.mubr.f32.mxu1 %v14495_v62 }
 0x528   : > { %10711 = vmatmul.mubr.f32.gmra.mrb[46].mxu1 %v14498_v35 }
 0x529   : > { %10745 = vmatprep.mubr.f32.mxu1 %v5111_v2  ;;  %v14514_v2 = vld [vmem:[#allocation2 + $0x51] sm:$0xff] }
 0x52c   : > { %10746 = vmatmul.mubr.f32.vlgmr.msra.gmra.mrb[0].mxu1 %v5112_v61  ;;  %v14517_v61 = vld [vmem:[#allocation2 + $0x59] sm:$0xff] }
 0x52d   : > { %10748 = vmatprep.mubr.f32.mxu1 %v5113_v57  ;;  %11828 = vmatpush3.bf16.msra.mxu1 %v14399_v3  ;;  %v11841_v3 = vpack.c.bf16 %v5587_v20, %v5586_v1  ;;  %v5591_v57 = vld [vmem:[#allocation8 + $0x1e8] sm:$0xff]  ;;  %v5592_v1 = vld [vmem:[#allocation8 + $0x1f0] sm:$0xff]  ;;  %v5593_v20 = vld [vmem:[#allocation8 + $0x1f8] sm:$0xff] }
 0x52e   : > { %11830 = vmatprep.subr.bf16.mxu1 %v11829_v43  ;;  %v11849_v49 = vpack.c.bf16 %v5591_v57, %v5590_v28  ;;  %v14540_v57 = vld [vmem:[#allocation2 + $0x91] sm:$0xff] }
 0x52f   : > { %15480 = vst [vmem:[#allocation63_spill] sm:$0xff] %v14540_v57 }
 0x530   : > { %10749 = vmatmul.mubr.f32.gmra.mrb[2].mxu1 %v14502_v46 }
 0x531   : > { %10751 = vmatprep.mubr.f32.mxu1 %v14505_v54  ;;  %11832 = vmatpush3.bf16.msra.mxu1 %v11829_v43  ;;  %v11845_v43 = vpack.c.bf16 %v5589_v0, %v5588_v34  ;;  %v11853_v34 = vpack.c.bf16 %v5593_v20, %v5592_v1  ;;  %v14532_v0 = vld [vmem:[#allocation2 + $0x81] sm:$0xff]  ;;  %v14550_v20 = vld [vmem:[#allocation2 + $0xa9] sm:$0xff] }
 0x532   : > { %11834 = vmatprep.subr.bf16.mxu1 %v11833_v16  ;;  %v14547_v1 = vld [vmem:[#allocation2 + $0xa1] sm:$0xff]  ;;  %15483 = vst [vmem:[#allocation66_spill] sm:$0xff] %v14550_v20 }
 0x533   : > { %15482 = vst [vmem:[#allocation65_spill] sm:$0xff] %v14547_v1 }
 0x534   : > { %10752 = vmatmul.mubr.f32.gmra.mrb[4].mxu1 %v14508_v63 }
 0x535   : > { %10754 = vmatprep.mubr.f32.mxu1 %v14511_v56  ;;  %11836 = vmatpush3.bf16.msra.mxu1 %v11833_v16  ;;  %v14523_v16 = vld [vmem:[#allocation2 + $0x69] sm:$0xff] }
 0x536   : > { %11838 = vmatprep.subr.bf16.mxu1 %v11837_v55  ;;  %15478 = vst [vmem:[#allocation61_spill] sm:$0xff] %v14523_v16 }
 0x538   : > { %10755 = vmatmul.mubr.f32.gmra.mrb[6].mxu1 %v14514_v2 }
 0x539   : > { %10757 = vmatprep.mubr.f32.mxu1 %v14517_v61  ;;  %11840 = vmatpush3.bf16.msra.mxu1 %v11837_v55  ;;  %v14529_v55 = vld [vmem:[#allocation2 + $0x79] sm:$0xff] }
 0x53a   : > { %11842 = vmatprep.subr.bf16.mxu1 %v11841_v3 }
 0x53c   : > { %10758 = vmatmul.mubr.f32.gmra.mrb[8].mxu1 %v14520_v22  ;;  %v5996_v22 = vld [vmem:[#allocation8 + $0x200] sm:$0xff] }
 0x53d   : > { %10760 = vmatprep.mubr.f32.mxu1 %v14523_v16  ;;  %11844 = vmatpush3.bf16.msra.mxu1 %v11841_v3  ;;  %v5997_v16 = vld [vmem:[#allocation8 + $0x208] sm:$0xff] }
 0x53e   : > { %11846 = vmatprep.subr.bf16.mxu1 %v11845_v43  ;;  %v14535_v3 = vld [vmem:[#allocation2 + $0x89] sm:$0xff]  ;;  %v14538_v28 = vpack.c.bf16 %v5997_v16, %v5996_v22  ;;  %v14553_v22 = vld [vmem:[#allocation2 + $0xb1] sm:$0xff]  ;;  %v14556_v16 = vld [vmem:[#allocation2 + $0xb9] sm:$0xff] }
 0x53f   : > { %15479 = vst [vmem:[#allocation62_spill] sm:$0xff] %v14535_v3  ;;  %15484 = vst [vmem:[#allocation67_spill] sm:$0xff] %v14553_v22 }
 0x540   : > { %10761 = vmatmul.mubr.f32.gmra.mrb[10].mxu1 %v14526_v13  ;;  %15485 = vst [vmem:[#allocation68_spill] sm:$0xff] %v14556_v16 }
 0x541   : > { %10763 = vmatprep.mubr.f32.mxu1 %v14529_v55  ;;  %11848 = vmatpush3.bf16.msra.mxu1 %v11845_v43  ;;  %v14543_v43 = vld [vmem:[#allocation2 + $0x99] sm:$0xff] }
 0x542   : > { %11850 = vmatprep.subr.bf16.mxu1 %v11849_v49  ;;  %15481 = vst [vmem:[#allocation64_spill] sm:$0xff] %v14543_v43 }
 0x544   : > { %10764 = vmatmul.mubr.f32.gmra.mrb[12].mxu1 %v14532_v0 }
 0x545   : > { %10766 = vmatprep.mubr.f32.mxu1 %v14535_v3  ;;  %11852 = vmatpush3.bf16.msra.mxu1 %v11849_v49  ;;  %v14559_v49 = vld [vmem:[#allocation2 + $0xc1] sm:$0xff] }
 0x546   : > { %11854 = vmatprep.subr.bf16.mxu1 %v11853_v34  ;;  %15486 = vst [vmem:[#allocation69_spill] sm:$0xff] %v14559_v49  ;;  %v6001_v3 = vld [vmem:[#allocation8 + $0x228] sm:$0xff] }
 0x548   : > { %10767 = vmatmul.mubr.f32.gmra.mrb[14].mxu1 %v14540_v57  ;;  %v6000_v57 = vld [vmem:[#allocation8 + $0x220] sm:$0xff] }
 0x549   : > { %10769 = vmatprep.mubr.f32.mxu1 %v14543_v43  ;;  %11856 = vmatpush3.bf16.msra.mxu1 %v11853_v34  ;;  %v14562_v34 = vld [vmem:[#allocation2 + $0xc9] sm:$0xff] }
 0x54a   : > { %11858 = vmatprep.subr.bf16.mxu1 %v14538_v28  ;;  %15487 = vst [vmem:[#allocation70_spill] sm:$0xff] %v14562_v34  ;;  %v5998_v43 = vld [vmem:[#allocation8 + $0x210] sm:$0xff] }
 0x54c   : > { %10770 = vmatmul.mubr.f32.gmra.mrb[16].mxu1 %v14547_v1  ;;  %v14565_v1 = vld [vmem:[#allocation2 + $0xd1] sm:$0xff] }
 0x54d   : > { %10772 = vmatprep.mubr.f32.mxu1 %v14550_v20  ;;  %15488 = vst [vmem:[#allocation71_spill] sm:$0xff] %v14565_v1  ;;  %v14568_v20 = vld [vmem:[#allocation2 + $0xd9] sm:$0xff] }
 0x54e   : > { %15489 = vst [vmem:[#allocation72_spill] sm:$0xff] %v14568_v20 }
 0x550   : > { %10773 = vmatmul.mubr.f32.gmra.mrb[18].mxu1 %v14553_v22  ;;  %v14571_v22 = vld [vmem:[#allocation2 + $0xe1] sm:$0xff] }
 0x551   : > { %10775 = vmatprep.mubr.f32.mxu1 %v14556_v16  ;;  %15490 = vst [vmem:[#allocation73_spill] sm:$0xff] %v14571_v22  ;;  %v14574_v16 = vld [vmem:[#allocation2 + $0xe9] sm:$0xff] }
 0x552   : > { %15491 = vst [vmem:[#allocation74_spill] sm:$0xff] %v14574_v16 }
 0x554   : > { %10776 = vmatmul.mubr.f32.gmra.mrb[20].mxu1 %v14559_v49  ;;  %v14577_v49 = vld [vmem:[#allocation2 + $0xf1] sm:$0xff] }
 0x555   : > { %10778 = vmatprep.mubr.f32.mxu1 %v14562_v34  ;;  %15492 = vst [vmem:[#allocation75_spill] sm:$0xff] %v14577_v49  ;;  %v14580_v34 = vld [vmem:[#allocation2 + $0xf9] sm:$0xff] }
 0x556   : > { %15493 = vst [vmem:[#allocation76_spill] sm:$0xff] %v14580_v34 }
 0x558   : > { %10779 = vmatmul.mubr.f32.gmra.mrb[22].mxu1 %v14565_v1  ;;  %v14583_v1 = vld [vmem:[#allocation2 + $0x101] sm:$0xff] }
 0x559   : > { %10781 = vmatprep.mubr.f32.mxu1 %v14568_v20  ;;  %15494 = vst [vmem:[#allocation77_spill] sm:$0xff] %v14583_v1  ;;  %v14586_v20 = vld [vmem:[#allocation2 + $0x109] sm:$0xff] }
 0x55a   : > { %15495 = vst [vmem:[#allocation78_spill] sm:$0xff] %v14586_v20 }
 0x55c   : > { %10782 = vmatmul.mubr.f32.gmra.mrb[24].mxu1 %v14571_v22  ;;  %v14589_v22 = vld [vmem:[#allocation2 + $0x111] sm:$0xff] }
 0x55d   : > { %10784 = vmatprep.mubr.f32.mxu1 %v14574_v16  ;;  %15496 = vst [vmem:[#allocation81_spill] sm:$0xff] %v14589_v22  ;;  %v14592_v16 = vld [vmem:[#allocation2 + $0x119] sm:$0xff] }
 0x55e   : > { %15497 = vst [vmem:[#allocation82_spill] sm:$0xff] %v14592_v16 }
 0x560   : > { %10785 = vmatmul.mubr.f32.gmra.mrb[26].mxu1 %v14577_v49  ;;  %v14595_v49 = vld [vmem:[#allocation2 + $0x121] sm:$0xff] }
 0x561   : > { %10787 = vmatprep.mubr.f32.mxu1 %v14580_v34  ;;  %15498 = vst [vmem:[#allocation83_spill] sm:$0xff] %v14595_v49  ;;  %v14598_v34 = vld [vmem:[#allocation2 + $0x129] sm:$0xff] }
 0x562   : > { %15499 = vst [vmem:[#allocation84_spill] sm:$0xff] %v14598_v34 }
 0x564   : > { %10788 = vmatmul.mubr.f32.gmra.mrb[28].mxu1 %v14583_v1  ;;  %v14601_v1 = vld [vmem:[#allocation2 + $0x131] sm:$0xff] }
 0x565   : > { %10790 = vmatprep.mubr.f32.mxu1 %v14586_v20  ;;  %15500 = vst [vmem:[#allocation85_spill] sm:$0xff] %v14601_v1  ;;  %v14604_v20 = vld [vmem:[#allocation2 + $0x139] sm:$0xff] }
 0x566   : > { %15501 = vst [vmem:[#allocation86_spill] sm:$0xff] %v14604_v20 }
 0x568   : > { %10791 = vmatmul.mubr.f32.gmra.mrb[30].mxu1 %v14589_v22  ;;  %v14607_v22 = vld [vmem:[#allocation2 + $0x141] sm:$0xff] }
 0x569   : > { %10793 = vmatprep.mubr.f32.mxu1 %v14592_v16  ;;  %15502 = vst [vmem:[#allocation87_spill] sm:$0xff] %v14607_v22  ;;  %v14610_v16 = vld [vmem:[#allocation2 + $0x149] sm:$0xff] }
 0x56a   : > { %15503 = vst [vmem:[#allocation88_spill] sm:$0xff] %v14610_v16 }
 0x56c   : > { %10794 = vmatmul.mubr.f32.gmra.mrb[32].mxu1 %v14595_v49  ;;  %v14613_v49 = vld [vmem:[#allocation2 + $0x151] sm:$0xff] }
 0x56d   : > { %10796 = vmatprep.mubr.f32.mxu1 %v14598_v34  ;;  %15504 = vst [vmem:[#allocation89_spill] sm:$0xff] %v14613_v49  ;;  %v14616_v34 = vld [vmem:[#allocation2 + $0x159] sm:$0xff] }
 0x56e   : > { %15505 = vst [vmem:[#allocation90_spill] sm:$0xff] %v14616_v34 }
 0x570   : > { %10797 = vmatmul.mubr.f32.gmra.mrb[34].mxu1 %v14601_v1  ;;  %v14619_v1 = vld [vmem:[#allocation2 + $0x161] sm:$0xff] }
 0x571   : > { %10799 = vmatprep.mubr.f32.mxu1 %v14604_v20  ;;  %15506 = vst [vmem:[#allocation91_spill] sm:$0xff] %v14619_v1  ;;  %v14622_v20 = vld [vmem:[#allocation2 + $0x169] sm:$0xff] }
 0x572   : > { %15507 = vst [vmem:[#allocation92_spill] sm:$0xff] %v14622_v20 }
 0x574   : > { %10800 = vmatmul.mubr.f32.gmra.mrb[36].mxu1 %v14607_v22  ;;  %v14625_v22 = vld [vmem:[#allocation2 + $0x171] sm:$0xff] }
 0x575   : > { %10802 = vmatprep.mubr.f32.mxu1 %v14610_v16  ;;  %15508 = vst [vmem:[#allocation93_spill] sm:$0xff] %v14625_v22  ;;  %v14628_v16 = vld [vmem:[#allocation2 + $0x179] sm:$0xff] }
 0x576   : > { %15509 = vst [vmem:[#allocation94_spill] sm:$0xff] %v14628_v16 }
 0x578   : > { %10803 = vmatmul.mubr.f32.gmra.mrb[38].mxu1 %v14613_v49  ;;  %v14631_v49 = vld [vmem:[#allocation2 + $0x181] sm:$0xff] }
 0x579   : > { %10805 = vmatprep.mubr.f32.mxu1 %v14616_v34  ;;  %15510 = vst [vmem:[#allocation95_spill] sm:$0xff] %v14631_v49  ;;  %v14634_v34 = vld [vmem:[#allocation2 + $0x189] sm:$0xff] }
 0x57a   : > { %15511 = vst [vmem:[#allocation96_spill] sm:$0xff] %v14634_v34 }
 0x57c   : > { %10806 = vmatmul.mubr.f32.gmra.mrb[40].mxu1 %v14619_v1  ;;  %v14637_v1 = vld [vmem:[#allocation2 + $0x191] sm:$0xff] }
 0x57d   : > { %10808 = vmatprep.mubr.f32.mxu1 %v14622_v20  ;;  %v5999_v20 = vld [vmem:[#allocation8 + $0x218] sm:$0xff] }
 0x580   : > { %10809 = vmatmul.mubr.f32.gmra.mrb[42].mxu1 %v14625_v22  ;;  %v11861_v22 = vpack.c.bf16 %v5999_v20, %v5998_v43  ;;  %v6004_v43 = vld [vmem:[#allocation8 + $0x240] sm:$0xff]  ;;  %v6005_v20 = vld [vmem:[#allocation8 + $0x248] sm:$0xff] }
 0x581   : > { %10811 = vmatprep.mubr.f32.mxu1 %v14628_v16  ;;  %v6003_v16 = vld [vmem:[#allocation8 + $0x238] sm:$0xff] }
 0x584   : > { %10812 = vmatmul.mubr.f32.gmra.mrb[44].mxu1 %v14631_v49  ;;  %v11865_v49 = vpack.c.bf16 %v6001_v3, %v6000_v57  ;;  %v6007_v3 = vld [vmem:[#allocation8 + $0x258] sm:$0xff] }
 0x585   : > { %10814 = vmatprep.mubr.f32.mxu1 %v14634_v34  ;;  %v6002_v34 = vld [vmem:[#allocation8 + $0x230] sm:$0xff]  ;;  %v6011_v57 = vld [vmem:[#allocation8 + $0x278] sm:$0xff] }
 0x588   : > { %10815 = vmatmul.mubr.f32.gmra.mrb[46].mxu1 %v14637_v1 }
 0x589   : > { %10849 = vmatprep.mubr.f32.mxu1 %v14363_v11  ;;  %v11869_v11 = vpack.c.bf16 %v6003_v16, %v6002_v34  ;;  %v14722_v16 = vld [vmem:[#allocation2 + $0x90] sm:$0xff]  ;;  %v14725_v34 = vld [vmem:[#allocation2 + $0x98] sm:$0xff] }
 0x58c   : > { %10850 = vmatmul.mubr.f32.vlgmr.msra.gmra.mrb[0].mxu1 %v14366_v12  ;;  %v11873_v12 = vpack.c.bf16 %v6005_v20, %v6004_v43  ;;  %v6833_v43 = vld [vmem:[#allocation8 + $0x308] sm:$0xff]  ;;  %v14728_v20 = vld [vmem:[#allocation2 + $0xa0] sm:$0xff] }
 0x58d   : > { %10852 = vmatprep.mubr.f32.mxu1 %v14369_v6  ;;  %11860 = vmatpush3.bf16.msra.mxu1 %v14538_v28  ;;  %v6006_v6 = vld [vmem:[#allocation8 + $0x250] sm:$0xff]  ;;  %v6009_v28 = vld [vmem:[#allocation8 + $0x268] sm:$0xff] }
 0x58e   : > { %11862 = vmatprep.subr.bf16.mxu1 %v11861_v22 }
 0x590   : > { %10853 = vmatmul.mubr.f32.gmra.mrb[2].mxu1 %v14372_v17  ;;  %v11877_v17 = vpack.c.bf16 %v6007_v3, %v6006_v6  ;;  %v14733_v6 = vld [vmem:[#allocation2 + $0xa8] sm:$0xff]  ;;  %v14736_v3 = vld [vmem:[#allocation2 + $0xb0] sm:$0xff] }
 0x591   : > { %10855 = vmatprep.mubr.f32.mxu1 %v14375_v5  ;;  %11864 = vmatpush3.bf16.msra.mxu1 %v11861_v22  ;;  %v6008_v5 = vld [vmem:[#allocation8 + $0x260] sm:$0xff]  ;;  %v6415_v22 = vld [vmem:[#allocation8 + $0x288] sm:$0xff] }
 0x592   : > { %11866 = vmatprep.subr.bf16.mxu1 %v11865_v49 }
 0x594   : > { %10856 = vmatmul.mubr.f32.gmra.mrb[4].mxu1 %v14378_v45  ;;  %v11881_v45 = vpack.c.bf16 %v6009_v28, %v6008_v5  ;;  %v14743_v5 = vld [vmem:[#allocation2 + $0xc0] sm:$0xff]  ;;  %v14746_v28 = vld [vmem:[#allocation2 + $0xc8] sm:$0xff] }
 0x595   : > { %10858 = vmatprep.mubr.f32.mxu1 %v14381_v40  ;;  %11868 = vmatpush3.bf16.msra.mxu1 %v11865_v49  ;;  %v6010_v40 = vld [vmem:[#allocation8 + $0x270] sm:$0xff] }
 0x596   : > { %11870 = vmatprep.subr.bf16.mxu1 %v11869_v11 }
 0x598   : > { %10859 = vmatmul.mubr.f32.gmra.mrb[6].mxu1 %v14384_v50  ;;  %v11885_v50 = vpack.c.bf16 %v6011_v57, %v6010_v40  ;;  %v14752_v40 = vld [vmem:[#allocation2 + $0xd8] sm:$0xff]  ;;  %v14755_v57 = vld [vmem:[#allocation2 + $0xe0] sm:$0xff] }
 0x599   : > { %10861 = vmatprep.mubr.f32.mxu1 %v14387_v29  ;;  %11872 = vmatpush3.bf16.msra.mxu1 %v11869_v11  ;;  %v6414_v29 = vld [vmem:[#allocation8 + $0x280] sm:$0xff] }
 0x59a   : > { %11874 = vmatprep.subr.bf16.mxu1 %v11873_v12  ;;  %v6832_v11 = vld [vmem:[#allocation8 + $0x300] sm:$0xff] }
 0x59c   : > { %10862 = vmatmul.mubr.f32.gmra.mrb[8].mxu1 %v14390_v19  ;;  %v11889_v19 = vpack.c.bf16 %v6415_v22, %v6414_v29  ;;  %v14761_v29 = vld [vmem:[#allocation2 + $0xf0] sm:$0xff]  ;;  %v14764_v22 = vld [vmem:[#allocation2 + $0xf8] sm:$0xff] }
 0x59d   : > { %10864 = vmatprep.mubr.f32.mxu1 %v14393_v33  ;;  %11876 = vmatpush3.bf16.msra.mxu1 %v11873_v12  ;;  %v14686_v33 = vld [vmem:[#allocation2 + $0x197] sm:$0xff]  ;;  %v14731_v12 = vpack.c.bf16 %v6833_v43, %v6832_v11  ;;  %v6836_v11 = vld [vmem:[#allocation8 + $0x320] sm:$0xff]  ;;  %v6837_v43 = vld [vmem:[#allocation8 + $0x328] sm:$0xff] }
 0x59e   : > { %11878 = vmatprep.subr.bf16.mxu1 %v11877_v17 }
 0x5a0   : > { %10865 = vmatmul.mubr.f32.gmra.mrb[10].mxu1 %v14396_v23  ;;  %v14689_v23 = vld [vmem:[#allocation2 + $0x19f] sm:$0xff] }
 0x5a1   : > { %10867 = vmatprep.mubr.f32.mxu1 %v14401_v30  ;;  %11880 = vmatpush3.bf16.msra.mxu1 %v11877_v17  ;;  %v14692_v30 = vld [vmem:[#allocation2 + $0x1a7] sm:$0xff]  ;;  %v14740_v17 = vld [vmem:[#allocation2 + $0xb8] sm:$0xff] }
 0x5a2   : > { %11882 = vmatprep.subr.bf16.mxu1 %v11881_v45 }
 0x5a4   : > { %10868 = vmatmul.mubr.f32.gmra.mrb[12].mxu1 %v14404_v27  ;;  %v6416_v27 = vld [vmem:[#allocation8 + $0x290] sm:$0xff] }
 0x5a5   : > { %10870 = vmatprep.mubr.f32.mxu1 %v14408_v58  ;;  %11884 = vmatpush3.bf16.msra.mxu1 %v11881_v45  ;;  %v6417_v58 = vld [vmem:[#allocation8 + $0x298] sm:$0xff]  ;;  %v14749_v45 = vld [vmem:[#allocation2 + $0xd0] sm:$0xff] }
 0x5a6   : > { %11886 = vmatprep.subr.bf16.mxu1 %v11885_v50 }
 0x5a8   : > { %10871 = vmatmul.mubr.f32.gmra.mrb[14].mxu1 %v14411_v9  ;;  %v5947_v9 = vld [vmem:[#allocation2 + $0x30] sm:$0xff] }
 0x5a9   : > { %10873 = vmatprep.mubr.f32.mxu1 %v14414_v10  ;;  %11888 = vmatpush3.bf16.msra.mxu1 %v11885_v50  ;;  %v11893_v10 = vpack.c.bf16 %v6417_v58, %v6416_v27  ;;  %v14758_v50 = vld [vmem:[#allocation2 + $0xe8] sm:$0xff]  ;;  %v14773_v58 = vld [vmem:[#allocation2 + $0x110] sm:$0xff] }
 0x5aa   : > { %11890 = vmatprep.subr.bf16.mxu1 %v11889_v19  ;;  %v14770_v27 = vld [vmem:[#allocation2 + $0x108] sm:$0xff] }
 0x5ac   : > { %10874 = vmatmul.mubr.f32.gmra.mrb[16].mxu1 %v14417_v24  ;;  %v5948_v24 = vld [vmem:[#allocation2 + $0x38] sm:$0xff] }
 0x5ad   : > { %10876 = vmatprep.mubr.f32.mxu1 %v14420_v15  ;;  %v6418_v15 = vld [vmem:[#allocation8 + $0x2a0] sm:$0xff] }
 0x5b0   : > { %10877 = vmatmul.mubr.f32.gmra.mrb[18].mxu1 %v14423_v32  ;;  %v6419_v32 = vld [vmem:[#allocation8 + $0x2a8] sm:$0xff] }
 0x5b1   : > { %10879 = vmatprep.mubr.f32.mxu1 %v14426_v47  ;;  %v5949_v47 = vld [vmem:[#allocation2 + $0x40] sm:$0xff] }
 0x5b4   : > { %10880 = vmatmul.mubr.f32.gmra.mrb[20].mxu1 %v14429_v7  ;;  %v11897_v7 = vpack.c.bf16 %v6419_v32, %v6418_v15  ;;  %v14785_v15 = vld [vmem:[#allocation2 + $0x130] sm:$0xff]  ;;  %v14788_v32 = vld [vmem:[#allocation2 + $0x138] sm:$0xff] }
 0x5b5   : > { %10882 = vmatprep.mubr.f32.mxu1 %v14432_v18  ;;  %v14695_v18 = vld [vmem:[#allocation2 + $0x48] sm:$0xff] }
 0x5b8   : > { %10883 = vmatmul.mubr.f32.gmra.mrb[22].mxu1 %v14435_v48  ;;  %v6420_v48 = vld [vmem:[#allocation8 + $0x2b0] sm:$0xff] }
 0x5b9   : > { %10885 = vmatprep.mubr.f32.mxu1 %v14438_v4  ;;  %v6421_v4 = vld [vmem:[#allocation8 + $0x2b8] sm:$0xff] }
 0x5bc   : > { %10886 = vmatmul.mubr.f32.gmra.mrb[24].mxu1 %v14441_v14  ;;  %v14698_v14 = vld [vmem:[#allocation2 + $0x50] sm:$0xff] }
 0x5bd   : > { %10888 = vmatprep.mubr.f32.mxu1 %v14444_v21  ;;  %v11901_v21 = vpack.c.bf16 %v6421_v4, %v6420_v48  ;;  %v14797_v48 = vld [vmem:[#allocation2 + $0x150] sm:$0xff]  ;;  %v14800_v4 = vld [vmem:[#allocation2 + $0x158] sm:$0xff] }
 0x5c0   : > { %10889 = vmatmul.mubr.f32.gmra.mrb[26].mxu1 %v14447_v8  ;;  %v14701_v8 = vld [vmem:[#allocation2 + $0x58] sm:$0xff] }
 0x5c1   : > { %10891 = vmatprep.mubr.f32.mxu1 %v14450_v41  ;;  %v6422_v41 = vld [vmem:[#allocation8 + $0x2c0] sm:$0xff] }
 0x5c4   : > { %10892 = vmatmul.mubr.f32.gmra.mrb[28].mxu1 %v14453_v38  ;;  %v6423_v38 = vld [vmem:[#allocation8 + $0x2c8] sm:$0xff] }
 0x5c5   : > { %10894 = vmatprep.mubr.f32.mxu1 %v14456_v36  ;;  %v14704_v36 = vld [vmem:[#allocation2 + $0x60] sm:$0xff] }
 0x5c8   : > { %10895 = vmatmul.mubr.f32.gmra.mrb[30].mxu1 %v14459_v37  ;;  %v11905_v37 = vpack.c.bf16 %v6423_v38, %v6422_v41  ;;  %v14806_v41 = vld [vmem:[#allocation2 + $0x168] sm:$0xff]  ;;  %v14809_v38 = vld [vmem:[#allocation2 + $0x170] sm:$0xff] }
 0x5c9   : > { %10897 = vmatprep.mubr.f32.mxu1 %v14462_v39  ;;  %v14707_v39 = vld [vmem:[#allocation2 + $0x68] sm:$0xff] }
 0x5cc   : > { %10898 = vmatmul.mubr.f32.gmra.mrb[32].mxu1 %v14465_v31  ;;  %v6424_v31 = vld [vmem:[#allocation8 + $0x2d0] sm:$0xff] }
 0x5cd   : > { %10900 = vmatprep.mubr.f32.mxu1 %v14468_v42  ;;  %v6425_v42 = vld [vmem:[#allocation8 + $0x2d8] sm:$0xff] }
 0x5d0   : > { %10901 = vmatmul.mubr.f32.gmra.mrb[34].mxu1 %v14471_v44  ;;  %v14710_v44 = vld [vmem:[#allocation2 + $0x70] sm:$0xff] }
 0x5d1   : > { %10903 = vmatprep.mubr.f32.mxu1 %v14474_v51  ;;  %v11909_v51 = vpack.c.bf16 %v6425_v42, %v6424_v31  ;;  %v14815_v31 = vld [vmem:[#allocation2 + $0x180] sm:$0xff]  ;;  %v14818_v42 = vld [vmem:[#allocation2 + $0x188] sm:$0xff] }
 0x5d4   : > { %10904 = vmatmul.mubr.f32.gmra.mrb[36].mxu1 %v14477_v52  ;;  %v14713_v52 = vld [vmem:[#allocation2 + $0x78] sm:$0xff] }
 0x5d5   : > { %10906 = vmatprep.mubr.f32.mxu1 %v14480_v26  ;;  %v6426_v26 = vld [vmem:[#allocation8 + $0x2e0] sm:$0xff] }
 0x5d8   : > { %10907 = vmatmul.mubr.f32.gmra.mrb[38].mxu1 %v14483_v25  ;;  %v6427_v25 = vld [vmem:[#allocation8 + $0x2e8] sm:$0xff] }
 0x5d9   : > { %10909 = vmatprep.mubr.f32.mxu1 %v14486_v53  ;;  %v14716_v53 = vld [vmem:[#allocation2 + $0x80] sm:$0xff] }
 0x5dc   : > { %10910 = vmatmul.mubr.f32.gmra.mrb[40].mxu1 %v14489_v59  ;;  %v11913_v59 = vpack.c.bf16 %v6427_v25, %v6426_v26  ;;  %v14824_v26 = vld [vmem:[#allocation2 + $0x198] sm:$0xff]  ;;  %v14827_v25 = vld [vmem:[#allocation2 + $0x1a0] sm:$0xff] }
 0x5dd   : > { %10912 = vmatprep.mubr.f32.mxu1 %v14492_v60  ;;  %v14719_v60 = vld [vmem:[#allocation2 + $0x88] sm:$0xff]  ;;  %15513 = vst [vmem:[#allocation98_spill] sm:$0xff] %v14824_v26  ;;  %15514 = vst [vmem:[#allocation59_spill] sm:$0xff] %v14827_v25 }
 0x5e0   : > { %10913 = vmatmul.mubr.f32.gmra.mrb[42].mxu1 %v14495_v62  ;;  %v6428_v62 = vld [vmem:[#allocation8 + $0x2f0] sm:$0xff] }
 0x5e1   : > { %10915 = vmatprep.mubr.f32.mxu1 %v14498_v35  ;;  %v6429_v35 = vld [vmem:[#allocation8 + $0x2f8] sm:$0xff] }
 0x5e2   : > { %v11917_v49 = vpack.c.bf16 %v6429_v35, %v6428_v62  ;;  %v6834_v62 = vld [vmem:[#allocation8 + $0x310] sm:$0xff]  ;;  %v6835_v35 = vld [vmem:[#allocation8 + $0x318] sm:$0xff] }
 0x5e4   : > { %10916 = vmatmul.mubr.f32.gmra.mrb[44].mxu1 %v14686_v33 }
 0x5e5   : > { %10918 = vmatprep.mubr.f32.mxu1 %v14689_v23 }
 0x5e8   : > { %10919 = vmatmul.mubr.f32.gmra.mrb[46].mxu1 %v14692_v30 }
 0x5e9   : > { %10953 = vmatprep.mubr.f32.mxu1 %v5947_v9  ;;  %v14776_v9 = vld [vmem:[#allocation2 + $0x118] sm:$0xff] }
 0x5ec   : > { %10954 = vmatmul.mubr.f32.vlgmr.msra.gmra.mrb[0].mxu1 %v5948_v24  ;;  %v14782_v24 = vld [vmem:[#allocation2 + $0x128] sm:$0xff] }
 0x5ed   : > { %10956 = vmatprep.mubr.f32.mxu1 %v5949_v47  ;;  %11892 = vmatpush3.bf16.msra.mxu1 %v11889_v19  ;;  %v14767_v19 = vld [vmem:[#allocation2 + $0x100] sm:$0xff] }
 0x5ee   : > { %11894 = vmatprep.subr.bf16.mxu1 %v11893_v10  ;;  %v14791_v47 = vld [vmem:[#allocation2 + $0x140] sm:$0xff] }
 0x5f0   : > { %10957 = vmatmul.mubr.f32.gmra.mrb[2].mxu1 %v14695_v18 }
 0x5f1   : > { %10959 = vmatprep.mubr.f32.mxu1 %v14698_v14  ;;  %11896 = vmatpush3.bf16.msra.mxu1 %v11893_v10  ;;  %v14779_v10 = vld [vmem:[#allocation2 + $0x120] sm:$0xff] }
 0x5f2   : > { %11898 = vmatprep.subr.bf16.mxu1 %v11897_v7 }
 0x5f4   : > { %10960 = vmatmul.mubr.f32.gmra.mrb[4].mxu1 %v14701_v8 }
 0x5f5   : > { %10962 = vmatprep.mubr.f32.mxu1 %v14704_v36  ;;  %11900 = vmatpush3.bf16.msra.mxu1 %v11897_v7  ;;  %v14794_v7 = vld [vmem:[#allocation2 + $0x148] sm:$0xff] }
 0x5f6   : > { %11902 = vmatprep.subr.bf16.mxu1 %v11901_v21 }
 0x5f8   : > { %10963 = vmatmul.mubr.f32.gmra.mrb[6].mxu1 %v14707_v39 }
 0x5f9   : > { %10965 = vmatprep.mubr.f32.mxu1 %v14710_v44  ;;  %11904 = vmatpush3.bf16.msra.mxu1 %v11901_v21  ;;  %v14803_v21 = vld [vmem:[#allocation2 + $0x160] sm:$0xff] }
 0x5fa   : > { %11906 = vmatprep.subr.bf16.mxu1 %v11905_v37 }
 0x5fc   : > { %10966 = vmatmul.mubr.f32.gmra.mrb[8].mxu1 %v14713_v52 }
 0x5fd   : > { %10968 = vmatprep.mubr.f32.mxu1 %v14716_v53  ;;  %11908 = vmatpush3.bf16.msra.mxu1 %v11905_v37  ;;  %v14812_v37 = vld [vmem:[#allocation2 + $0x178] sm:$0xff] }
 0x5fe   : > { %11910 = vmatprep.subr.bf16.mxu1 %v11909_v51 }
 0x600   : > { %10969 = vmatmul.mubr.f32.gmra.mrb[10].mxu1 %v14719_v60 }
 0x601   : > { %10971 = vmatprep.mubr.f32.mxu1 %v14722_v16  ;;  %11912 = vmatpush3.bf16.msra.mxu1 %v11909_v51  ;;  %v14821_v51 = vld [vmem:[#allocation2 + $0x190] sm:$0xff] }
 0x602   : > { %11914 = vmatprep.subr.bf16.mxu1 %v11913_v59  ;;  %15512 = vst [vmem:[#allocation97_spill] sm:$0xff] %v14821_v51 }
 0x604   : > { %10972 = vmatmul.mubr.f32.gmra.mrb[12].mxu1 %v14725_v34 }
 0x605   : > { %10974 = vmatprep.mubr.f32.mxu1 %v14728_v20  ;;  %11916 = vmatpush3.bf16.msra.mxu1 %v11913_v59  ;;  %v14830_v59 = vld [vmem:[#allocation2 + $0x1a8] sm:$0xff] }
 0x606   : > { %11918 = vmatprep.subr.bf16.mxu1 %v11917_v49 }
 0x608   : > { %10975 = vmatmul.mubr.f32.gmra.mrb[14].mxu1 %v14733_v6 }
 0x609   : > { %10977 = vmatprep.mubr.f32.mxu1 %v14736_v3  ;;  %11920 = vmatpush3.bf16.msra.mxu1 %v11917_v49  ;;  %v11925_v49 = vpack.c.bf16 %v6835_v35, %v6834_v62  ;;  %v6840_v62 = vld [vmem:[#allocation8 + $0x340] sm:$0xff]  ;;  %v6841_v35 = vld [vmem:[#allocation8 + $0x348] sm:$0xff] }
 0x60a   : > { %11922 = vmatprep.subr.bf16.mxu1 %v14731_v12 }
 0x60c   : > { %10978 = vmatmul.mubr.f32.gmra.mrb[16].mxu1 %v14740_v17 }
 0x60d   : > { %10980 = vmatprep.mubr.f32.mxu1 %v14743_v5 }
 0x610   : > { %10981 = vmatmul.mubr.f32.gmra.mrb[18].mxu1 %v14746_v28 }
 0x611   : > { %10983 = vmatprep.mubr.f32.mxu1 %v14749_v45 }
 0x614   : > { %10984 = vmatmul.mubr.f32.gmra.mrb[20].mxu1 %v14752_v40 }
 0x615   : > { %10986 = vmatprep.mubr.f32.mxu1 %v14755_v57 }
 0x618   : > { %10987 = vmatmul.mubr.f32.gmra.mrb[22].mxu1 %v14758_v50 }
 0x619   : > { %10989 = vmatprep.mubr.f32.mxu1 %v14761_v29 }
 0x61c   : > { %10990 = vmatmul.mubr.f32.gmra.mrb[24].mxu1 %v14764_v22 }
 0x61d   : > { %10992 = vmatprep.mubr.f32.mxu1 %v14767_v19 }
 0x620   : > { %10993 = vmatmul.mubr.f32.gmra.mrb[26].mxu1 %v14770_v27 }
 0x621   : > { %10995 = vmatprep.mubr.f32.mxu1 %v14773_v58 }
 0x624   : > { %10996 = vmatmul.mubr.f32.gmra.mrb[28].mxu1 %v14776_v9 }
 0x625   : > { %10998 = vmatprep.mubr.f32.mxu1 %v14779_v10 }
 0x628   : > { %10999 = vmatmul.mubr.f32.gmra.mrb[30].mxu1 %v14782_v24 }
 0x629   : > { %11001 = vmatprep.mubr.f32.mxu1 %v14785_v15 }
 0x62c   : > { %11002 = vmatmul.mubr.f32.gmra.mrb[32].mxu1 %v14788_v32 }
 0x62d   : > { %11004 = vmatprep.mubr.f32.mxu1 %v14791_v47 }
 0x630   : > { %11005 = vmatmul.mubr.f32.gmra.mrb[34].mxu1 %v14794_v7 }
 0x631   : > { %11007 = vmatprep.mubr.f32.mxu1 %v14797_v48 }
 0x634   : > { %11008 = vmatmul.mubr.f32.gmra.mrb[36].mxu1 %v14800_v4 }
 0x635   : > { %11010 = vmatprep.mubr.f32.mxu1 %v14803_v21 }
 0x638   : > { %11011 = vmatmul.mubr.f32.gmra.mrb[38].mxu1 %v14806_v41 }
 0x639   : > { %11013 = vmatprep.mubr.f32.mxu1 %v14809_v38 }
 0x63c   : > { %11014 = vmatmul.mubr.f32.gmra.mrb[40].mxu1 %v14812_v37 }
 0x63d   : > { %11016 = vmatprep.mubr.f32.mxu1 %v14815_v31 }
 0x640   : > { %11017 = vmatmul.mubr.f32.gmra.mrb[42].mxu1 %v14818_v42 }
 0x641   : > { %11019 = vmatprep.mubr.f32.mxu1 %v14821_v51  ;;  %v6839_v51 = vld [vmem:[#allocation8 + $0x338] sm:$0xff] }
 0x644   : > { %11020 = vmatmul.mubr.f32.gmra.mrb[44].mxu1 %v14824_v26  ;;  %v11929_v26 = vpack.c.bf16 %v6837_v43, %v6836_v11  ;;  %v6843_v11 = vld [vmem:[#allocation8 + $0x358] sm:$0xff]  ;;  %v15516_v43 = vld [vmem:[#allocation61_spill] sm:$0xff] }
 0x645   : > { %11022 = vmatprep.mubr.f32.mxu1 %v14827_v25  ;;  %v6838_v25 = vld [vmem:[#allocation8 + $0x330] sm:$0xff] }
 0x648   : > { %11023 = vmatmul.mubr.f32.gmra.mrb[46].mxu1 %v14830_v59 }
 0x649   : > { %11057 = vmatprep.mubr.f32.mxu1 %v14502_v46  ;;  %v11933_v46 = vpack.c.bf16 %v6839_v51, %v6838_v25  ;;  %v6845_v51 = vld [vmem:[#allocation8 + $0x368] sm:$0xff]  ;;  %v6847_v25 = vld [vmem:[#allocation8 + $0x378] sm:$0xff] }
 0x64c   : > { %11058 = vmatmul.mubr.f32.vlgmr.msra.gmra.mrb[0].mxu1 %v14505_v54  ;;  %v15515_v54 = vld [vmem:[#allocation60_spill] sm:$0xff] }
 0x64d   : > { %11060 = vmatprep.mubr.f32.mxu1 %v14508_v63  ;;  %11924 = vmatpush3.bf16.msra.mxu1 %v14731_v12  ;;  %v11937_v63 = vpack.c.bf16 %v6841_v35, %v6840_v62  ;;  %v6842_v12 = vld [vmem:[#allocation8 + $0x350] sm:$0xff]  ;;  %v7251_v35 = vld [vmem:[#allocation8 + $0x388] sm:$0xff] }
 0x64e   : > { %11926 = vmatprep.subr.bf16.mxu1 %v11925_v49  ;;  %v15518_v62 = vld [vmem:[#allocation63_spill] sm:$0xff] }
 0x650   : > { %11061 = vmatmul.mubr.f32.gmra.mrb[2].mxu1 %v14511_v56  ;;  %v11941_v56 = vpack.c.bf16 %v6843_v11, %v6842_v12  ;;  %v15520_v12 = vld [vmem:[#allocation65_spill] sm:$0xff]  ;;  %v15523_v11 = vld [vmem:[#allocation68_spill] sm:$0xff] }
 0x651   : > { %11063 = vmatprep.mubr.f32.mxu1 %v14514_v2  ;;  %11928 = vmatpush3.bf16.msra.mxu1 %v11925_v49  ;;  %v6844_v2 = vld [vmem:[#allocation8 + $0x360] sm:$0xff]  ;;  %v15517_v49 = vld [vmem:[#allocation62_spill] sm:$0xff] }
 0x652   : > { %11930 = vmatprep.subr.bf16.mxu1 %v11929_v26 }
 0x654   : > { %11064 = vmatmul.mubr.f32.gmra.mrb[4].mxu1 %v14517_v61  ;;  %v11945_v61 = vpack.c.bf16 %v6845_v51, %v6844_v2  ;;  %v15526_v2 = vld [vmem:[#allocation71_spill] sm:$0xff]  ;;  %v15527_v51 = vld [vmem:[#allocation72_spill] sm:$0xff] }
 0x655   : > { %11066 = vmatprep.mubr.f32.mxu1 %v15515_v54  ;;  %11932 = vmatpush3.bf16.msra.mxu1 %v11929_v26  ;;  %v6846_v26 = vld [vmem:[#allocation8 + $0x370] sm:$0xff]  ;;  %v15519_v54 = vld [vmem:[#allocation64_spill] sm:$0xff] }
 0x656   : > { %11934 = vmatprep.subr.bf16.mxu1 %v11933_v46 }
 0x658   : > { %11067 = vmatmul.mubr.f32.gmra.mrb[6].mxu1 %v15516_v43  ;;  %v15524_v43 = vld [vmem:[#allocation69_spill] sm:$0xff] }
 0x659   : > { %11069 = vmatprep.mubr.f32.mxu1 %v14526_v13  ;;  %11936 = vmatpush3.bf16.msra.mxu1 %v11933_v46  ;;  %v11949_v13 = vpack.c.bf16 %v6847_v25, %v6846_v26  ;;  %v7250_v46 = vld [vmem:[#allocation8 + $0x380] sm:$0xff]  ;;  %v15530_v25 = vld [vmem:[#allocation75_spill] sm:$0xff] }
 0x65a   : > { %11938 = vmatprep.subr.bf16.mxu1 %v11937_v63  ;;  %v15528_v26 = vld [vmem:[#allocation73_spill] sm:$0xff] }
 0x65c   : > { %11070 = vmatmul.mubr.f32.gmra.mrb[8].mxu1 %v14529_v55  ;;  %v11953_v55 = vpack.c.bf16 %v7251_v35, %v7250_v46  ;;  %v15534_v46 = vld [vmem:[#allocation81_spill] sm:$0xff]  ;;  %v15535_v35 = vld [vmem:[#allocation82_spill] sm:$0xff] }
 0x65d   : > { %11072 = vmatprep.mubr.f32.mxu1 %v14532_v0  ;;  %11940 = vmatpush3.bf16.msra.mxu1 %v11937_v63  ;;  %v15521_v0 = vld [vmem:[#allocation66_spill] sm:$0xff]  ;;  %v15522_v63 = vld [vmem:[#allocation67_spill] sm:$0xff] }
 0x65e   : > { %11942 = vmatprep.subr.bf16.mxu1 %v11941_v56 }
 0x660   : > { %11073 = vmatmul.mubr.f32.gmra.mrb[10].mxu1 %v15517_v49  ;;  %v15531_v49 = vld [vmem:[#allocation76_spill] sm:$0xff] }
 0x661   : > { %11075 = vmatprep.mubr.f32.mxu1 %v15518_v62  ;;  %11944 = vmatpush3.bf16.msra.mxu1 %v11941_v56  ;;  %v15525_v56 = vld [vmem:[#allocation70_spill] sm:$0xff]  ;;  %v15532_v62 = vld [vmem:[#allocation77_spill] sm:$0xff] }
 0x662   : > { %11946 = vmatprep.subr.bf16.mxu1 %v11945_v61 }
 0x664   : > { %11076 = vmatmul.mubr.f32.gmra.mrb[12].mxu1 %v15519_v54  ;;  %v15536_v54 = vld [vmem:[#allocation83_spill] sm:$0xff] }
 0x665   : > { %11078 = vmatprep.mubr.f32.mxu1 %v15520_v12  ;;  %11948 = vmatpush3.bf16.msra.mxu1 %v11945_v61  ;;  %v15529_v61 = vld [vmem:[#allocation74_spill] sm:$0xff]  ;;  %v15537_v12 = vld [vmem:[#allocation84_spill] sm:$0xff] }
 0x666   : > { %11950 = vmatprep.subr.bf16.mxu1 %v11949_v13 }
 0x668   : > { %11079 = vmatmul.mubr.f32.gmra.mrb[14].mxu1 %v15521_v0  ;;  %v15538_v0 = vld [vmem:[#allocation85_spill] sm:$0xff] }
 0x669   : > { %11081 = vmatprep.mubr.f32.mxu1 %v15522_v63  ;;  %11952 = vmatpush3.bf16.msra.mxu1 %v11949_v13  ;;  %v15533_v13 = vld [vmem:[#allocation78_spill] sm:$0xff] }
 0x66a   : > { %11954 = vmatprep.subr.bf16.mxu1 %v11953_v55  ;;  %v15539_v63 = vld [vmem:[#allocation86_spill] sm:$0xff] }
 0x66c   : > { %11082 = vmatmul.mubr.f32.gmra.mrb[16].mxu1 %v15523_v11  ;;  %v15540_v11 = vld [vmem:[#allocation87_spill] sm:$0xff] }
 0x66d   : > { %11084 = vmatprep.mubr.f32.mxu1 %v15524_v43  ;;  %v15541_v43 = vld [vmem:[#allocation88_spill] sm:$0xff] }
 0x670   : > { %11085 = vmatmul.mubr.f32.gmra.mrb[18].mxu1 %v15525_v56  ;;  %v15542_v56 = vld [vmem:[#allocation89_spill] sm:$0xff] }
 0x671   : > { %11087 = vmatprep.mubr.f32.mxu1 %v15526_v2  ;;  %v15543_v2 = vld [vmem:[#allocation90_spill] sm:$0xff] }
 0x674   : > { %11088 = vmatmul.mubr.f32.gmra.mrb[20].mxu1 %v15527_v51  ;;  %v15544_v51 = vld [vmem:[#allocation91_spill] sm:$0xff] }
 0x675   : > { %11090 = vmatprep.mubr.f32.mxu1 %v15528_v26  ;;  %v15545_v26 = vld [vmem:[#allocation92_spill] sm:$0xff] }
 0x678   : > { %11091 = vmatmul.mubr.f32.gmra.mrb[22].mxu1 %v15529_v61  ;;  %v15546_v61 = vld [vmem:[#allocation93_spill] sm:$0xff] }
 0x679   : > { %11093 = vmatprep.mubr.f32.mxu1 %v15530_v25  ;;  %v15547_v25 = vld [vmem:[#allocation94_spill] sm:$0xff] }
 0x67c   : > { %11094 = vmatmul.mubr.f32.gmra.mrb[24].mxu1 %v15531_v49  ;;  %v15548_v49 = vld [vmem:[#allocation95_spill] sm:$0xff] }
 0x67d   : > { %11096 = vmatprep.mubr.f32.mxu1 %v15532_v62  ;;  %v15549_v62 = vld [vmem:[#allocation96_spill] sm:$0xff] }
 0x680   : > { %11097 = vmatmul.mubr.f32.gmra.mrb[26].mxu1 %v15533_v13  ;;  %v14879_v13 = vld [vmem:[#allocation2 + $0x199] sm:$0xff] }
 0x681   : > { %11099 = vmatprep.mubr.f32.mxu1 %v15534_v46  ;;  %v14882_v46 = vld [vmem:[#allocation2 + $0x1a1] sm:$0xff] }
 0x684   : > { %11100 = vmatmul.mubr.f32.gmra.mrb[28].mxu1 %v15535_v35  ;;  %v14885_v35 = vld [vmem:[#allocation2 + $0x1a9] sm:$0xff] }
 0x685   : > { %11102 = vmatprep.mubr.f32.mxu1 %v15536_v54  ;;  %v7252_v54 = vld [vmem:[#allocation8 + $0x390] sm:$0xff] }
 0x688   : > { %11103 = vmatmul.mubr.f32.gmra.mrb[30].mxu1 %v15537_v12  ;;  %v7253_v12 = vld [vmem:[#allocation8 + $0x398] sm:$0xff] }
 0x689   : > { %11105 = vmatprep.mubr.f32.mxu1 %v15538_v0  ;;  %v6783_v0 = vld [vmem:[#allocation2 + $0x47] sm:$0xff] }
 0x68c   : > { %11106 = vmatmul.mubr.f32.gmra.mrb[32].mxu1 %v15539_v63  ;;  %v11957_v63 = vpack.c.bf16 %v7253_v12, %v7252_v54  ;;  %v7258_v54 = vld [vmem:[#allocation8 + $0x3c0] sm:$0xff]  ;;  %v7259_v12 = vld [vmem:[#allocation8 + $0x3c8] sm:$0xff] }
 0x68d   : > { %11108 = vmatprep.mubr.f32.mxu1 %v15540_v11  ;;  %v6784_v11 = vld [vmem:[#allocation2 + $0x4f] sm:$0xff] }
 0x690   : > { %11109 = vmatmul.mubr.f32.gmra.mrb[34].mxu1 %v15541_v43  ;;  %v7254_v43 = vld [vmem:[#allocation8 + $0x3a0] sm:$0xff] }
 0x691   : > { %11111 = vmatprep.mubr.f32.mxu1 %v15542_v56  ;;  %v6785_v56 = vld [vmem:[#allocation2 + $0x57] sm:$0xff] }
 0x694   : > { %11112 = vmatmul.mubr.f32.gmra.mrb[36].mxu1 %v15543_v2 }
 0x695   : > { %11114 = vmatprep.mubr.f32.mxu1 %v15544_v51  ;;  %v6786_v51 = vld [vmem:[#allocation2 + $0x5f] sm:$0xff] }
 0x698   : > { %11115 = vmatmul.mubr.f32.gmra.mrb[38].mxu1 %v15545_v26  ;;  %v7256_v26 = vld [vmem:[#allocation8 + $0x3b0] sm:$0xff] }
 0x699   : > { %11117 = vmatprep.mubr.f32.mxu1 %v15546_v61  ;;  %v7257_v61 = vld [vmem:[#allocation8 + $0x3b8] sm:$0xff] }
 0x69c   : > { %11118 = vmatmul.mubr.f32.gmra.mrb[40].mxu1 %v15547_v25  ;;  %v6787_v25 = vld [vmem:[#allocation2 + $0x67] sm:$0xff] }
 0x69d   : > { %11120 = vmatprep.mubr.f32.mxu1 %v15548_v49  ;;  %v11965_v49 = vpack.c.bf16 %v7257_v61, %v7256_v26  ;;  %v7262_v26 = vld [vmem:[#allocation8 + $0x3e0] sm:$0xff]  ;;  %v7263_v61 = vld [vmem:[#allocation8 + $0x3e8] sm:$0xff] }
 0x6a0   : > { %11121 = vmatmul.mubr.f32.gmra.mrb[42].mxu1 %v15549_v62  ;;  %v6788_v62 = vld [vmem:[#allocation2 + $0x6f] sm:$0xff] }
 0x6a1   : > { %11123 = vmatprep.mubr.f32.mxu1 %v14637_v1  ;;  %v7255_v1 = vld [vmem:[#allocation8 + $0x3a8] sm:$0xff] }
 0x6a2   : > { %v11961_v2 = vpack.c.bf16 %v7255_v1, %v7254_v43  ;;  %v7260_v43 = vld [vmem:[#allocation8 + $0x3d0] sm:$0xff]  ;;  %v7261_v1 = vld [vmem:[#allocation8 + $0x3d8] sm:$0xff] }
 0x6a4   : > { %11124 = vmatmul.mubr.f32.gmra.mrb[44].mxu1 %v14879_v13 }
 0x6a5   : > { %11126 = vmatprep.mubr.f32.mxu1 %v14882_v46 }
 0x6a8   : > { %11127 = vmatmul.mubr.f32.gmra.mrb[46].mxu1 %v14885_v35 }
 0x6a9   : > { %11161 = vmatprep.mubr.f32.mxu1 %v6783_v0  ;;  %v6789_v0 = vld [vmem:[#allocation2 + $0x77] sm:$0xff] }
 0x6ac   : > { %11162 = vmatmul.mubr.f32.vlgmr.msra.gmra.mrb[0].mxu1 %v6784_v11  ;;  %v6790_v11 = vld [vmem:[#allocation2 + $0x7f] sm:$0xff] }
 0x6ad   : > { %11164 = vmatprep.mubr.f32.mxu1 %v6785_v56  ;;  %11956 = vmatpush3.bf16.msra.mxu1 %v11953_v55  ;;  %v11969_v55 = vpack.c.bf16 %v7259_v12, %v7258_v54  ;;  %v6791_v56 = vld [vmem:[#allocation2 + $0x87] sm:$0xff]  ;;  %v7264_v54 = vld [vmem:[#allocation8 + $0x3f0] sm:$0xff]  ;;  %v7265_v12 = vld [vmem:[#allocation8 + $0x3f8] sm:$0xff] }
 0x6ae   : > { %11958 = vmatprep.subr.bf16.mxu1 %v11957_v63 }
 0x6b0   : > { %11165 = vmatmul.mubr.f32.gmra.mrb[2].mxu1 %v6786_v51  ;;  %v6792_v51 = vld [vmem:[#allocation2 + $0x8f] sm:$0xff] }
 0x6b1   : > { %11167 = vmatprep.mubr.f32.mxu1 %v6787_v25  ;;  %11960 = vmatpush3.bf16.msra.mxu1 %v11957_v63  ;;  %v11973_v63 = vpack.c.bf16 %v7261_v1, %v7260_v43  ;;  %v6793_v25 = vld [vmem:[#allocation2 + $0x97] sm:$0xff]  ;;  %v7668_v43 = vld [vmem:[#allocation8 + $0x400] sm:$0xff]  ;;  %v7669_v1 = vld [vmem:[#allocation8 + $0x408] sm:$0xff] }
 0x6b2   : > { %11962 = vmatprep.subr.bf16.mxu1 %v11961_v2 }
 0x6b4   : > { %11168 = vmatmul.mubr.f32.gmra.mrb[4].mxu1 %v6788_v62  ;;  %v6794_v62 = vld [vmem:[#allocation2 + $0x9f] sm:$0xff] }
 0x6b5   : > { %11170 = vmatprep.mubr.f32.mxu1 %v6789_v0  ;;  %11964 = vmatpush3.bf16.msra.mxu1 %v11961_v2  ;;  %v11977_v2 = vpack.c.bf16 %v7263_v61, %v7262_v26  ;;  %v6795_v0 = vld [vmem:[#allocation2 + $0xa7] sm:$0xff]  ;;  %v6801_v61 = vld [vmem:[#allocation2 + $0xd7] sm:$0xff] }
 0x6b6   : > { %11966 = vmatprep.subr.bf16.mxu1 %v11965_v49  ;;  %v6799_v26 = vld [vmem:[#allocation2 + $0xc7] sm:$0xff] }
 0x6b8   : > { %11171 = vmatmul.mubr.f32.gmra.mrb[6].mxu1 %v6790_v11  ;;  %v6796_v11 = vld [vmem:[#allocation2 + $0xaf] sm:$0xff] }
 0x6b9   : > { %11173 = vmatprep.mubr.f32.mxu1 %v6791_v56  ;;  %11968 = vmatpush3.bf16.msra.mxu1 %v11965_v49  ;;  %v11981_v49 = vpack.c.bf16 %v7265_v12, %v7264_v54  ;;  %v6797_v56 = vld [vmem:[#allocation2 + $0xb7] sm:$0xff]  ;;  %v6804_v54 = vld [vmem:[#allocation2 + $0xef] sm:$0xff]  ;;  %v6806_v12 = vld [vmem:[#allocation2 + $0xff] sm:$0xff] }
 0x6ba   : > { %11970 = vmatprep.subr.bf16.mxu1 %v11969_v55 }
 0x6bc   : > { %11174 = vmatmul.mubr.f32.gmra.mrb[8].mxu1 %v6792_v51  ;;  %v6798_v51 = vld [vmem:[#allocation2 + $0xbf] sm:$0xff] }
 0x6bd   : > { %11176 = vmatprep.mubr.f32.mxu1 %v6793_v25  ;;  %11972 = vmatpush3.bf16.msra.mxu1 %v11969_v55  ;;  %v14888_v55 = vpack.c.bf16 %v7669_v1, %v7668_v43  ;;  %v6802_v25 = vld [vmem:[#allocation2 + $0xdf] sm:$0xff]  ;;  %v6811_v1 = vld [vmem:[#allocation2 + $0x127] sm:$0xff] }
 0x6be   : > { %11974 = vmatprep.subr.bf16.mxu1 %v11973_v63  ;;  %v6810_v43 = vld [vmem:[#allocation2 + $0x11f] sm:$0xff] }
 0x6c0   : > { %11177 = vmatmul.mubr.f32.gmra.mrb[10].mxu1 %v6794_v62  ;;  %v6803_v62 = vld [vmem:[#allocation2 + $0xe7] sm:$0xff] }
 0x6c1   : > { %11179 = vmatprep.mubr.f32.mxu1 %v6795_v0  ;;  %11976 = vmatpush3.bf16.msra.mxu1 %v11973_v63  ;;  %v6800_v63 = vld [vmem:[#allocation2 + $0xcf] sm:$0xff]  ;;  %v6807_v0 = vld [vmem:[#allocation2 + $0x107] sm:$0xff] }
 0x6c2   : > { %11978 = vmatprep.subr.bf16.mxu1 %v11977_v2 }
 0x6c4   : > { %11180 = vmatmul.mubr.f32.gmra.mrb[12].mxu1 %v6796_v11  ;;  %v6808_v11 = vld [vmem:[#allocation2 + $0x10f] sm:$0xff] }
 0x6c5   : > { %11182 = vmatprep.mubr.f32.mxu1 %v6797_v56  ;;  %11980 = vmatpush3.bf16.msra.mxu1 %v11977_v2  ;;  %v6805_v2 = vld [vmem:[#allocation2 + $0xf7] sm:$0xff]  ;;  %v6812_v56 = vld [vmem:[#allocation2 + $0x12f] sm:$0xff] }
 0x6c6   : > { %11982 = vmatprep.subr.bf16.mxu1 %v11981_v49 }
 0x6c8   : > { %11183 = vmatmul.mubr.f32.gmra.mrb[14].mxu1 %v6798_v51  ;;  %v6813_v51 = vld [vmem:[#allocation2 + $0x137] sm:$0xff] }
 0x6c9   : > { %11185 = vmatprep.mubr.f32.mxu1 %v6799_v26  ;;  %11984 = vmatpush3.bf16.msra.mxu1 %v11981_v49  ;;  %v6809_v49 = vld [vmem:[#allocation2 + $0x117] sm:$0xff]  ;;  %v6814_v26 = vld [vmem:[#allocation2 + $0x13f] sm:$0xff] }
 0x6ca   : > { %11986 = vmatprep.subr.bf16.mxu1 %v14888_v55 }
 0x6cc   : > { %11186 = vmatmul.mubr.f32.gmra.mrb[16].mxu1 %v6800_v63  ;;  %v6815_v63 = vld [vmem:[#allocation2 + $0x147] sm:$0xff] }
 0x6cd   : > { %11188 = vmatprep.mubr.f32.mxu1 %v6801_v61  ;;  %v6816_v61 = vld [vmem:[#allocation2 + $0x14f] sm:$0xff] }
 0x6d0   : > { %11189 = vmatmul.mubr.f32.gmra.mrb[18].mxu1 %v6802_v25  ;;  %v6817_v25 = vld [vmem:[#allocation2 + $0x157] sm:$0xff] }
 0x6d1   : > { %11191 = vmatprep.mubr.f32.mxu1 %v6803_v62  ;;  %v6818_v62 = vld [vmem:[#allocation2 + $0x15f] sm:$0xff] }
 0x6d4   : > { %11192 = vmatmul.mubr.f32.gmra.mrb[20].mxu1 %v6804_v54  ;;  %v6819_v54 = vld [vmem:[#allocation2 + $0x167] sm:$0xff] }
 0x6d5   : > { %11194 = vmatprep.mubr.f32.mxu1 %v6805_v2  ;;  %v6820_v2 = vld [vmem:[#allocation2 + $0x16f] sm:$0xff] }
 0x6d8   : > { %11195 = vmatmul.mubr.f32.gmra.mrb[22].mxu1 %v6806_v12  ;;  %v6821_v12 = vld [vmem:[#allocation2 + $0x177] sm:$0xff] }
 0x6d9   : > { %11197 = vmatprep.mubr.f32.mxu1 %v6807_v0  ;;  %v6822_v0 = vld [vmem:[#allocation2 + $0x17f] sm:$0xff] }
 0x6dc   : > { %11198 = vmatmul.mubr.f32.gmra.mrb[24].mxu1 %v6808_v11  ;;  %v6823_v11 = vld [vmem:[#allocation2 + $0x187] sm:$0xff] }
 0x6dd   : > { %11200 = vmatprep.mubr.f32.mxu1 %v6809_v49  ;;  %v6824_v49 = vld [vmem:[#allocation2 + $0x18f] sm:$0xff] }
 0x6e0   : > { %11201 = vmatmul.mubr.f32.gmra.mrb[26].mxu1 %v6810_v43  ;;  %v6829_v43 = vld [vmem:[#allocation2 + $0x1b7] sm:$0xff] }
 0x6e1   : > { %11203 = vmatprep.mubr.f32.mxu1 %v6811_v1  ;;  %v6828_v1 = vld [vmem:[#allocation2 + $0x1af] sm:$0xff] }
 0x6e4   : > { %11204 = vmatmul.mubr.f32.gmra.mrb[28].mxu1 %v6812_v56  ;;  %v6830_v56 = vld [vmem:[#allocation2 + $0x1bf] sm:$0xff] }
 0x6e5   : > { %11206 = vmatprep.mubr.f32.mxu1 %v6813_v51  ;;  %v7670_v51 = vld [vmem:[#allocation8 + $0x410] sm:$0xff] }
 0x6e8   : > { %11207 = vmatmul.mubr.f32.gmra.mrb[30].mxu1 %v6814_v26  ;;  %v7671_v26 = vld [vmem:[#allocation8 + $0x418] sm:$0xff] }
 0x6e9   : > { %11209 = vmatprep.mubr.f32.mxu1 %v6815_v63  ;;  %v11989_v63 = vpack.c.bf16 %v7671_v26, %v7670_v51  ;;  %v7655_v51 = vld [vmem:[#allocation2 + $0x169] sm:$0xff]  ;;  %v7656_v26 = vld [vmem:[#allocation2 + $0x171] sm:$0xff] }
 0x6ec   : > { %11210 = vmatmul.mubr.f32.gmra.mrb[32].mxu1 %v6816_v61  ;;  %v7672_v61 = vld [vmem:[#allocation8 + $0x420] sm:$0xff] }
 0x6ed   : > { %11212 = vmatprep.mubr.f32.mxu1 %v6817_v25  ;;  %v7673_v25 = vld [vmem:[#allocation8 + $0x428] sm:$0xff] }
 0x6f0   : > { %11213 = vmatmul.mubr.f32.gmra.mrb[34].mxu1 %v6818_v62  ;;  %v7676_v62 = vld [vmem:[#allocation8 + $0x440] sm:$0xff] }
 0x6f1   : > { %11215 = vmatprep.mubr.f32.mxu1 %v6819_v54  ;;  %v7677_v54 = vld [vmem:[#allocation8 + $0x448] sm:$0xff] }
 0x6f4   : > { %11216 = vmatmul.mubr.f32.gmra.mrb[36].mxu1 %v6820_v2  ;;  %v7681_v2 = vld [vmem:[#allocation8 + $0x468] sm:$0xff] }
 0x6f5   : > { %11218 = vmatprep.mubr.f32.mxu1 %v6821_v12  ;;  %v7683_v12 = vld [vmem:[#allocation8 + $0x478] sm:$0xff] }
 0x6f8   : > { %11219 = vmatmul.mubr.f32.gmra.mrb[38].mxu1 %v6822_v0  ;;  %v7649_v0 = vld [vmem:[#allocation2 + $0x139] sm:$0xff] }
 0x6f9   : > { %11221 = vmatprep.mubr.f32.mxu1 %v6823_v11  ;;  %v7650_v11 = vld [vmem:[#allocation2 + $0x141] sm:$0xff] }
 0x6fc   : > { %11222 = vmatmul.mubr.f32.gmra.mrb[40].mxu1 %v6824_v49  ;;  %v7651_v49 = vld [vmem:[#allocation2 + $0x149] sm:$0xff] }
 0x6fd   : > { %11224 = vmatprep.mubr.f32.mxu1 %v14686_v33  ;;  %v11993_v33 = vpack.c.bf16 %v7673_v25, %v7672_v61  ;;  %v7658_v61 = vld [vmem:[#allocation2 + $0x181] sm:$0xff]  ;;  %v7659_v25 = vld [vmem:[#allocation2 + $0x189] sm:$0xff] }
 0x700   : > { %11225 = vmatmul.mubr.f32.gmra.mrb[42].mxu1 %v14689_v23  ;;  %v7674_v23 = vld [vmem:[#allocation8 + $0x430] sm:$0xff] }
 0x701   : > { %11227 = vmatprep.mubr.f32.mxu1 %v14692_v30  ;;  %v7675_v30 = vld [vmem:[#allocation8 + $0x438] sm:$0xff] }
 0x704   : > { %11228 = vmatmul.mubr.f32.gmra.mrb[44].mxu1 %v6828_v1  ;;  %v7653_v1 = vld [vmem:[#allocation2 + $0x159] sm:$0xff] }
 0x705   : > { %11230 = vmatprep.mubr.f32.mxu1 %v6829_v43  ;;  %v7652_v43 = vld [vmem:[#allocation2 + $0x151] sm:$0xff] }
 0x708   : > { %11231 = vmatmul.mubr.f32.gmra.mrb[46].mxu1 %v6830_v56  ;;  %v7654_v56 = vld [vmem:[#allocation2 + $0x161] sm:$0xff] }
 0x709   : > { %11265 = vmatprep.mubr.f32.mxu1 %v14695_v18  ;;  %v11997_v18 = vpack.c.bf16 %v7675_v30, %v7674_v23  ;;  %v7664_v23 = vld [vmem:[#allocation2 + $0x1b1] sm:$0xff]  ;;  %v7665_v30 = vld [vmem:[#allocation2 + $0x1b9] sm:$0xff] }
 0x70c   : > { %11266 = vmatmul.mubr.f32.vlgmr.msra.gmra.mrb[0].mxu1 %v14698_v14  ;;  %v12001_v14 = vpack.c.bf16 %v7677_v54, %v7676_v62  ;;  %v14946_v62 = vld [vmem:[%s15204_s5] ss:$0 sm:$0xff] }
 0x70d   : > { %11268 = vmatprep.mubr.f32.mxu1 %v14701_v8  ;;  %11988 = vmatpush3.bf16.msra.mxu1 %v14888_v55  ;;  %v7678_v8 = vld [vmem:[#allocation8 + $0x450] sm:$0xff]  ;;  %v7679_v55 = vld [vmem:[#allocation8 + $0x458] sm:$0xff] }
 0x70e   : > { %11990 = vmatprep.subr.bf16.mxu1 %v11989_v63 }
 0x710   : > { %11269 = vmatmul.mubr.f32.gmra.mrb[2].mxu1 %v14704_v36  ;;  %v12005_v36 = vpack.c.bf16 %v7679_v55, %v7678_v8 }
 0x711   : > { %11271 = vmatprep.mubr.f32.mxu1 %v14707_v39  ;;  %11992 = vmatpush3.bf16.msra.mxu1 %v11989_v63  ;;  %v7680_v39 = vld [vmem:[#allocation8 + $0x460] sm:$0xff] }
 0x712   : > { %11994 = vmatprep.subr.bf16.mxu1 %v11993_v33  ;;  %v7657_v63 = vld [vmem:[#allocation2 + $0x179] sm:$0xff] }
 0x714   : > { %11272 = vmatmul.mubr.f32.gmra.mrb[4].mxu1 %v14710_v44  ;;  %v12009_v44 = vpack.c.bf16 %v7681_v2, %v7680_v39  ;;  %v15553_v39 = vld [vmem:[#allocation14_spill] sm:$0xff] }
 0x715   : > { %11274 = vmatprep.mubr.f32.mxu1 %v14713_v52  ;;  %11996 = vmatpush3.bf16.msra.mxu1 %v11993_v33  ;;  %v7682_v52 = vld [vmem:[#allocation8 + $0x470] sm:$0xff] }
 0x716   : > { %11998 = vmatprep.subr.bf16.mxu1 %v11997_v18  ;;  %v7660_v33 = vld [vmem:[#allocation2 + $0x191] sm:$0xff] }
 0x718   : > { %11275 = vmatmul.mubr.f32.gmra.mrb[6].mxu1 %v14716_v53  ;;  %v12013_v53 = vpack.c.bf16 %v7683_v12, %v7682_v52  ;;  %v15554_v12 = vld [vmem:[#allocation13_spill] sm:$0xff] }
 0x719   : > { %11277 = vmatprep.mubr.f32.mxu1 %v14719_v60  ;;  %12000 = vmatpush3.bf16.msra.mxu1 %v11997_v18  ;;  %v15550_v60 = vld [vmem:[#allocation97_spill] sm:$0xff] }
 0x71a   : > { %12002 = vmatprep.subr.bf16.mxu1 %v12001_v14  ;;  %v7666_v18 = vld [vmem:[#allocation2 + $0x1c1] sm:$0xff] }
 0x71c   : > { %11278 = vmatmul.mubr.f32.gmra.mrb[8].mxu1 %v14722_v16  ;;  %v15551_v16 = vld [vmem:[#allocation98_spill] sm:$0xff] }
 0x71d   : > { %11280 = vmatprep.mubr.f32.mxu1 %v14725_v34  ;;  %12004 = vmatpush3.bf16.msra.mxu1 %v12001_v14  ;;  %v15552_v34 = vld [vmem:[#allocation59_spill] sm:$0xff] }
 0x71e   : > { %12006 = vmatprep.subr.bf16.mxu1 %v12005_v36 }
 0x720   : > { %11281 = vmatmul.mubr.f32.gmra.mrb[10].mxu1 %v14728_v20  ;;  %v12861_v20 = vld [vmem:[#allocation2] sm:$0xff] }
 0x721   : > { %11283 = vmatprep.mubr.f32.mxu1 %v14733_v6  ;;  %12008 = vmatpush3.bf16.msra.mxu1 %v12005_v36  ;;  %v7619_v6 = vld [vmem:[#allocation2 + $0x49] sm:$0xff] }
 0x722   : > { %12010 = vmatprep.subr.bf16.mxu1 %v12009_v44 }
 0x724   : > { %11284 = vmatmul.mubr.f32.gmra.mrb[12].mxu1 %v14736_v3  ;;  %v7620_v3 = vld [vmem:[#allocation2 + $0x51] sm:$0xff] }
 0x725   : > { %11286 = vmatprep.mubr.f32.mxu1 %v14740_v17  ;;  %12012 = vmatpush3.bf16.msra.mxu1 %v12009_v44  ;;  %v7621_v17 = vld [vmem:[#allocation2 + $0x59] sm:$0xff] }
 0x726   : > { %12014 = vmatprep.subr.bf16.mxu1 %v12013_v53 }
 0x728   : > { %11287 = vmatmul.mubr.f32.gmra.mrb[14].mxu1 %v14743_v5  ;;  %v7622_v5 = vld [vmem:[#allocation2 + $0x61] sm:$0xff] }
 0x729   : > { %11289 = vmatprep.mubr.f32.mxu1 %v14746_v28  ;;  %12016 = vmatpush3.bf16.msra.mxu1 %v12013_v53  ;;  %v7623_v28 = vld [vmem:[#allocation2 + $0x69] sm:$0xff] }
 0x72c   : > { %11290 = vmatmul.mubr.f32.gmra.mrb[16].mxu1 %v14749_v45  ;;  %v7624_v45 = vld [vmem:[#allocation2 + $0x71] sm:$0xff] }
 0x72d   : > { %11292 = vmatprep.mubr.f32.mxu1 %v14752_v40  ;;  %v7625_v40 = vld [vmem:[#allocation2 + $0x79] sm:$0xff] }
 0x730   : > { %11293 = vmatmul.mubr.f32.gmra.mrb[18].mxu1 %v14755_v57  ;;  %v7626_v57 = vld [vmem:[#allocation2 + $0x81] sm:$0xff] }
 0x731   : > { %11295 = vmatprep.mubr.f32.mxu1 %v14758_v50  ;;  %v7627_v50 = vld [vmem:[#allocation2 + $0x89] sm:$0xff] }
 0x734   : > { %11296 = vmatmul.mubr.f32.gmra.mrb[20].mxu1 %v14761_v29  ;;  %v7628_v29 = vld [vmem:[#allocation2 + $0x91] sm:$0xff] }
 0x735   : > { %11298 = vmatprep.mubr.f32.mxu1 %v14764_v22  ;;  %v7629_v22 = vld [vmem:[#allocation2 + $0x99] sm:$0xff] }
 0x738   : > { %11299 = vmatmul.mubr.f32.gmra.mrb[22].mxu1 %v14767_v19  ;;  %v7630_v19 = vld [vmem:[#allocation2 + $0xa1] sm:$0xff] }
 0x739   : > { %11301 = vmatprep.mubr.f32.mxu1 %v14770_v27  ;;  %v7631_v27 = vld [vmem:[#allocation2 + $0xa9] sm:$0xff] }
 0x73c   : > { %11302 = vmatmul.mubr.f32.gmra.mrb[24].mxu1 %v14773_v58  ;;  %v7632_v58 = vld [vmem:[#allocation2 + $0xb1] sm:$0xff] }
 0x73d   : > { %11304 = vmatprep.mubr.f32.mxu1 %v14776_v9  ;;  %v7633_v9 = vld [vmem:[#allocation2 + $0xb9] sm:$0xff] }
 0x740   : > { %11305 = vmatmul.mubr.f32.gmra.mrb[26].mxu1 %v14779_v10  ;;  %v7634_v10 = vld [vmem:[#allocation2 + $0xc1] sm:$0xff] }
 0x741   : > { %11307 = vmatprep.mubr.f32.mxu1 %v14782_v24  ;;  %v7635_v24 = vld [vmem:[#allocation2 + $0xc9] sm:$0xff] }
 0x744   : > { %11308 = vmatmul.mubr.f32.gmra.mrb[28].mxu1 %v14785_v15  ;;  %v7636_v15 = vld [vmem:[#allocation2 + $0xd1] sm:$0xff] }
 0x745   : > { %11310 = vmatprep.mubr.f32.mxu1 %v14788_v32  ;;  %v7637_v32 = vld [vmem:[#allocation2 + $0xd9] sm:$0xff] }
 0x748   : > { %11311 = vmatmul.mubr.f32.gmra.mrb[30].mxu1 %v14791_v47  ;;  %v7638_v47 = vld [vmem:[#allocation2 + $0xe1] sm:$0xff] }
 0x749   : > { %11313 = vmatprep.mubr.f32.mxu1 %v14794_v7  ;;  %v7639_v7 = vld [vmem:[#allocation2 + $0xe9] sm:$0xff] }
 0x74c   : > { %11314 = vmatmul.mubr.f32.gmra.mrb[32].mxu1 %v14797_v48  ;;  %v7640_v48 = vld [vmem:[#allocation2 + $0xf1] sm:$0xff] }
 0x74d   : > { %11316 = vmatprep.mubr.f32.mxu1 %v14800_v4  ;;  %v7641_v4 = vld [vmem:[#allocation2 + $0xf9] sm:$0xff] }
 0x750   : > { %11317 = vmatmul.mubr.f32.gmra.mrb[34].mxu1 %v14803_v21  ;;  %v7642_v21 = vld [vmem:[#allocation2 + $0x101] sm:$0xff] }
 0x751   : > { %11319 = vmatprep.mubr.f32.mxu1 %v14806_v41  ;;  %v7643_v41 = vld [vmem:[#allocation2 + $0x109] sm:$0xff] }
 0x754   : > { %11320 = vmatmul.mubr.f32.gmra.mrb[36].mxu1 %v14809_v38  ;;  %v7644_v38 = vld [vmem:[#allocation2 + $0x111] sm:$0xff] }
 0x755   : > { %11322 = vmatprep.mubr.f32.mxu1 %v14812_v37  ;;  %v7645_v37 = vld [vmem:[#allocation2 + $0x119] sm:$0xff] }
 0x758   : > { %11323 = vmatmul.mubr.f32.gmra.mrb[38].mxu1 %v14815_v31  ;;  %v7646_v31 = vld [vmem:[#allocation2 + $0x121] sm:$0xff] }
 0x759   : > { %11325 = vmatprep.mubr.f32.mxu1 %v14818_v42  ;;  %v7647_v42 = vld [vmem:[#allocation2 + $0x129] sm:$0xff] }
 0x75c   : > { %11326 = vmatmul.mubr.f32.gmra.mrb[40].mxu1 %v15550_v60 }
 0x75d   : > { %11328 = vmatprep.mubr.f32.mxu1 %v15551_v16 }
 0x760   : > { %11329 = vmatmul.mubr.f32.gmra.mrb[42].mxu1 %v15552_v34 }
 0x761   : > { %11331 = vmatprep.mubr.f32.mxu1 %v14830_v59  ;;  %v7648_v59 = vld [vmem:[#allocation2 + $0x131] sm:$0xff] }
 0x764   : > { %11332 = vmatmul.mubr.f32.gmra.mrb[44].mxu1 %v12861_v20 }
 0x765   : > { %11334 = vmatprep.mubr.f32.mxu1 %v12861_v20 }
 0x768   : > { %11335 = vmatmul.mubr.f32.gmra.mrb[46].mxu1 %v12861_v20 }
 0x769   : > { %11369 = vmatprep.mubr.f32.mxu1 %v7619_v6 }
 0x76c   : > { %11370 = vmatmul.mubr.f32.vlgmr.msra.gmra.mrb[0].mxu1 %v7620_v3 }
 0x76d   : > { %11372 = vmatprep.mubr.f32.mxu1 %v7621_v17  ;;  %v15555_v17 = vld [vmem:[#allocation16_spill] sm:$0xff] }
 0x770   : > { %11373 = vmatmul.mubr.f32.gmra.mrb[2].mxu1 %v7622_v5 }
 0x771   : > { %11375 = vmatprep.mubr.f32.mxu1 %v7623_v28 }
 0x774   : > { %11376 = vmatmul.mubr.f32.gmra.mrb[4].mxu1 %v7624_v45 }
 0x775   : > { %11378 = vmatprep.mubr.f32.mxu1 %v7625_v40  ;;  %v15556_v40 = vld [vmem:[#allocation15_spill] sm:$0xff] }
 0x778   : > { %11379 = vmatmul.mubr.f32.gmra.mrb[6].mxu1 %v7626_v57 }
 0x779   : > { %11381 = vmatprep.mubr.f32.mxu1 %v7627_v50 }
 0x77c   : > { %11382 = vmatmul.mubr.f32.gmra.mrb[8].mxu1 %v7628_v29 }
 0x77d   : > { %11384 = vmatprep.mubr.f32.mxu1 %v7629_v22 }
 0x780   : > { %11385 = vmatmul.mubr.f32.gmra.mrb[10].mxu1 %v7630_v19 }
 0x781   : > { %11387 = vmatprep.mubr.f32.mxu1 %v7631_v27 }
 0x784   : > { %11388 = vmatmul.mubr.f32.gmra.mrb[12].mxu1 %v7632_v58 }
 0x785   : > { %11390 = vmatprep.mubr.f32.mxu1 %v7633_v9  ;;  %v15557_v9 = vld [vmem:[#allocation18_spill] sm:$0xff] }
 0x788   : > { %11391 = vmatmul.mubr.f32.gmra.mrb[14].mxu1 %v7634_v10 }
 0x789   : > { %11393 = vmatprep.mubr.f32.mxu1 %v7635_v24 }
 0x78c   : > { %11394 = vmatmul.mubr.f32.gmra.mrb[16].mxu1 %v7636_v15 }
 0x78d   : > { %11396 = vmatprep.mubr.f32.mxu1 %v7637_v32  ;;  %v15558_v32 = vld [vmem:[#allocation17_spill] sm:$0xff] }
 0x790   : > { %11397 = vmatmul.mubr.f32.gmra.mrb[18].mxu1 %v7638_v47 }
 0x791   : > { %11399 = vmatprep.mubr.f32.mxu1 %v7639_v7 }
 0x794   : > { %11400 = vmatmul.mubr.f32.gmra.mrb[20].mxu1 %v7640_v48 }
 0x795   : > { %11402 = vmatprep.mubr.f32.mxu1 %v7641_v4 }
 0x798   : > { %11403 = vmatmul.mubr.f32.gmra.mrb[22].mxu1 %v7642_v21 }
 0x799   : > { %11405 = vmatprep.mubr.f32.mxu1 %v7643_v41 }
 0x79c   : > { %11406 = vmatmul.mubr.f32.gmra.mrb[24].mxu1 %v7644_v38 }
 0x79d   : > { %11408 = vmatprep.mubr.f32.mxu1 %v7645_v37  ;;  %v15559_v37 = vld [vmem:[#allocation20_spill] sm:$0xff] }
 0x7a0   : > { %11409 = vmatmul.mubr.f32.gmra.mrb[26].mxu1 %v7646_v31 }
 0x7a1   : > { %11411 = vmatprep.mubr.f32.mxu1 %v7647_v42 }
 0x7a4   : > { %11412 = vmatmul.mubr.f32.gmra.mrb[28].mxu1 %v7648_v59 }
 0x7a5   : > { %11414 = vmatprep.mubr.f32.mxu1 %v7649_v0  ;;  %v15560_v0 = vld [vmem:[#allocation19_spill] sm:$0xff] }
 0x7a8   : > { %11415 = vmatmul.mubr.f32.gmra.mrb[30].mxu1 %v7650_v11 }
 0x7a9   : > { %11417 = vmatprep.mubr.f32.mxu1 %v7651_v49 }
 0x7ac   : > { %11418 = vmatmul.mubr.f32.gmra.mrb[32].mxu1 %v7652_v43 }
 0x7ad   : > { %11420 = vmatprep.mubr.f32.mxu1 %v7653_v1 }
 0x7b0   : > { %11421 = vmatmul.mubr.f32.gmra.mrb[34].mxu1 %v7654_v56 }
 0x7b1   : > { %11423 = vmatprep.mubr.f32.mxu1 %v7655_v51 }
 0x7b4   : > { %11424 = vmatmul.mubr.f32.gmra.mrb[36].mxu1 %v7656_v26 }
 0x7b5   : > { %11426 = vmatprep.mubr.f32.mxu1 %v7657_v63  ;;  %v15561_v63 = vld [vmem:[#allocation22_spill] sm:$0xff] }
 0x7b8   : > { %11427 = vmatmul.mubr.f32.gmra.mrb[38].mxu1 %v7658_v61 }
 0x7b9   : > { %11429 = vmatprep.mubr.f32.mxu1 %v7659_v25 }
 0x7bc   : > { %11430 = vmatmul.mubr.f32.gmra.mrb[40].mxu1 %v7660_v33 }
 0x7bd   : > { %11432 = vmatprep.mubr.f32.mxu1 %v14879_v13  ;;  %v14951_v13 = vld [vmem:[%s15205_s6] ss:$0 sm:$0xff] }
 0x7c0   : > { %11433 = vmatmul.mubr.f32.gmra.mrb[42].mxu1 %v14882_v46 }
 0x7c1   : > { %11435 = vmatprep.mubr.f32.mxu1 %v14885_v35 }
 0x7c4   : > { %11436 = vmatmul.mubr.f32.gmra.mrb[44].mxu1 %v7664_v23  ;;  %v15562_v23 = vld [vmem:[#allocation21_spill] sm:$0xff] }
 0x7c5   : > { %11438 = vmatprep.mubr.f32.mxu1 %v7665_v30 }
 0x7c8   : > { %11439 = vmatmul.mubr.f32.gmra.mrb[46].mxu1 %v7666_v18 }
 0x83f   : > { %v11371_v54 = vpop.f32.mrb[0].mxu1 }
 0x840   : > { %v8045_v46 = vmul.f32 %v11371_v54, %v14946_v62  ;;  %v7750_v35 = vpop.f32.mrb[1].mxu1 }
 0x841   : > { %v8044_v14 = vmul.f32 %v14946_v62, %v7750_v35 }
 0x842   : > { %v8100_v8 = vadd.f32 %v14951_v13, %v8045_v46 }
 0x843   : > { %v8099_v55 = vadd.f32 %v14951_v13, %v8044_v14  ;;  %v11374_v36 = vpop.f32.mrb[2].mxu1 }
 0x844   : > { %v8148_v2 = vadd.f32 %v8100_v8, %v15553_v39  ;;  %v8047_v44 = vmul.f32 %v11374_v36, %v14946_v62  ;;  %v7760_v52 = vpop.f32.mrb[3].mxu1 }
 0x845   : > { %v8147_v53 = vadd.f32 %v8099_v55, %v15554_v12  ;;  %v8046_v60 = vmul.f32 %v14946_v62, %v7760_v52  ;;  %v15563_v55 = vld [vmem:[#allocation24_spill] sm:$0xff] }
 0x846   : > { %v8196_v16 = vmax.f32 %v8148_v2, 0.0  ;;  %v8102_v34 = vadd.f32 %v14951_v13, %v8047_v44  ;;  %v15564_v44 = vld [vmem:[#allocation23_spill] sm:$0xff] }
 0x847   : > { %v8195_v20 = vmax.f32 %v8147_v53, 0.0  ;;  %v8101_v6 = vadd.f32 %v14951_v13, %v8046_v60  ;;  %v11377_v3 = vpop.f32.mrb[4].mxu1 }
 0x848   : > { %8244 = vst [vmem:[%s14964_s23 + $0x7] sm:$0xff] %v8196_v16  ;;  %v8150_v5 = vadd.f32 %v8102_v34, %v15555_v17  ;;  %v8049_v28 = vmul.f32 %v11377_v3, %v14946_v62  ;;  %v7770_v45 = vpop.f32.mrb[5].mxu1 }
 0x849   : > { %8243 = vst [vmem:[%s14964_s23 - $0x1] sm:$0xfe] %v8195_v20  ;;  %v8149_v57 = vadd.f32 %v8101_v6, %v15556_v40  ;;  %v8048_v50 = vmul.f32 %v14946_v62, %v7770_v45  ;;  %v15565_v6 = vld [vmem:[#allocation26_spill] sm:$0xff] }
 0x84a   : > { %v8198_v29 = vmax.f32 %v8150_v5, 0.0  ;;  %v8104_v22 = vadd.f32 %v14951_v13, %v8049_v28  ;;  %v15566_v28 = vld [vmem:[#allocation25_spill] sm:$0xff] }
 0x84b   : > { %v8197_v19 = vmax.f32 %v8149_v57, 0.0  ;;  %v8103_v27 = vadd.f32 %v14951_v13, %v8048_v50  ;;  %v11380_v58 = vpop.f32.mrb[6].mxu1 }
 0x84c   : > { %8246 = vst [vmem:[%s14964_s23 + $0xf] sm:$0xfe] %v8198_v29  ;;  %v8152_v10 = vadd.f32 %v8104_v22, %v15557_v9  ;;  %v8051_v24 = vmul.f32 %v11380_v58, %v14946_v62  ;;  %v7780_v15 = vpop.f32.mrb[7].mxu1 }
 0x84d   : > { %8245 = vst [vmem:[%s14964_s23 + $0xf] sm:$0x1] %v8197_v19  ;;  %v8151_v47 = vadd.f32 %v8103_v27, %v15558_v32  ;;  %v8050_v7 = vmul.f32 %v14946_v62, %v7780_v15  ;;  %v15567_v27 = vld [vmem:[#allocation28_spill] sm:$0xff] }
 0x84e   : > { %v8200_v48 = vmax.f32 %v8152_v10, 0.0  ;;  %v8106_v4 = vadd.f32 %v14951_v13, %v8051_v24  ;;  %v15568_v24 = vld [vmem:[#allocation27_spill] sm:$0xff] }
 0x84f   : > { %v8199_v21 = vmax.f32 %v8151_v47, 0.0  ;;  %v8105_v41 = vadd.f32 %v14951_v13, %v8050_v7  ;;  %v11383_v38 = vpop.f32.mrb[8].mxu1 }
 0x850   : > { %8248 = vst [vmem:[%s14964_s23 + $0x1f] sm:$0x1] %v8200_v48  ;;  %v8154_v31 = vadd.f32 %v8106_v4, %v15559_v37  ;;  %v8053_v42 = vmul.f32 %v11383_v38, %v14946_v62  ;;  %v7790_v59 = vpop.f32.mrb[9].mxu1 }
 0x851   : > { %8247 = vst [vmem:[%s14964_s23 + $0x17] sm:$0xff] %v8199_v21  ;;  %v8153_v11 = vadd.f32 %v8105_v41, %v15560_v0  ;;  %v8052_v49 = vmul.f32 %v14946_v62, %v7790_v59  ;;  %v15569_v41 = vld [vmem:[#allocation30_spill] sm:$0xff] }
 0x852   : > { %v8202_v43 = vmax.f32 %v8154_v31, 0.0  ;;  %v8108_v1 = vadd.f32 %v14951_v13, %v8053_v42  ;;  %v15570_v42 = vld [vmem:[#allocation29_spill] sm:$0xff] }
 0x853   : > { %v8201_v56 = vmax.f32 %v8153_v11, 0.0  ;;  %v8107_v51 = vadd.f32 %v14951_v13, %v8052_v49  ;;  %v11386_v26 = vpop.f32.mrb[10].mxu1 }
 0x854   : > { %8250 = vst [vmem:[%s14964_s23 + $0x27] sm:$0xff] %v8202_v43  ;;  %v8156_v61 = vadd.f32 %v8108_v1, %v15561_v63  ;;  %v8055_v25 = vmul.f32 %v11386_v26, %v14946_v62  ;;  %v7800_v33 = vpop.f32.mrb[11].mxu1 }
 0x855   : > { %8249 = vst [vmem:[%s14964_s23 + $0x1f] sm:$0xfe] %v8201_v56  ;;  %v8155_v30 = vadd.f32 %v8107_v51, %v15562_v23  ;;  %v8054_v18 = vmul.f32 %v14946_v62, %v7800_v33  ;;  %v15571_v51 = vld [vmem:[#allocation32_spill] sm:$0xff] }
 0x856   : > { %v8204_v54 = vmax.f32 %v8156_v61, 0.0  ;;  %v8110_v46 = vadd.f32 %v14951_v13, %v8055_v25  ;;  %v15572_v25 = vld [vmem:[#allocation31_spill] sm:$0xff] }
 0x857   : > { %v8203_v35 = vmax.f32 %v8155_v30, 0.0  ;;  %v8109_v14 = vadd.f32 %v14951_v13, %v8054_v18  ;;  %v11389_v8 = vpop.f32.mrb[12].mxu1 }
 0x858   : > { %8252 = vst [vmem:[%s14964_s23 + $0x2f] sm:$0xfe] %v8204_v54  ;;  %v8158_v36 = vadd.f32 %v8110_v46, %v15563_v55  ;;  %v8057_v39 = vmul.f32 %v11389_v8, %v14946_v62  ;;  %v7810_v2 = vpop.f32.mrb[13].mxu1 }
 0x859   : > { %8251 = vst [vmem:[%s14964_s23 + $0x2f] sm:$0x1] %v8203_v35  ;;  %v8157_v52 = vadd.f32 %v8109_v14, %v15564_v44  ;;  %v8056_v12 = vmul.f32 %v14946_v62, %v7810_v2  ;;  %v15573_v14 = vld [vmem:[#allocation34_spill] sm:$0xff] }
 0x85a   : > { %v8206_v53 = vmax.f32 %v8158_v36, 0.0  ;;  %v8112_v60 = vadd.f32 %v14951_v13, %v8057_v39  ;;  %v15574_v39 = vld [vmem:[#allocation33_spill] sm:$0xff] }
 0x85b   : > { %v8205_v16 = vmax.f32 %v8157_v52, 0.0  ;;  %v8111_v34 = vadd.f32 %v14951_v13, %v8056_v12  ;;  %v11392_v20 = vpop.f32.mrb[14].mxu1 }
 0x85c   : > { %8254 = vst [vmem:[%s14964_s23 + $0x3f] sm:$0x1] %v8206_v53  ;;  %v8160_v3 = vadd.f32 %v8112_v60, %v15565_v6  ;;  %v8059_v17 = vmul.f32 %v11392_v20, %v14946_v62  ;;  %v7820_v5 = vpop.f32.mrb[15].mxu1 }
 0x85d   : > { %8253 = vst [vmem:[%s14964_s23 + $0x37] sm:$0xff] %v8205_v16  ;;  %v8159_v45 = vadd.f32 %v8111_v34, %v15566_v28  ;;  %v8058_v40 = vmul.f32 %v14946_v62, %v7820_v5  ;;  %v15575_v34 = vld [vmem:[#allocation36_spill] sm:$0xff] }
 0x85e   : > { %v8208_v57 = vmax.f32 %v8160_v3, 0.0  ;;  %v8114_v50 = vadd.f32 %v14951_v13, %v8059_v17  ;;  %v15576_v17 = vld [vmem:[#allocation35_spill] sm:$0xff] }
 0x85f   : > { %v8207_v29 = vmax.f32 %v8159_v45, 0.0  ;;  %v8113_v22 = vadd.f32 %v14951_v13, %v8058_v40  ;;  %v11395_v19 = vpop.f32.mrb[16].mxu1 }
 0x860   : > { %8256 = vst [vmem:[%s14964_s23 + $0x47] sm:$0xff] %v8208_v57  ;;  %v8162_v58 = vadd.f32 %v8114_v50, %v15567_v27  ;;  %v8061_v9 = vmul.f32 %v11395_v19, %v14946_v62  ;;  %v7830_v10 = vpop.f32.mrb[17].mxu1 }
 0x861   : > { %8255 = vst [vmem:[%s14964_s23 + $0x3f] sm:$0xfe] %v8207_v29  ;;  %v8161_v15 = vadd.f32 %v8113_v22, %v15568_v24  ;;  %v8060_v32 = vmul.f32 %v14946_v62, %v7830_v10  ;;  %v15577_v22 = vld [vmem:[#allocation38_spill] sm:$0xff] }
 0x862   : > { %v8210_v47 = vmax.f32 %v8162_v58, 0.0  ;;  %v8116_v7 = vadd.f32 %v14951_v13, %v8061_v9  ;;  %v15578_v9 = vld [vmem:[#allocation37_spill] sm:$0xff] }
 0x863   : > { %v8209_v48 = vmax.f32 %v8161_v15, 0.0  ;;  %v8115_v4 = vadd.f32 %v14951_v13, %v8060_v32  ;;  %v11398_v21 = vpop.f32.mrb[18].mxu1 }
 0x864   : > { %8258 = vst [vmem:[%s14964_s23 + $0x4f] sm:$0xfe] %v8210_v47  ;;  %v8164_v38 = vadd.f32 %v8116_v7, %v15569_v41  ;;  %v8063_v37 = vmul.f32 %v11398_v21, %v14946_v62  ;;  %v7840_v31 = vpop.f32.mrb[19].mxu1 }
 0x865   : > { %8257 = vst [vmem:[%s14964_s23 + $0x4f] sm:$0x1] %v8209_v48  ;;  %v8163_v59 = vadd.f32 %v8115_v4, %v15570_v42  ;;  %v8062_v0 = vmul.f32 %v14946_v62, %v7840_v31  ;;  %v15579_v4 = vld [vmem:[#allocation40_spill] sm:$0xff] }
 0x866   : > { %v8212_v11 = vmax.f32 %v8164_v38, 0.0  ;;  %v8118_v49 = vadd.f32 %v14951_v13, %v8063_v37  ;;  %v15580_v37 = vld [vmem:[#allocation39_spill] sm:$0xff] }
 0x867   : > { %v8211_v43 = vmax.f32 %v8163_v59, 0.0  ;;  %v8117_v1 = vadd.f32 %v14951_v13, %v8062_v0  ;;  %v11401_v56 = vpop.f32.mrb[20].mxu1 }
 0x868   : > { %8260 = vst [vmem:[%s14964_s23 + $0x5f] sm:$0x1] %v8212_v11  ;;  %v8166_v26 = vadd.f32 %v8118_v49, %v15571_v51  ;;  %v8065_v63 = vmul.f32 %v11401_v56, %v14946_v62  ;;  %v7850_v61 = vpop.f32.mrb[21].mxu1 }
 0x869   : > { %8259 = vst [vmem:[%s14964_s23 + $0x57] sm:$0xff] %v8211_v43  ;;  %v8165_v33 = vadd.f32 %v8117_v1, %v15572_v25  ;;  %v8064_v23 = vmul.f32 %v14946_v62, %v7850_v61  ;;  %v15581_v1 = vld [vmem:[#allocation42_spill] sm:$0xff] }
 0x86a   : > { %v8214_v30 = vmax.f32 %v8166_v26, 0.0  ;;  %v8120_v18 = vadd.f32 %v14951_v13, %v8065_v63  ;;  %v15582_v63 = vld [vmem:[#allocation41_spill] sm:$0xff] }
 0x86b   : > { %v8213_v54 = vmax.f32 %v8165_v33, 0.0  ;;  %v8119_v46 = vadd.f32 %v14951_v13, %v8064_v23  ;;  %v11404_v35 = vpop.f32.mrb[22].mxu1 }
 0x86c   : > { %8262 = vst [vmem:[%s14964_s23 + $0x67] sm:$0xff] %v8214_v30  ;;  %v8168_v8 = vadd.f32 %v8120_v18, %v15573_v14  ;;  %v8067_v55 = vmul.f32 %v11404_v35, %v14946_v62  ;;  %v7860_v36 = vpop.f32.mrb[23].mxu1 }
 0x86d   : > { %8261 = vst [vmem:[%s14964_s23 + $0x5f] sm:$0xfe] %v8213_v54  ;;  %v8167_v2 = vadd.f32 %v8119_v46, %v15574_v39  ;;  %v8066_v44 = vmul.f32 %v14946_v62, %v7860_v36  ;;  %v15583_v46 = vld [vmem:[#allocation44_spill] sm:$0xff] }
 0x86e   : > { %v8216_v52 = vmax.f32 %v8168_v8, 0.0  ;;  %v8122_v12 = vadd.f32 %v14951_v13, %v8067_v55  ;;  %v15584_v55 = vld [vmem:[#allocation43_spill] sm:$0xff] }
 0x86f   : > { %v8215_v53 = vmax.f32 %v8167_v2, 0.0  ;;  %v8121_v60 = vadd.f32 %v14951_v13, %v8066_v44  ;;  %v11407_v16 = vpop.f32.mrb[24].mxu1 }
 0x870   : > { %8264 = vst [vmem:[%s14964_s23 + $0x6f] sm:$0xfe] %v8216_v52  ;;  %v8170_v20 = vadd.f32 %v8122_v12, %v15575_v34  ;;  %v8069_v6 = vmul.f32 %v11407_v16, %v14946_v62  ;;  %v7870_v3 = vpop.f32.mrb[25].mxu1 }
 0x871   : > { %8263 = vst [vmem:[%s14964_s23 + $0x6f] sm:$0x1] %v8215_v53  ;;  %v8169_v5 = vadd.f32 %v8121_v60, %v15576_v17  ;;  %v8068_v28 = vmul.f32 %v14946_v62, %v7870_v3  ;;  %v15585_v60 = vld [vmem:[#allocation46_spill] sm:$0xff] }
 0x872   : > { %v8218_v45 = vmax.f32 %v8170_v20, 0.0  ;;  %v8124_v40 = vadd.f32 %v14951_v13, %v8069_v6  ;;  %v15586_v6 = vld [vmem:[#allocation45_spill] sm:$0xff] }
 0x873   : > { %v8217_v57 = vmax.f32 %v8169_v5, 0.0  ;;  %v8123_v50 = vadd.f32 %v14951_v13, %v8068_v28  ;;  %v11410_v29 = vpop.f32.mrb[26].mxu1 }
 0x874   : > { %8266 = vst [vmem:[%s14964_s23 + $0x7f] sm:$0x1] %v8218_v45  ;;  %v8172_v19 = vadd.f32 %v8124_v40, %v15577_v22  ;;  %v8071_v27 = vmul.f32 %v11410_v29, %v14946_v62  ;;  %v7880_v58 = vpop.f32.mrb[27].mxu1 }
 0x875   : > { %8265 = vst [vmem:[%s14964_s23 + $0x77] sm:$0xff] %v8217_v57  ;;  %v8171_v10 = vadd.f32 %v8123_v50, %v15578_v9  ;;  %v8070_v24 = vmul.f32 %v14946_v62, %v7880_v58  ;;  %v15587_v50 = vld [vmem:[#allocation48_spill] sm:$0xff] }
 0x876   : > { %v8220_v15 = vmax.f32 %v8172_v19, 0.0  ;;  %v8126_v32 = vadd.f32 %v14951_v13, %v8071_v27  ;;  %v15588_v27 = vld [vmem:[#allocation47_spill] sm:$0xff] }
 0x877   : > { %v8219_v47 = vmax.f32 %v8171_v10, 0.0  ;;  %v8125_v7 = vadd.f32 %v14951_v13, %v8070_v24  ;;  %v11413_v48 = vpop.f32.mrb[28].mxu1 }
 0x878   : > { %8268 = vst [vmem:[%s14964_s23 + $0x87] sm:$0xff] %v8220_v15  ;;  %v8174_v21 = vadd.f32 %v8126_v32, %v15579_v4  ;;  %v8073_v41 = vmul.f32 %v11413_v48, %v14946_v62  ;;  %v7890_v38 = vpop.f32.mrb[29].mxu1 }
 0x879   : > { %8267 = vst [vmem:[%s14964_s23 + $0x7f] sm:$0xfe] %v8219_v47  ;;  %v8173_v31 = vadd.f32 %v8125_v7, %v15580_v37  ;;  %v8072_v42 = vmul.f32 %v14946_v62, %v7890_v38  ;;  %v15589_v7 = vld [vmem:[#allocation50_spill] sm:$0xff] }
 0x87a   : > { %v8222_v59 = vmax.f32 %v8174_v21, 0.0  ;;  %v8128_v0 = vadd.f32 %v14951_v13, %v8073_v41  ;;  %v15590_v41 = vld [vmem:[#allocation49_spill] sm:$0xff] }
 0x87b   : > { %v8221_v11 = vmax.f32 %v8173_v31, 0.0  ;;  %v8127_v49 = vadd.f32 %v14951_v13, %v8072_v42  ;;  %v11416_v43 = vpop.f32.mrb[30].mxu1 }
 0x87c   : > { %8270 = vst [vmem:[%s14964_s23 + $0x8f] sm:$0xfe] %v8222_v59  ;;  %v8176_v56 = vadd.f32 %v8128_v0, %v15581_v1  ;;  %v8075_v51 = vmul.f32 %v11416_v43, %v14946_v62  ;;  %v7900_v26 = vpop.f32.mrb[31].mxu1 }
 0x87d   : > { %8269 = vst [vmem:[%s14964_s23 + $0x8f] sm:$0x1] %v8221_v11  ;;  %v8175_v61 = vadd.f32 %v8127_v49, %v15582_v63  ;;  %v8074_v25 = vmul.f32 %v14946_v62, %v7900_v26  ;;  %v15591_v49 = vld [vmem:[#allocation52_spill] sm:$0xff] }
 0x87e   : > { %v8224_v33 = vmax.f32 %v8176_v56, 0.0  ;;  %v8130_v23 = vadd.f32 %v14951_v13, %v8075_v51  ;;  %v15592_v51 = vld [vmem:[#allocation51_spill] sm:$0xff] }
 0x87f   : > { %v8223_v30 = vmax.f32 %v8175_v61, 0.0  ;;  %v8129_v18 = vadd.f32 %v14951_v13, %v8074_v25  ;;  %v11419_v54 = vpop.f32.mrb[32].mxu1 }
 0x880   : > { %8272 = vst [vmem:[%s14964_s23 + $0x9f] sm:$0x1] %v8224_v33  ;;  %v8178_v35 = vadd.f32 %v8130_v23, %v15583_v46  ;;  %v8077_v14 = vmul.f32 %v11419_v54, %v14946_v62  ;;  %v7910_v8 = vpop.f32.mrb[33].mxu1 }
 0x881   : > { %8271 = vst [vmem:[%s14964_s23 + $0x97] sm:$0xff] %v8223_v30  ;;  %v8177_v36 = vadd.f32 %v8129_v18, %v15584_v55  ;;  %v8076_v39 = vmul.f32 %v14946_v62, %v7910_v8  ;;  %v15593_v18 = vld [vmem:[#allocation54_spill] sm:$0xff] }
 0x882   : > { %v8226_v2 = vmax.f32 %v8178_v35, 0.0  ;;  %v8132_v44 = vadd.f32 %v14951_v13, %v8077_v14  ;;  %v15594_v14 = vld [vmem:[#allocation53_spill] sm:$0xff] }
 0x883   : > { %v8225_v52 = vmax.f32 %v8177_v36, 0.0  ;;  %v8131_v12 = vadd.f32 %v14951_v13, %v8076_v39  ;;  %v11422_v53 = vpop.f32.mrb[34].mxu1 }
 0x884   : > { %8274 = vst [vmem:[%s14964_s23 + $0xa7] sm:$0xff] %v8226_v2  ;;  %v8180_v16 = vadd.f32 %v8132_v44, %v15585_v60  ;;  %v8079_v34 = vmul.f32 %v11422_v53, %v14946_v62  ;;  %v7920_v20 = vpop.f32.mrb[35].mxu1 }
 0x885   : > { %8273 = vst [vmem:[%s14964_s23 + $0x9f] sm:$0xfe] %v8225_v52  ;;  %v8179_v3 = vadd.f32 %v8131_v12, %v15586_v6  ;;  %v8078_v17 = vmul.f32 %v14946_v62, %v7920_v20  ;;  %v15595_v12 = vld [vmem:[#allocation56_spill] sm:$0xff] }
 0x886   : > { %v8228_v5 = vmax.f32 %v8180_v16, 0.0  ;;  %v8134_v28 = vadd.f32 %v14951_v13, %v8079_v34  ;;  %v15596_v34 = vld [vmem:[#allocation55_spill] sm:$0xff] }
 0x887   : > { %v8227_v45 = vmax.f32 %v8179_v3, 0.0  ;;  %v8133_v40 = vadd.f32 %v14951_v13, %v8078_v17  ;;  %v11425_v57 = vpop.f32.mrb[36].mxu1 }
 0x888   : > { %8276 = vst [vmem:[%s14964_s23 + $0xaf] sm:$0xfe] %v8228_v5  ;;  %v8182_v29 = vadd.f32 %v8134_v28, %v15587_v50  ;;  %v8081_v22 = vmul.f32 %v11425_v57, %v14946_v62  ;;  %v7930_v19 = vpop.f32.mrb[37].mxu1 }
 0x889   : > { %8275 = vst [vmem:[%s14964_s23 + $0xaf] sm:$0x1] %v8227_v45  ;;  %v8181_v58 = vadd.f32 %v8133_v40, %v15588_v27  ;;  %v8080_v9 = vmul.f32 %v14946_v62, %v7930_v19  ;;  %v15597_v40 = vld [vmem:[#allocation58_spill] sm:$0xff] }
 0x88a   : > { %v8230_v10 = vmax.f32 %v8182_v29, 0.0  ;;  %v8136_v24 = vadd.f32 %v14951_v13, %v8081_v22  ;;  %v15598_v22 = vld [vmem:[#allocation57_spill] sm:$0xff] }
 0x88b   : > { %v8229_v15 = vmax.f32 %v8181_v58, 0.0  ;;  %v8135_v32 = vadd.f32 %v14951_v13, %v8080_v9  ;;  %v11428_v47 = vpop.f32.mrb[38].mxu1 }
 0x88c   : > { %8278 = vst [vmem:[%s14964_s23 + $0xbf] sm:$0x1] %v8230_v10  ;;  %v8184_v48 = vadd.f32 %v8136_v24, %v15589_v7  ;;  %v8083_v4 = vmul.f32 %v11428_v47, %v14946_v62  ;;  %v7940_v21 = vpop.f32.mrb[39].mxu1  ;;  %v15600_v47 = vld [vmem:[#allocation79_spill] sm:$0xff] }
 0x88d   : > { %8277 = vst [vmem:[%s14964_s23 + $0xb7] sm:$0xff] %v8229_v15  ;;  %v8183_v38 = vadd.f32 %v8135_v32, %v15590_v41  ;;  %v8082_v37 = vmul.f32 %v14946_v62, %v7940_v21  ;;  %v15599_v15 = vld [vmem:[#allocation80_spill] sm:$0xff] }
 0x88e   : > { %v8232_v31 = vmax.f32 %v8184_v48, 0.0  ;;  %v8138_v42 = vadd.f32 %v14951_v13, %v8083_v4 }
 0x88f   : > { %v8231_v59 = vmax.f32 %v8183_v38, 0.0  ;;  %v8137_v0 = vadd.f32 %v14951_v13, %v8082_v37  ;;  %v11431_v11 = vpop.f32.mrb[40].mxu1 }
 0x890   : > { %8280 = vst [vmem:[%s14964_s23 + $0xc7] sm:$0xff] %v8232_v31  ;;  %v8186_v43 = vadd.f32 %v8138_v42, %v15591_v49  ;;  %v8085_v1 = vmul.f32 %v11431_v11, %v14946_v62  ;;  %v7950_v56 = vpop.f32.mrb[41].mxu1 }
 0x891   : > { %8279 = vst [vmem:[%s14964_s23 + $0xbf] sm:$0xfe] %v8231_v59  ;;  %v8185_v26 = vadd.f32 %v8137_v0, %v15592_v51  ;;  %v8084_v63 = vmul.f32 %v14946_v62, %v7950_v56 }
 0x892   : > { %v8234_v61 = vmax.f32 %v8186_v43, 0.0  ;;  %v8140_v25 = vadd.f32 %v14951_v13, %v8085_v1 }
 0x893   : > { %v8233_v33 = vmax.f32 %v8185_v26, 0.0  ;;  %v8139_v23 = vadd.f32 %v14951_v13, %v8084_v63  ;;  %v11434_v30 = vpop.f32.mrb[42].mxu1 }
 0x894   : > { %8282 = vst [vmem:[%s14964_s23 + $0xcf] sm:$0xfe] %v8234_v61  ;;  %v8188_v54 = vadd.f32 %v8140_v25, %v15593_v18  ;;  %v8087_v46 = vmul.f32 %v11434_v30, %v14946_v62  ;;  %v7960_v35 = vpop.f32.mrb[43].mxu1 }
 0x895   : > { %8281 = vst [vmem:[%s14964_s23 + $0xcf] sm:$0x1] %v8233_v33  ;;  %v8187_v8 = vadd.f32 %v8139_v23, %v15594_v14  ;;  %v8086_v55 = vmul.f32 %v14946_v62, %v7960_v35 }
 0x896   : > { %v8236_v36 = vmax.f32 %v8188_v54, 0.0  ;;  %v8142_v39 = vadd.f32 %v14951_v13, %v8087_v46 }
 0x897   : > { %v8235_v2 = vmax.f32 %v8187_v8, 0.0  ;;  %v8141_v44 = vadd.f32 %v14951_v13, %v8086_v55  ;;  %v11437_v52 = vpop.f32.mrb[44].mxu1 }
 0x898   : > { %8284 = vst [vmem:[%s14964_s23 + $0xdf] sm:$0x1] %v8236_v36  ;;  %v8190_v53 = vadd.f32 %v8142_v39, %v15595_v12  ;;  %v8089_v60 = vmul.f32 %v11437_v52, %v14946_v62  ;;  %v7970_v16 = vpop.f32.mrb[45].mxu1 }
 0x899   : > { %8283 = vst [vmem:[%s14964_s23 + $0xd7] sm:$0xff] %v8235_v2  ;;  %v8189_v20 = vadd.f32 %v8141_v44, %v15596_v34  ;;  %v8088_v6 = vmul.f32 %v14946_v62, %v7970_v16 }
 0x89a   : > { %v8238_v3 = vmax.f32 %v8190_v53, 0.0  ;;  %v8144_v17 = vadd.f32 %v14951_v13, %v8089_v60 }
 0x89b   : > { %v8237_v5 = vmax.f32 %v8189_v20, 0.0  ;;  %v8143_v28 = vadd.f32 %v14951_v13, %v8088_v6  ;;  %v11440_v45 = vpop.f32.mrb[46].mxu1 }
 0x89c   : > { %8286 = vst [vmem:[%s14964_s23 + $0xe7] sm:$0xff] %v8238_v3  ;;  %v8192_v57 = vadd.f32 %v8144_v17, %v15597_v40  ;;  %v8091_v50 = vmul.f32 %v11440_v45, %v14946_v62  ;;  %v7980_v29 = vpop.f32.mrb[47].mxu1 }
 0x89d   : > { %8285 = vst [vmem:[%s14964_s23 + $0xdf] sm:$0xfe] %v8237_v5  ;;  %v8191_v19 = vadd.f32 %v8143_v28, %v15598_v22  ;;  %v8090_v27 = vmul.f32 %v14946_v62, %v7980_v29 }
 0x89e   : > { %v8240_v58 = vmax.f32 %v8192_v57, 0.0  ;;  %v8146_v9 = vadd.f32 %v14951_v13, %v8091_v50 }
 0x89f   : > { %v8239_v10 = vmax.f32 %v8191_v19, 0.0  ;;  %v8145_v24 = vadd.f32 %v14951_v13, %v8090_v27 }
 0x8a0   : > { %8288 = vst [vmem:[%s14964_s23 + $0xef] sm:$0xfe] %v8240_v58  ;;  %v8194_v32 = vadd.f32 %v8146_v9, %v15599_v15 }
 0x8a1   : > { %8287 = vst [vmem:[%s14964_s23 + $0xef] sm:$0x1] %v8239_v10  ;;  %v8193_v7 = vadd.f32 %v8145_v24, %v15600_v47 }
 0x8a2   : > { %v8242_v48 = vmax.f32 %v8194_v32, 0.0 }
 0x8a3   : > { %v8241_v62 = vmax.f32 %v8193_v7, 0.0 }
 0x8a4   : > { %8290 = vst [vmem:[%s14964_s23 + $0xff] sm:$0x1] %v8242_v48 }
 0x8a5   : > { %8289 = vst [vmem:[%s14964_s23 + $0xf7] sm:$0xff] %v8241_v62 }
 0x8a6   : > { %12991 = shalt.err (!%p12988_p1)
}
 0x8a7   : > { %s12992_s15 = scalar_lea.hbm %s15151_s30, 4096  ;;  %s12996_s1 = scalar_lea.hbm %s15206_s7, 8192 }
 0x8a8   : > { %p12993_p13 = scmp.ne.s32.totalorder %s15151_s30, %s12992_s15  ;;  %p12997_p4 = scmp.lt.u32.totalorder %s15151_s30, %s15206_s7 }
 0x8a9   : > { %p12998_p5 = scmp.lt.u32.totalorder %s12996_s1, %s12992_s15  ;;  %p13000_p11 = scmp.lt.u32.totalorder %s12992_s15, %s15151_s30 }
 0x8aa   : > { %p12994_p6 = pnand %p12993_p13, %p15601_p0 }
 0x8ab   : > { %p12999_p8 = por %p12998_p5, %p12997_p4 }
 0x8ac   : > { %p12995_p10 = pneg %p12994_p6 }
 0x8ad   : > { %p13001_p2 = por %p13000_p11, %p12999_p8 }
 0x8af   : > { %p13002_p3 = pnand %p13001_p2, %p12995_p10 }
 0x8b1   : > { %13005 = shalt.err (!%p13002_p3)
}
 0x8b2   : > { %s13057_s11 = smov 128   ;;  %s13058_s18 = smov 8  }
 0x8b3   : > { %12798 = dma.vmem_to_hbm [thread:$0]  (%p15601_p0), %s15153_s21, 4096, %s15151_s30, %s8292_s28, %s13057_s11, %s13057_s11, %s13058_s18  }
 0x8b4 PF: > { %s8320_s9 = sand.u32 1, %s13036_s24   ;;  %p15602_p7 = scmp.ne.s32.totalorder %s15339_s8, 0 }
 0x8b5   : > { %p15603_p9 = scmp.ge.s32.totalorder %s13048_s27, 2  ;;  %s8321_s20 = scalar_lea.sflag [#allocation5], %s8320_s9 }
 0x8b7   : > { %p12812_p12 = pnand %p15603_p9, %p15602_p7 }
 0x8b9   : > { %13031 = dma.done.wait (!%p12812_p12), %s8321_s20, 4096  }
 0x8ba   : > { %13033 = vsyncadd (!%p12812_p12), %s8321_s20, 4294963200  ;;  %p21_p1 = scmp.ge.s32.totalorder %s13215_s12, 4   ;;  %s15604_s24 = smov %s13040_s25 }
 0x8bb   : > { %s15605_s25 = smov %s13044_s26  ;;  %s15606_s26 = smov %s13231_s17 }
 0x8bc   : > { %s15607_s27 = smov %s13215_s12  ;;  %23 = sbr.rel (!%p21_p1) target bundleno = 8 (0x8), region = 117 }
 0x8c3   :  { %8326 = vsyncpa [#allocation4], 1 }
 0x8c4   :  { %8328 = vsyncpa [#allocation4 + $0x1], 1 }
 0x8c5   :  { %8329 = vsyncpa [#allocation7], 1 }
 0x8c6   :  { %8330 = vsyncpa [#allocation5], 1 }
 0x8c7   :  { %8332 = vsyncpa [#allocation5 + $0x1], 1 }

</bundles_post_ra>
